<compile_context>
chip_gen: v7x
topology: tpu7x:2x2x1
jax: 0.10.0
libtpu: 0.0.40
codegen_flags: <defaults>
</compile_context>

<pallas_src>
import functools
import math

import jax
import jax.numpy as jnp
import numpy as np
from jax.experimental import pallas as pl
from jax.experimental.pallas import tpu as pltpu

# 48 MiB scoped VMEM: below v7x's 64 MiB physical ceiling, well inside the
# 128 MiB of v5e/v6e, and far above every tile footprint used here.
_VMEM_LIMIT = 48 * 1024 * 1024


def _round_up(x, m):
    return (x + m - 1) // m * m


# ----------------------------- Pallas kernels ------------------------------ #

def _mm_bias_kernel(x_ref, w_ref, b_ref, o_ref, *, relu):
    """out = maybe_relu(x @ w + shift) for one row tile (bf16 MXU, f32 acc)."""
    y = jnp.dot(x_ref[...], w_ref[...], preferred_element_type=jnp.float32)
    y = y + b_ref[...]
    if relu:
        y = jnp.maximum(y, 0.0)
    o_ref[...] = y.astype(o_ref.dtype)


def _mm_bias_res_relu_kernel(x_ref, w_ref, b_ref, r_ref, o_ref):
    """out = relu(x @ w + shift + residual) for one row tile (bf16 residual)."""
    y = jnp.dot(x_ref[...], w_ref[...], preferred_element_type=jnp.float32)
    y = y + b_ref[...] + r_ref[...].astype(jnp.float32)
    o_ref[...] = jnp.maximum(y, 0.0).astype(o_ref.dtype)


def _mm_bias_ktiled_kernel(x_ref, w_ref, b_ref, o_ref, acc_ref, *, relu):
    """K-tiled matmul: f32 VMEM accumulator across the reduction grid axis."""
    @pl.when(pl.program_id(1) == 0)
    def _():
        acc_ref[...] = jnp.zeros_like(acc_ref)

    acc_ref[...] += jnp.dot(x_ref[...], w_ref[...],
                            preferred_element_type=jnp.float32)

    @pl.when(pl.program_id(1) == pl.num_programs(1) - 1)
    def _():
        y = acc_ref[...] + b_ref[...]
        if relu:
            y = jnp.maximum(y, 0.0)
        o_ref[...] = y.astype(o_ref.dtype)


def _conv2_kernel(x0_ref, x1_ref, x2_ref, w_ref, b_ref, o_ref, *,
                  kh_offsets, out_rows):
    """3x3x3 conv (stride 1) for one compact output depth slice.

    x{0,1,2}_ref: (Hp*W, 3C) bf16 depth slices of the kw-pregathered,
                  spatially padded activation at padded depths d, d+dl, d+2dl.
    w_ref:        (9, 3C, C) bf16, tap index = kd*3 + kh, K index = kw*C + ci
                  (BN scale folded in).
    Each (kd, kh) tap is a contiguous static row-offset window of the matching
    depth stream; the 9 partial matmuls (K = 3C) accumulate in registers and
    are stored once with the bias + ReLU epilogue (compact H*W rows).
    """
    acc = None
    for kd, x_ref in enumerate((x0_ref, x1_ref, x2_ref)):
        for kh, off in enumerate(kh_offsets):
            part = jnp.dot(x_ref[pl.ds(off, out_rows), :],
                           w_ref[kd * 3 + kh],
                           preferred_element_type=jnp.float32)
            acc = part if acc is None else acc + part
    o_ref[...] = jnp.maximum(acc + b_ref[...], 0.0).astype(o_ref.dtype)


# ------------------------------- wrappers ----------------------------------- #

def mm_bias(x, w, shift, *, relu, residual=None, out_dtype=jnp.bfloat16,
            tm_max=512, tk_max=1024):
    """Row-tiled (and optionally K-tiled) fused (x @ w) + shift [+ res] [+ relu].

    Operands are cast to bf16 for the MXU; accumulation and epilogue are f32.
    w: (K, Cout) with BN scale already folded in; shift: (Cout,) f32.
    When `residual` is given (bf16) the final ReLU is always applied.
    """
    P, K = x.shape
    Cout = w.shape[1]

    # Row tiling: pad rows only to a multiple of 8; pick tm dividing the padded
    # row count when cheap (avoids junk-row matmul/writeback + extra pad pass).
    ppad8 = _round_up(P, 8)
    tm = min(tm_max, ppad8)
    if ppad8 % tm:
        g = math.gcd(ppad8, tm)
        if g >= 128:
            tm = g
    ppad = _round_up(ppad8, tm)

    # K (reduction) tiling for large K (im2col path) to bound VMEM.
    if K > 2 * tk_max:
        tk = tk_max
        kpad = _round_up(K, tk)
    else:
        tk, kpad = K, K
    nk = kpad // tk
    nm = ppad // tm

    xb = x.astype(jnp.bfloat16)
    wb = w.astype(jnp.bfloat16)
    if ppad != P or kpad != K:
        xb = jnp.pad(xb, ((0, ppad - P), (0, kpad - K)))
    if kpad != K:
        wb = jnp.pad(wb, ((0, kpad - K), (0, 0)))
    b2 = shift.reshape(1, Cout).astype(jnp.float32)

    if residual is not None:
        assert nk == 1, "residual epilogue only used for small-K (1x1x1) convs"
        rb = residual.astype(jnp.bfloat16)
        if ppad != P:
            rb = jnp.pad(rb, ((0, ppad - P), (0, 0)))
        out = pl.pallas_call(
            _mm_bias_res_relu_kernel,
            out_shape=jax.ShapeDtypeStruct((ppad, Cout), out_dtype),
            grid=(nm,),
            in_specs=[
                pl.BlockSpec((tm, kpad), lambda i: (i, 0)),
                pl.BlockSpec((kpad, Cout), lambda i: (0, 0)),
                pl.BlockSpec((1, Cout), lambda i: (0, 0)),
                pl.BlockSpec((tm, Cout), lambda i: (i, 0)),
            ],
            out_specs=pl.BlockSpec((tm, Cout), lambda i: (i, 0)),
            compiler_params=pltpu.CompilerParams(
                dimension_semantics=("parallel",),
                vmem_limit_bytes=_VMEM_LIMIT),
        )(xb, wb, b2, rb)
    elif nk == 1:
        out = pl.pallas_call(
            functools.partial(_mm_bias_kernel, relu=relu),
            out_shape=jax.ShapeDtypeStruct((ppad, Cout), out_dtype),
            grid=(nm,),
            in_specs=[
                pl.BlockSpec((tm, kpad), lambda i: (i, 0)),
                pl.BlockSpec((kpad, Cout), lambda i: (0, 0)),
                pl.BlockSpec((1, Cout), lambda i: (0, 0)),
            ],
            out_specs=pl.BlockSpec((tm, Cout), lambda i: (i, 0)),
            compiler_params=pltpu.CompilerParams(
                dimension_semantics=("parallel",),
                vmem_limit_bytes=_VMEM_LIMIT),
        )(xb, wb, b2)
    else:
        out = pl.pallas_call(
            functools.partial(_mm_bias_ktiled_kernel, relu=relu),
            out_shape=jax.ShapeDtypeStruct((ppad, Cout), out_dtype),
            grid=(nm, nk),
            in_specs=[
                pl.BlockSpec((tm, tk), lambda i, k: (i, k)),
                pl.BlockSpec((tk, Cout), lambda i, k: (k, 0)),
                pl.BlockSpec((1, Cout), lambda i, k: (0, 0)),
            ],
            out_specs=pl.BlockSpec((tm, Cout), lambda i, k: (i, 0)),
            scratch_shapes=[pltpu.VMEM((tm, Cout), jnp.float32)],
            compiler_params=pltpu.CompilerParams(
                dimension_semantics=("parallel", "arbitrary"),
                vmem_limit_bytes=_VMEM_LIMIT),
        )(xb, wb, b2)
    return out[:P] if ppad != P else out


def conv2_3x3x3_fused(y1, w9, shift, *, dilation):
    """3x3x3 conv (stride 1, padding=dilation) + BN shift + ReLU, fully fused.

    y1:  (N, D, H, W, C) bf16 channels-last activation.
    w9:  (9, 3C, C) bf16; tap index = kd*3 + kh, K index = kw*C + ci
         (BN scale folded).
    Returns compact rows (N * D*H*W, C) bf16 (no post-kernel compaction pass).
    """
    N, D, H, W, C = y1.shape
    dl = dilation
    Dp, Hp = D + 2 * dl, H + 2 * dl

    # Pad spatially and pre-gather the kw taps into the K dim (K = 3C); the
    # output W axis is therefore already compact.
    xp = jnp.pad(y1, ((0, 0), (dl, dl), (dl, dl), (dl, dl), (0, 0)))
    xw = jnp.concatenate(
        [xp[:, :, :, kw * dl:kw * dl + W, :] for kw in range(3)], axis=-1)
    xw = xw.reshape(N, Dp, Hp * W, 3 * C)            # (N, Dp, rows, 3C)

    b2 = shift.reshape(1, C).astype(jnp.float32)
    kh_offsets = tuple(kh * dl * W for kh in range(3))
    out_rows = H * W

    def stream_spec(kd):
        # Same array, depth-shifted by kd*dl: handles the kd taps without
        # overlapping blocks or a giant whole-sample VMEM window.
        return pl.BlockSpec((None, None, Hp * W, 3 * C),
                            lambda n, d, kd=kd: (n, d + kd * dl, 0, 0))

    out = pl.pallas_call(
        functools.partial(_conv2_kernel, kh_offsets=kh_offsets,
                          out_rows=out_rows),
        out_shape=jax.ShapeDtypeStruct((N, D, out_rows, C), jnp.bfloat16),
        grid=(N, D),
        in_specs=[
            stream_spec(0), stream_spec(1), stream_spec(2),
            pl.BlockSpec((9, 3 * C, C), lambda n, d: (0, 0, 0)),
            pl.BlockSpec((1, C), lambda n, d: (0, 0)),
        ],
        out_specs=pl.BlockSpec((None, None, out_rows, C),
                               lambda n, d: (n, d, 0, 0)),
        compiler_params=pltpu.CompilerParams(
            dimension_semantics=("parallel", "parallel"),
            vmem_limit_bytes=_VMEM_LIMIT),
    )(xw, xw, xw, w9, b2)
    return out.reshape(N * D * out_rows, C)


def _im2col_3d(x, ksize, stride, dilation, padding):
    """Fallback (stride > 1): (N,D,H,W,C) -> (N,Do,Ho,Wo, ksize^3*C) tap-major."""
    N, D, H, W, C = x.shape
    xp = jnp.pad(x, ((0, 0), (padding, padding), (padding, padding),
                     (padding, padding), (0, 0)))

    def out_sz(s):
        return (s + 2 * padding - dilation * (ksize - 1) - 1) // stride + 1

    Do, Ho, Wo = out_sz(D), out_sz(H), out_sz(W)
    taps = []
    for kd in range(ksize):
        for kh in range(ksize):
            for kw in range(ksize):
                taps.append(xp[
                    :,
                    kd * dilation: kd * dilation + stride * (Do - 1) + 1: stride,
                    kh * dilation: kh * dilation + stride * (Ho - 1) + 1: stride,
                    kw * dilation: kw * dilation + stride * (Wo - 1) + 1: stride,
                    :,
                ])
    return jnp.concatenate(taps, axis=-1), (Do, Ho, Wo)


def bn_fold(w, bn, eps=1e-5):
    """Fold inference-BN scale into the conv weight's output-channel dim.

    Returns (bf16 weight with scale folded, f32 shift)."""
    gamma, beta, mean, var = bn
    scale = gamma / jnp.sqrt(var + eps)
    shift = beta - mean * scale
    return (w * scale).astype(jnp.bfloat16), shift.astype(jnp.float32)


def bottleneck_forward(x_ncdhw, params, *, stride=1, dilation=1):
    """Bottleneck forward.  Input/output are NCDHW like the PyTorch module.

    `params` holds PyTorch-layout (OIDHW) conv weights and BN tuples
    (gamma, beta, running_mean, running_var)."""
    # cast to bf16 BEFORE the layout transpose (halves that HBM pass)
    x = jnp.transpose(x_ncdhw.astype(jnp.bfloat16), (0, 2, 3, 4, 1))  # NDHWC
    N, D, H, W, Cin = x.shape
    C = params["conv1_w"].shape[0]
    Cexp = params["conv3_w"].shape[0]

    # weight prep: kernel layout + BN-scale folding + bf16 cast (trace-time)
    w1, b1 = bn_fold(params["conv1_w"][:, :, 0, 0, 0].T, params["bn1"])
    w3, b3 = bn_fold(params["conv3_w"][:, :, 0, 0, 0].T, params["bn3"])
    w2t = jnp.transpose(params["conv2_w"], (2, 3, 4, 1, 0))  # (kd,kh,kw,Ci,Co)

    # conv1 (1x1x1) + bn1 + relu
    y1 = mm_bias(x.reshape(-1, Cin), w1, b1, relu=True, out_dtype=jnp.bfloat16)
    y1 = y1.reshape(N, D, H, W, C)

    # conv2 (3x3x3) + bn2 + relu
    if stride == 1:
        w9, b2 = bn_fold(w2t.reshape(9, 3 * C, C), params["bn2"])
        y2 = conv2_3x3x3_fused(y1, w9, b2, dilation=dilation)
        Do, Ho, Wo = D, H, W
    else:
        # TODO(synk): strided 3x3x3 conv still uses an im2col + (K-tiled) matmul path.
        w2c, b2 = bn_fold(w2t.reshape(27 * C, C), params["bn2"])
        patches, (Do, Ho, Wo) = _im2col_3d(y1, 3, stride, dilation, dilation)
        y2 = mm_bias(patches.reshape(-1, 27 * C), w2c, b2, relu=True,
                     out_dtype=jnp.bfloat16)

    # residual branch (optional downsample = strided 1x1x1 conv + bn0), bf16
    if params.get("down_w") is not None:
        xs = x[:, ::stride, ::stride, ::stride, :] if stride > 1 else x
        w0, b0 = bn_fold(params["down_w"][:, :, 0, 0, 0].T, params["bn0"])
        res = mm_bias(xs.reshape(-1, Cin), w0, b0, relu=False,
                      out_dtype=jnp.bfloat16)
    else:
        assert stride == 1 and Cin == Cexp, (
            "identity shortcut requires stride==1 and in_channels==channels*4")
        res = x.reshape(-1, Cin)

    # conv3 (1x1x1) + bn3 + residual add + relu, fused in one kernel (bf16 out)
    out = mm_bias(y2, w3, b3, relu=True, residual=res, out_dtype=jnp.bfloat16)
    out = out.reshape(N, Do, Ho, Wo, Cexp)
    # final NCDHW transpose; f32 cast fuses into the same pass
    return jnp.transpose(out, (0, 4, 1, 2, 3)).astype(jnp.float32)


# --------------------------- pure-JAX reference ----------------------------- #

def ref_forward(x, p, stride, dilation):
    dn = ("NCDHW", "OIDHW", "NCDHW")
    hi = jax.lax.Precision.HIGHEST

    def conv(x, w, stride=1, padding=0, dil=1):
        return jax.lax.conv_general_dilated(
            x, w, window_strides=(stride,) * 3, padding=[(padding, padding)] * 3,
            rhs_dilation=(dil,) * 3, dimension_numbers=dn, precision=hi)

    def bn(x, bnp, eps=1e-5):
        g, b, m, v = bnp
        sc = (g / jnp.sqrt(v + eps)).reshape(1, -1, 1, 1, 1)
        sh = (b - m * g / jnp.sqrt(v + eps)).reshape(1, -1, 1, 1, 1)
        return x * sc + sh

    out = jax.nn.relu(bn(conv(x, p["conv1_w"]), p["bn1"]))
    out = jax.nn.relu(bn(conv(out, p["conv2_w"], stride, dilation, dilation),
                         p["bn2"]))
    out = bn(conv(out, p["conv3_w"]), p["bn3"])
    if p.get("down_w") is not None:
        residual = bn(conv(x, p["down_w"], stride), p["bn0"])
    else:
        residual = x
    return jax.nn.relu(out + residual)


# ----------------------------------- main ----------------------------------- #

if __name__ == "__main__":
    N, Cin, D, H, W = 2, 8, 8, 8, 8
    channels = 4
    Cexp = channels * 4  # expansion = 4

    keys = jax.random.split(jax.random.PRNGKey(0), 10)

    def w_init(k, shape, fan_in):
        return jax.random.normal(k, shape, jnp.float32) / math.sqrt(fan_in)

    def bn_params(k, c):
        k1, k2, k3, k4 = jax.random.split(k, 4)
        return (jax.random.uniform(k1, (c,), jnp.float32, 0.5, 1.5),
                jax.random.normal(k2, (c,), jnp.float32) * 0.1,
                jax.random.normal(k3, (c,), jnp.float32) * 0.1,
                jax.random.uniform(k4, (c,), jnp.float32, 0.5, 1.5))

    # PyTorch-layout (OIDHW) weights + BN running stats
    params = dict(
        conv1_w=w_init(keys[0], (channels, Cin, 1, 1, 1), Cin),
        conv2_w=w_init(keys[1], (channels, channels, 3, 3, 3), channels * 27),
        conv3_w=w_init(keys[2], (Cexp, channels, 1, 1, 1), channels),
        down_w=w_init(keys[3], (Cexp, Cin, 1, 1, 1), Cin),  # Cin != Cexp
        bn0=bn_params(keys[4], Cexp),
        bn1=bn_params(keys[5], channels),
        bn2=bn_params(keys[6], channels),
        bn3=bn_params(keys[7], Cexp),
    )

    x = jax.random.normal(keys[8], (N, Cin, D, H, W), jnp.float32)

    # (stride, dilation): fused conv2 path, dilated fused path, strided fallback
    for stride, dilation in ((1, 1), (1, 2), (2, 1)):
        fwd = jax.jit(functools.partial(bottleneck_forward,
                                        stride=stride, dilation=dilation))
        out = jax.block_until_ready(fwd(x, params))
        ref = ref_forward(x, params, stride, dilation)
        np.testing.assert_allclose(np.asarray(out), np.asarray(ref),
                                   rtol=5e-2, atol=5e-2)

    print("KERNEL_OK")
</pallas_src>

<mosaic_0001>
module attributes {stable_mosaic.version = 11 : i64} {
  func.func @_mm_bias_kernel(%arg0: i32, %arg1: memref<512x8xbf16, #tpu.memory_space<vmem>>, %arg2: memref<8x4xbf16, #tpu.memory_space<vmem>>, %arg3: memref<1x4xf32, #tpu.memory_space<vmem>>, %arg4: memref<512x4xbf16, #tpu.memory_space<vmem>>) attributes {dimension_semantics = [#tpu.dimension_semantics<parallel>], iteration_bounds = array<i64: 2>, scalar_prefetch = 0 : i64, scratch_operands = 0 : i64, tpu.core_type = #tpu.core_type<tc>, window_params = [{transform_indices = @transform_0, window_bounds = array<i64: 512, 8>}, {pipeline_mode = #tpu.pipeline_mode<synchronous>, transform_indices = @transform_1, window_bounds = array<i64: 8, 4>}, {pipeline_mode = #tpu.pipeline_mode<synchronous>, transform_indices = @transform_2, window_bounds = array<i64: 1, 4>}, {transform_indices = @transform_3, window_bounds = array<i64: 512, 4>}]} {
    %c0 = arith.constant 0 : index
    %c0_0 = arith.constant 0 : index
    %0 = vector.load %arg1[%c0, %c0_0] : memref<512x8xbf16, #tpu.memory_space<vmem>>, vector<512x8xbf16>
    %c0_1 = arith.constant 0 : index
    %c0_2 = arith.constant 0 : index
    %1 = vector.load %arg2[%c0_1, %c0_2] : memref<8x4xbf16, #tpu.memory_space<vmem>>, vector<8x4xbf16>
    %cst = arith.constant dense<0.000000e+00> : vector<512x4xf32>
    %2 = tpu.matmul %0, %1, %cst {dimension_numbers = #tpu.dot_dimension_numbers<[1], [0], [0], [1], [0, 0, 1, 1], [], []>} : vector<512x8xbf16>, vector<8x4xbf16>, vector<512x4xf32> -> vector<512x4xf32>
    %c0_3 = arith.constant 0 : index
    %c0_4 = arith.constant 0 : index
    %3 = vector.load %arg3[%c0_3, %c0_4] : memref<1x4xf32, #tpu.memory_space<vmem>>, vector<1x4xf32>
    %4 = vector.broadcast %3 : vector<1x4xf32> to vector<512x4xf32>
    %5 = arith.addf %2, %4 : vector<512x4xf32>
    %cst_5 = arith.constant 0.000000e+00 : f32
    %6 = vector.broadcast %cst_5 : f32 to vector<512x4xf32>
    %7 = arith.maximumf %5, %6 : vector<512x4xf32>
    %8 = arith.truncf %7 : vector<512x4xf32> to vector<512x4xbf16>
    %c0_6 = arith.constant 0 : index
    %c0_7 = arith.constant 0 : index
    %9 = vector.load %arg4[%c0_6, %c0_7] : memref<512x4xbf16, #tpu.memory_space<vmem>>, vector<512x4xbf16>
    tpu.vector_store %arg4[%c0_6, %c0_7], %8 {strides = array<i32>} : memref<512x4xbf16, #tpu.memory_space<vmem>>, vector<512x4xbf16>,
    return
  }
  func.func @transform_0(%arg0: i32) -> (i32, i32) {
    %c0_i32 = arith.constant 0 : i32
    %c0_i32_0 = arith.constant 0 : i32
    return %arg0, %c0_i32 : i32, i32
  }
  func.func @transform_1(%arg0: i32) -> (i32, i32) {
    %c0_i32 = arith.constant 0 : i32
    %c0_i32_0 = arith.constant 0 : i32
    %c0_i32_1 = arith.constant 0 : i32
    return %c0_i32, %c0_i32_0 : i32, i32
  }
  func.func @transform_2(%arg0: i32) -> (i32, i32) {
    %c0_i32 = arith.constant 0 : i32
    %c0_i32_0 = arith.constant 0 : i32
    %c0_i32_1 = arith.constant 0 : i32
    return %c0_i32, %c0_i32_0 : i32, i32
  }
  func.func @transform_3(%arg0: i32) -> (i32, i32) {
    %c0_i32 = arith.constant 0 : i32
    %c0_i32_0 = arith.constant 0 : i32
    return %arg0, %c0_i32 : i32, i32
  }
}

module attributes {stable_mosaic.version = 11 : i64} {
  func.func @_conv2_kernel(%arg0: i32, %arg1: i32, %arg2: memref<1x1x80x12xbf16, #tpu.memory_space<vmem>>, %arg3: memref<1x1x80x12xbf16, #tpu.memory_space<vmem>>, %arg4: memref<1x1x80x12xbf16, #tpu.memory_space<vmem>>, %arg5: memref<9x12x4xbf16, #tpu.memory_space<vmem>>, %arg6: memref<1x4xf32, #tpu.memory_space<vmem>>, %arg7: memref<1x1x64x4xbf16, #tpu.memory_space<vmem>>) attributes {dimension_semantics = [#tpu.dimension_semantics<parallel>, #tpu.dimension_semantics<parallel>], iteration_bounds = array<i64: 2, 8>, scalar_prefetch = 0 : i64, scratch_operands = 0 : i64, tpu.core_type = #tpu.core_type<tc>, window_params = [{transform_indices = @transform_0, window_bounds = array<i64: 1, 1, 80, 12>}, {transform_indices = @transform_1, window_bounds = array<i64: 1, 1, 80, 12>}, {transform_indices = @transform_2, window_bounds = array<i64: 1, 1, 80, 12>}, {pipeline_mode = #tpu.pipeline_mode<synchronous>, transform_indices = @transform_3, window_bounds = array<i64: 9, 12, 4>}, {pipeline_mode = #tpu.pipeline_mode<synchronous>, transform_indices = @transform_4, window_bounds = array<i64: 1, 4>}, {transform_indices = @transform_5, window_bounds = array<i64: 1, 1, 64, 4>}]} {
    %c0 = arith.constant 0 : index
    %c0_0 = arith.constant 0 : index
    %c0_1 = arith.constant 0 : index
    %c0_2 = arith.constant 0 : index
    %0 = vector.load %arg2[%c0, %c0_0, %c0_1, %c0_2] : memref<1x1x80x12xbf16, #tpu.memory_space<vmem>>, vector<1x1x64x12xbf16>
    %1 = vector.shape_cast %0 : vector<1x1x64x12xbf16> to vector<64x12xbf16>
    %c0_3 = arith.constant 0 : index
    %c0_4 = arith.constant 0 : index
    %c0_5 = arith.constant 0 : index
    %2 = vector.load %arg5[%c0_3, %c0_4, %c0_5] : memref<9x12x4xbf16, #tpu.memory_space<vmem>>, vector<1x12x4xbf16>
    %3 = vector.shape_cast %2 : vector<1x12x4xbf16> to vector<12x4xbf16>
    %cst = arith.constant dense<0.000000e+00> : vector<64x4xf32>
    %4 = tpu.matmul %1, %3, %cst {dimension_numbers = #tpu.dot_dimension_numbers<[1], [0], [0], [1], [0, 0, 1, 1], [], []>} : vector<64x12xbf16>, vector<12x4xbf16>, vector<64x4xf32> -> vector<64x4xf32>
    %c0_6 = arith.constant 0 : index
    %c0_7 = arith.constant 0 : index
    %c8 = arith.constant 8 : index
    %c0_8 = arith.constant 0 : index
    %5 = vector.load %arg2[%c0_6, %c0_7, %c8, %c0_8] : memref<1x1x80x12xbf16, #tpu.memory_space<vmem>>, vector<1x1x64x12xbf16>
    %6 = vector.shape_cast %5 : vector<1x1x64x12xbf16> to vector<64x12xbf16>
    %c1 = arith.constant 1 : index
    %c0_9 = arith.constant 0 : index
    %c0_10 = arith.constant 0 : index
    %7 = vector.load %arg5[%c1, %c0_9, %c0_10] : memref<9x12x4xbf16, #tpu.memory_space<vmem>>, vector<1x12x4xbf16>
    %8 = vector.shape_cast %7 : vector<1x12x4xbf16> to vector<12x4xbf16>
    %cst_11 = arith.constant dense<0.000000e+00> : vector<64x4xf32>
    %9 = tpu.matmul %6, %8, %cst_11 {dimension_numbers = #tpu.dot_dimension_numbers<[1], [0], [0], [1], [0, 0, 1, 1], [], []>} : vector<64x12xbf16>, vector<12x4xbf16>, vector<64x4xf32> -> vector<64x4xf32>
    %10 = arith.addf %4, %9 : vector<64x4xf32>
    %c0_12 = arith.constant 0 : index
    %c0_13 = arith.constant 0 : index
    %c16 = arith.constant 16 : index
    %c0_14 = arith.constant 0 : index
    %11 = vector.load %arg2[%c0_12, %c0_13, %c16, %c0_14] : memref<1x1x80x12xbf16, #tpu.memory_space<vmem>>, vector<1x1x64x12xbf16>
    %12 = vector.shape_cast %11 : vector<1x1x64x12xbf16> to vector<64x12xbf16>
    %c2 = arith.constant 2 : index
    %c0_15 = arith.constant 0 : index
    %c0_16 = arith.constant 0 : index
    %13 = vector.load %arg5[%c2, %c0_15, %c0_16] : memref<9x12x4xbf16, #tpu.memory_space<vmem>>, vector<1x12x4xbf16>
    %14 = vector.shape_cast %13 : vector<1x12x4xbf16> to vector<12x4xbf16>
    %cst_17 = arith.constant dense<0.000000e+00> : vector<64x4xf32>
    %15 = tpu.matmul %12, %14, %cst_17 {dimension_numbers = #tpu.dot_dimension_numbers<[1], [0], [0], [1], [0, 0, 1, 1], [], []>} : vector<64x12xbf16>, vector<12x4xbf16>, vector<64x4xf32> -> vector<64x4xf32>
    %16 = arith.addf %10, %15 : vector<64x4xf32>
    %c0_18 = arith.constant 0 : index
    %c0_19 = arith.constant 0 : index
    %c0_20 = arith.constant 0 : index
    %c0_21 = arith.constant 0 : index
    %17 = vector.load %arg3[%c0_18, %c0_19, %c0_20, %c0_21] : memref<1x1x80x12xbf16, #tpu.memory_space<vmem>>, vector<1x1x64x12xbf16>
    %18 = vector.shape_cast %17 : vector<1x1x64x12xbf16> to vector<64x12xbf16>
    %c3 = arith.constant 3 : index
    %c0_22 = arith.constant 0 : index
    %c0_23 = arith.constant 0 : index
    %19 = vector.load %arg5[%c3, %c0_22, %c0_23] : memref<9x12x4xbf16, #tpu.memory_space<vmem>>, vector<1x12x4xbf16>
    %20 = vector.shape_cast %19 : vector<1x12x4xbf16> to vector<12x4xbf16>
    %cst_24 = arith.constant dense<0.000000e+00> : vector<64x4xf32>
    %21 = tpu.matmul %18, %20, %cst_24 {dimension_numbers = #tpu.dot_dimension_numbers<[1], [0], [0], [1], [0, 0, 1, 1], [], []>} : vector<64x12xbf16>, vector<12x4xbf16>, vector<64x4xf32> -> vector<64x4xf32>
    %22 = arith.addf %16, %21 : vector<64x4xf32>
    %c0_25 = arith.constant 0 : index
    %c0_26 = arith.constant 0 : index
    %c8_27 = arith.constant 8 : index
    %c0_28 = arith.constant 0 : index
    %23 = vector.load %arg3[%c0_25, %c0_26, %c8_27, %c0_28] : memref<1x1x80x12xbf16, #tpu.memory_space<vmem>>, vector<1x1x64x12xbf16>
    %24 = vector.shape_cast %23 : vector<1x1x64x12xbf16> to vector<64x12xbf16>
    %c4 = arith.constant 4 : index
    %c0_29 = arith.constant 0 : index
    %c0_30 = arith.constant 0 : index
    %25 = vector.load %arg5[%c4, %c0_29, %c0_30] : memref<9x12x4xbf16, #tpu.memory_space<vmem>>, vector<1x12x4xbf16>
    %26 = vector.shape_cast %25 : vector<1x12x4xbf16> to vector<12x4xbf16>
    %cst_31 = arith.constant dense<0.000000e+00> : vector<64x4xf32>
    %27 = tpu.matmul %24, %26, %cst_31 {dimension_numbers = #tpu.dot_dimension_numbers<[1], [0], [0], [1], [0, 0, 1, 1], [], []>} : vector<64x12xbf16>, vector<12x4xbf16>, vector<64x4xf32> -> vector<64x4xf32>
    %28 = arith.addf %22, %27 : vector<64x4xf32>
    %c0_32 = arith.constant 0 : index
    %c0_33 = arith.constant 0 : index
    %c16_34 = arith.constant 16 : index
    %c0_35 = arith.constant 0 : index
    %29 = vector.load %arg3[%c0_32, %c0_33, %c16_34, %c0_35] : memref<1x1x80x12xbf16, #tpu.memory_space<vmem>>, vector<1x1x64x12xbf16>
    %30 = vector.shape_cast %29 : vector<1x1x64x12xbf16> to vector<64x12xbf16>
    %c5 = arith.constant 5 : index
    %c0_36 = arith.constant 0 : index
    %c0_37 = arith.constant 0 : index
    %31 = vector.load %arg5[%c5, %c0_36, %c0_37] : memref<9x12x4xbf16, #tpu.memory_space<vmem>>, vector<1x12x4xbf16>
    %32 = vector.shape_cast %31 : vector<1x12x4xbf16> to vector<12x4xbf16>
    %cst_38 = arith.constant dense<0.000000e+00> : vector<64x4xf32>
    %33 = tpu.matmul %30, %32, %cst_38 {dimension_numbers = #tpu.dot_dimension_numbers<[1], [0], [0], [1], [0, 0, 1, 1], [], []>} : vector<64x12xbf16>, vector<12x4xbf16>, vector<64x4xf32> -> vector<64x4xf32>
    %34 = arith.addf %28, %33 : vector<64x4xf32>
    %c0_39 = arith.constant 0 : index
    %c0_40 = arith.constant 0 : index
    %c0_41 = arith.constant 0 : index
    %c0_42 = arith.constant 0 : index
    %35 = vector.load %arg4[%c0_39, %c0_40, %c0_41, %c0_42] : memref<1x1x80x12xbf16, #tpu.memory_space<vmem>>, vector<1x1x64x12xbf16>
    %36 = vector.shape_cast %35 : vector<1x1x64x12xbf16> to vector<64x12xbf16>
    %c6 = arith.constant 6 : index
    %c0_43 = arith.constant 0 : index
    %c0_44 = arith.constant 0 : index
    %37 = vector.load %arg5[%c6, %c0_43, %c0_44] : memref<9x12x4xbf16, #tpu.memory_space<vmem>>, vector<1x12x4xbf16>
    %38 = vector.shape_cast %37 : vector<1x12x4xbf16> to vector<12x4xbf16>
    %cst_45 = arith.constant dense<0.000000e+00> : vector<64x4xf32>
    %39 = tpu.matmul %36, %38, %cst_45 {dimension_numbers = #tpu.dot_dimension_numbers<[1], [0], [0], [1], [0, 0, 1, 1], [], []>} : vector<64x12xbf16>, vector<12x4xbf16>, vector<64x4xf32> -> vector<64x4xf32>
    %40 = arith.addf %34, %39 : vector<64x4xf32>
    %c0_46 = arith.constant 0 : index
    %c0_47 = arith.constant 0 : index
    %c8_48 = arith.constant 8 : index
    %c0_49 = arith.constant 0 : index
    %41 = vector.load %arg4[%c0_46, %c0_47, %c8_48, %c0_49] : memref<1x1x80x12xbf16, #tpu.memory_space<vmem>>, vector<1x1x64x12xbf16>
    %42 = vector.shape_cast %41 : vector<1x1x64x12xbf16> to vector<64x12xbf16>
    %c7 = arith.constant 7 : index
    %c0_50 = arith.constant 0 : index
    %c0_51 = arith.constant 0 : index
    %43 = vector.load %arg5[%c7, %c0_50, %c0_51] : memref<9x12x4xbf16, #tpu.memory_space<vmem>>, vector<1x12x4xbf16>
    %44 = vector.shape_cast %43 : vector<1x12x4xbf16> to vector<12x4xbf16>
    %cst_52 = arith.constant dense<0.000000e+00> : vector<64x4xf32>
    %45 = tpu.matmul %42, %44, %cst_52 {dimension_numbers = #tpu.dot_dimension_numbers<[1], [0], [0], [1], [0, 0, 1, 1], [], []>} : vector<64x12xbf16>, vector<12x4xbf16>, vector<64x4xf32> -> vector<64x4xf32>
    %46 = arith.addf %40, %45 : vector<64x4xf32>
    %c0_53 = arith.constant 0 : index
    %c0_54 = arith.constant 0 : index
    %c16_55 = arith.constant 16 : index
    %c0_56 = arith.constant 0 : index
    %47 = vector.load %arg4[%c0_53, %c0_54, %c16_55, %c0_56] : memref<1x1x80x12xbf16, #tpu.memory_space<vmem>>, vector<1x1x64x12xbf16>
    %48 = vector.shape_cast %47 : vector<1x1x64x12xbf16> to vector<64x12xbf16>
    %c8_57 = arith.constant 8 : index
    %c0_58 = arith.constant 0 : index
    %c0_59 = arith.constant 0 : index
    %49 = vector.load %arg5[%c8_57, %c0_58, %c0_59] : memref<9x12x4xbf16, #tpu.memory_space<vmem>>, vector<1x12x4xbf16>
    %50 = vector.shape_cast %49 : vector<1x12x4xbf16> to vector<12x4xbf16>
    %cst_60 = arith.constant dense<0.000000e+00> : vector<64x4xf32>
    %51 = tpu.matmul %48, %50, %cst_60 {dimension_numbers = #tpu.dot_dimension_numbers<[1], [0], [0], [1], [0, 0, 1, 1], [], []>} : vector<64x12xbf16>, vector<12x4xbf16>, vector<64x4xf32> -> vector<64x4xf32>
    %52 = arith.addf %46, %51 : vector<64x4xf32>
    %c0_61 = arith.constant 0 : index
    %c0_62 = arith.constant 0 : index
    %53 = vector.load %arg6[%c0_61, %c0_62] : memref<1x4xf32, #tpu.memory_space<vmem>>, vector<1x4xf32>
    %54 = vector.broadcast %53 : vector<1x4xf32> to vector<64x4xf32>
    %55 = arith.addf %52, %54 : vector<64x4xf32>
    %cst_63 = arith.constant 0.000000e+00 : f32
    %56 = vector.broadcast %cst_63 : f32 to vector<64x4xf32>
    %57 = arith.maximumf %55, %56 : vector<64x4xf32>
    %58 = arith.truncf %57 : vector<64x4xf32> to vector<64x4xbf16>
    %c0_64 = arith.constant 0 : index
    %c0_65 = arith.constant 0 : index
    %c0_66 = arith.constant 0 : index
    %c0_67 = arith.constant 0 : index
    %59 = vector.load %arg7[%c0_64, %c0_65, %c0_66, %c0_67] : memref<1x1x64x4xbf16, #tpu.memory_space<vmem>>, vector<1x1x64x4xbf16>
    %60 = vector.shape_cast %59 : vector<1x1x64x4xbf16> to vector<64x4xbf16>
    %61 = vector.shape_cast %58 : vector<64x4xbf16> to vector<1x1x64x4xbf16>
    tpu.vector_store %arg7[%c0_64, %c0_65, %c0_66, %c0_67], %61 {strides = array<i32>} : memref<1x1x64x4xbf16, #tpu.memory_space<vmem>>, vector<1x1x64x4xbf16>,
    return
  }
  func.func @transform_0(%arg0: i32, %arg1: i32) -> (i32, i32, i32, i32) {
    %c0_i32 = arith.constant 0 : i32
    %0 = arith.addi %arg1, %c0_i32 : i32
    %c0_i32_0 = arith.constant 0 : i32
    %c0_i32_1 = arith.constant 0 : i32
    %c0_i32_2 = arith.constant 0 : i32
    return %arg0, %0, %c0_i32_0, %c0_i32_1 : i32, i32, i32, i32
  }
  func.func @transform_1(%arg0: i32, %arg1: i32) -> (i32, i32, i32, i32) {
    %c1_i32 = arith.constant 1 : i32
    %0 = arith.addi %arg1, %c1_i32 : i32
    %c0_i32 = arith.constant 0 : i32
    %c0_i32_0 = arith.constant 0 : i32
    %c0_i32_1 = arith.constant 0 : i32
    return %arg0, %0, %c0_i32, %c0_i32_0 : i32, i32, i32, i32
  }
  func.func @transform_2(%arg0: i32, %arg1: i32) -> (i32, i32, i32, i32) {
    %c2_i32 = arith.constant 2 : i32
    %0 = arith.addi %arg1, %c2_i32 : i32
    %c0_i32 = arith.constant 0 : i32
    %c0_i32_0 = arith.constant 0 : i32
    %c0_i32_1 = arith.constant 0 : i32
    return %arg0, %0, %c0_i32, %c0_i32_0 : i32, i32, i32, i32
  }
  func.func @transform_3(%arg0: i32, %arg1: i32) -> (i32, i32, i32) {
    %c0_i32 = arith.constant 0 : i32
    %c0_i32_0 = arith.constant 0 : i32
    %c0_i32_1 = arith.constant 0 : i32
    %c0_i32_2 = arith.constant 0 : i32
    return %c0_i32, %c0_i32_0, %c0_i32_1 : i32, i32, i32
  }
  func.func @transform_4(%arg0: i32, %arg1: i32) -> (i32, i32) {
    %c0_i32 = arith.constant 0 : i32
    %c0_i32_0 = arith.constant 0 : i32
    %c0_i32_1 = arith.constant 0 : i32
    return %c0_i32, %c0_i32_0 : i32, i32
  }
  func.func @transform_5(%arg0: i32, %arg1: i32) -> (i32, i32, i32, i32) {
    %c0_i32 = arith.constant 0 : i32
    %c0_i32_0 = arith.constant 0 : i32
    %c0_i32_1 = arith.constant 0 : i32
    return %arg0, %arg1, %c0_i32, %c0_i32_0 : i32, i32, i32, i32
  }
}

module attributes {stable_mosaic.version = 11 : i64} {
  func.func @_mm_bias_kernel(%arg0: i32, %arg1: memref<512x8xbf16, #tpu.memory_space<vmem>>, %arg2: memref<8x16xbf16, #tpu.memory_space<vmem>>, %arg3: memref<1x16xf32, #tpu.memory_space<vmem>>, %arg4: memref<512x16xbf16, #tpu.memory_space<vmem>>) attributes {dimension_semantics = [#tpu.dimension_semantics<parallel>], iteration_bounds = array<i64: 2>, scalar_prefetch = 0 : i64, scratch_operands = 0 : i64, tpu.core_type = #tpu.core_type<tc>, window_params = [{transform_indices = @transform_0, window_bounds = array<i64: 512, 8>}, {pipeline_mode = #tpu.pipeline_mode<synchronous>, transform_indices = @transform_1, window_bounds = array<i64: 8, 16>}, {pipeline_mode = #tpu.pipeline_mode<synchronous>, transform_indices = @transform_2, window_bounds = array<i64: 1, 16>}, {transform_indices = @transform_3, window_bounds = array<i64: 512, 16>}]} {
    %c0 = arith.constant 0 : index
    %c0_0 = arith.constant 0 : index
    %0 = vector.load %arg1[%c0, %c0_0] : memref<512x8xbf16, #tpu.memory_space<vmem>>, vector<512x8xbf16>
    %c0_1 = arith.constant 0 : index
    %c0_2 = arith.constant 0 : index
    %1 = vector.load %arg2[%c0_1, %c0_2] : memref<8x16xbf16, #tpu.memory_space<vmem>>, vector<8x16xbf16>
    %cst = arith.constant dense<0.000000e+00> : vector<512x16xf32>
    %2 = tpu.matmul %0, %1, %cst {dimension_numbers = #tpu.dot_dimension_numbers<[1], [0], [0], [1], [0, 0, 1, 1], [], []>} : vector<512x8xbf16>, vector<8x16xbf16>, vector<512x16xf32> -> vector<512x16xf32>
    %c0_3 = arith.constant 0 : index
    %c0_4 = arith.constant 0 : index
    %3 = vector.load %arg3[%c0_3, %c0_4] : memref<1x16xf32, #tpu.memory_space<vmem>>, vector<1x16xf32>
    %4 = vector.broadcast %3 : vector<1x16xf32> to vector<512x16xf32>
    %5 = arith.addf %2, %4 : vector<512x16xf32>
    %6 = arith.truncf %5 : vector<512x16xf32> to vector<512x16xbf16>
    %c0_5 = arith.constant 0 : index
    %c0_6 = arith.constant 0 : index
    %7 = vector.load %arg4[%c0_5, %c0_6] : memref<512x16xbf16, #tpu.memory_space<vmem>>, vector<512x16xbf16>
    tpu.vector_store %arg4[%c0_5, %c0_6], %6 {strides = array<i32>} : memref<512x16xbf16, #tpu.memory_space<vmem>>, vector<512x16xbf16>,
    return
  }
  func.func @transform_0(%arg0: i32) -> (i32, i32) {
    %c0_i32 = arith.constant 0 : i32
    %c0_i32_0 = arith.constant 0 : i32
    return %arg0, %c0_i32 : i32, i32
  }
  func.func @transform_1(%arg0: i32) -> (i32, i32) {
    %c0_i32 = arith.constant 0 : i32
    %c0_i32_0 = arith.constant 0 : i32
    %c0_i32_1 = arith.constant 0 : i32
    return %c0_i32, %c0_i32_0 : i32, i32
  }
  func.func @transform_2(%arg0: i32) -> (i32, i32) {
    %c0_i32 = arith.constant 0 : i32
    %c0_i32_0 = arith.constant 0 : i32
    %c0_i32_1 = arith.constant 0 : i32
    return %c0_i32, %c0_i32_0 : i32, i32
  }
  func.func @transform_3(%arg0: i32) -> (i32, i32) {
    %c0_i32 = arith.constant 0 : i32
    %c0_i32_0 = arith.constant 0 : i32
    return %arg0, %c0_i32 : i32, i32
  }
}

module attributes {stable_mosaic.version = 11 : i64} {
  func.func @_mm_bias_res_relu_kernel(%arg0: i32, %arg1: memref<512x4xbf16, #tpu.memory_space<vmem>>, %arg2: memref<4x16xbf16, #tpu.memory_space<vmem>>, %arg3: memref<1x16xf32, #tpu.memory_space<vmem>>, %arg4: memref<512x16xbf16, #tpu.memory_space<vmem>>, %arg5: memref<512x16xbf16, #tpu.memory_space<vmem>>) attributes {dimension_semantics = [#tpu.dimension_semantics<parallel>], iteration_bounds = array<i64: 2>, scalar_prefetch = 0 : i64, scratch_operands = 0 : i64, tpu.core_type = #tpu.core_type<tc>, window_params = [{transform_indices = @transform_0, window_bounds = array<i64: 512, 4>}, {pipeline_mode = #tpu.pipeline_mode<synchronous>, transform_indices = @transform_1, window_bounds = array<i64: 4, 16>}, {pipeline_mode = #tpu.pipeline_mode<synchronous>, transform_indices = @transform_2, window_bounds = array<i64: 1, 16>}, {transform_indices = @transform_3, window_bounds = array<i64: 512, 16>}, {transform_indices = @transform_4, window_bounds = array<i64: 512, 16>}]} {
    %c0 = arith.constant 0 : index
    %c0_0 = arith.constant 0 : index
    %0 = vector.load %arg1[%c0, %c0_0] : memref<512x4xbf16, #tpu.memory_space<vmem>>, vector<512x4xbf16>
    %c0_1 = arith.constant 0 : index
    %c0_2 = arith.constant 0 : index
    %1 = vector.load %arg2[%c0_1, %c0_2] : memref<4x16xbf16, #tpu.memory_space<vmem>>, vector<4x16xbf16>
    %cst = arith.constant dense<0.000000e+00> : vector<512x16xf32>
    %2 = tpu.matmul %0, %1, %cst {dimension_numbers = #tpu.dot_dimension_numbers<[1], [0], [0], [1], [0, 0, 1, 1], [], []>} : vector<512x4xbf16>, vector<4x16xbf16>, vector<512x16xf32> -> vector<512x16xf32>
    %c0_3 = arith.constant 0 : index
    %c0_4 = arith.constant 0 : index
    %3 = vector.load %arg3[%c0_3, %c0_4] : memref<1x16xf32, #tpu.memory_space<vmem>>, vector<1x16xf32>
    %4 = vector.broadcast %3 : vector<1x16xf32> to vector<512x16xf32>
    %5 = arith.addf %2, %4 : vector<512x16xf32>
    %c0_5 = arith.constant 0 : index
    %c0_6 = arith.constant 0 : index
    %6 = vector.load %arg4[%c0_5, %c0_6] : memref<512x16xbf16, #tpu.memory_space<vmem>>, vector<512x16xbf16>
    %7 = arith.extf %6 : vector<512x16xbf16> to vector<512x16xf32>
    %8 = arith.addf %5, %7 : vector<512x16xf32>
    %cst_7 = arith.constant 0.000000e+00 : f32
    %9 = vector.broadcast %cst_7 : f32 to vector<512x16xf32>
    %10 = arith.maximumf %8, %9 : vector<512x16xf32>
    %11 = arith.truncf %10 : vector<512x16xf32> to vector<512x16xbf16>
    %c0_8 = arith.constant 0 : index
    %c0_9 = arith.constant 0 : index
    %12 = vector.load %arg5[%c0_8, %c0_9] : memref<512x16xbf16, #tpu.memory_space<vmem>>, vector<512x16xbf16>
    tpu.vector_store %arg5[%c0_8, %c0_9], %11 {strides = array<i32>} : memref<512x16xbf16, #tpu.memory_space<vmem>>, vector<512x16xbf16>,
    return
  }
  func.func @transform_0(%arg0: i32) -> (i32, i32) {
    %c0_i32 = arith.constant 0 : i32
    %c0_i32_0 = arith.constant 0 : i32
    return %arg0, %c0_i32 : i32, i32
  }
  func.func @transform_1(%arg0: i32) -> (i32, i32) {
    %c0_i32 = arith.constant 0 : i32
    %c0_i32_0 = arith.constant 0 : i32
    %c0_i32_1 = arith.constant 0 : i32
    return %c0_i32, %c0_i32_0 : i32, i32
  }
  func.func @transform_2(%arg0: i32) -> (i32, i32) {
    %c0_i32 = arith.constant 0 : i32
    %c0_i32_0 = arith.constant 0 : i32
    %c0_i32_1 = arith.constant 0 : i32
    return %c0_i32, %c0_i32_0 : i32, i32
  }
  func.func @transform_3(%arg0: i32) -> (i32, i32) {
    %c0_i32 = arith.constant 0 : i32
    %c0_i32_0 = arith.constant 0 : i32
    return %arg0, %c0_i32 : i32, i32
  }
  func.func @transform_4(%arg0: i32) -> (i32, i32) {
    %c0_i32 = arith.constant 0 : i32
    %c0_i32_0 = arith.constant 0 : i32
    return %arg0, %c0_i32 : i32, i32
  }
}

</mosaic_0001>

<bundles_post_ra>
// kernel: bottleneck_forward.4
= control target key start
LH: loop header
LB: loop body
LE: loop exit
PB: predicated region body
PF: predicated region fallthrough
CT: control target
= control target key end

     0   :  { %s1613_s12 = smov 0   ;;  %s1905_s0 = inlined_call_operand.vmem [shape: bf16[1024,8], index: 0, kind: input, shape index: {}]   ;;  %s1906_s1 = inlined_call_operand.vmem [shape: bf16[8,4], index: 1, kind: input, shape index: {}]   ;;  %s1907_s2 = inlined_call_operand.vmem [shape: f32[1,4], index: 2, kind: input, shape index: {}]   ;;  %s1908_s3 = inlined_call_operand.vmem [shape: bf16[1024,4], index: 3, kind: output, shape index: {}]  }
   0x1 LB: > { %s1238_s13 = sadd.s32 4294967295, %s1591_s12   ;;  %p1242_p0 = scmp.ge.s32.totalorder %s1591_s12, 1  ;;  %s1591_s12 = sphi %s1613_s12, %s13_s12  }
   0x2   : > { %p138_p1 = scmp.lt.s32.totalorder %s1591_s12, 3 }
   0x4   : > { %p139_p2 = pnand %p1242_p0, %p138_p1 }
   0x5   : > { %v239_v0 = vld [vmem:[%s1906_s1] sm:$0xf] (!%p139_p2)  ;;  %vm504_vm0 = vcmask (!%p139_p2), 1043456   ;;  %s1243_s16 = sshll.u32 (!%p139_p2), %s1238_s13, 6  ;;  %vm407_vm1 = vcmask (!%p139_p2), 64512   ;;  %vm1117_vm2 = vcmask (!%p139_p2), 27648  }
   0x6   : > { %142 = sbr.rel (%p139_p2) target bundleno = 297 (0x129), region = 32  ;;  %1543 = vmatprep.subr.msk.bf16.mxu0 (!%p139_p2), %vm504_vm0, %v239_v0  ;;  %1544 = vmatprep.subr.msk.bf16.mxu1 (!%p139_p2), %vm504_vm0, %v239_v0  ;;  %v506_v1 = vsel (!%p139_p2), %vm504_vm0, %v239_v0, 0  ;;  %p163_p3 = scmp.lt.s32.totalorder (!%p139_p2), %s1243_s16, 127  ;;  %v1701_v34 = vld [vmem:[%s1907_s2] ss:$0 sm:$0xff] (!%p139_p2) }
   0x7   : > { %1476 = vmatpush3.bf16.msra.mxu0 (!%p139_p2), %v506_v1  ;;  %1542 = vmatpush3.bf16.msra.mxu1 (!%p139_p2), %v506_v1 }
   0xd   : > { %s1910_s16 = smov (!%p163_p3, %s1243_s16), 127 }
   0xe   : > { %s1244_s17 = sshll.u32 %s1910_s16, 2 }
   0xf   : > { %s1632_s20 = scalar_lea.vmem %s1905_s0, %s1244_s17  ;;  %s1713_s25 = scalar_lea.vmem %s1908_s3, %s1244_s17 }
  0x10   : > { %v1553_v2 = vld [vmem:[%s1632_s20] sm:$0xff]   ;;  %v1555_v4 = vld [vmem:[%s1632_s20 + $0x8] sm:$0xff]   ;;  %v1557_v6 = vld [vmem:[%s1632_s20 + $0x10] sm:$0xff]  }
  0x11   : > { %v1554_v3 = vld [vmem:[%s1632_s20 + $0x80] sm:$0xff]   ;;  %1477 = vmatprep.mubr.msk.bf16.mxu0 %vm407_vm1, %v1553_v2  ;;  %v1556_v5 = vld [vmem:[%s1632_s20 + $0x88] sm:$0xff]   ;;  %v1558_v7 = vld [vmem:[%s1632_s20 + $0x90] sm:$0xff]  }
  0x12   : > { %1509 = vmatprep.mubr.msk.bf16.mxu1 %vm407_vm1, %v1554_v3  ;;  %1478 = vmatmul.mubr.msk.bf16.vlgmr.msra.gmra.mrb[0].mxu0 %vm407_vm1, %v1555_v4  ;;  %v1559_v8 = vld [vmem:[%s1632_s20 + $0x18] sm:$0xff]   ;;  %v1561_v10 = vld [vmem:[%s1632_s20 + $0x20] sm:$0xff]   ;;  %v1563_v12 = vld [vmem:[%s1632_s20 + $0x28] sm:$0xff]  }
  0x13   : > { %1510 = vmatmul.mubr.msk.bf16.vlgmr.msra.gmra.mrb[0].mxu1 %vm407_vm1, %v1556_v5  ;;  %1481 = vmatprep.mubr.msk.bf16.mxu0 %vm407_vm1, %v1557_v6  ;;  %v1560_v9 = vld [vmem:[%s1632_s20 + $0x98] sm:$0xff]   ;;  %v1562_v11 = vld [vmem:[%s1632_s20 + $0xa0] sm:$0xff]   ;;  %v1564_v13 = vld [vmem:[%s1632_s20 + $0xa8] sm:$0xff]  }
  0x14   : > { %1513 = vmatprep.mubr.msk.bf16.mxu1 %vm407_vm1, %v1558_v7  ;;  %v1565_v14 = vld [vmem:[%s1632_s20 + $0x30] sm:$0xff]   ;;  %v1567_v16 = vld [vmem:[%s1632_s20 + $0x38] sm:$0xff]   ;;  %v1569_v18 = vld [vmem:[%s1632_s20 + $0x40] sm:$0xff]  }
  0x15   : > { %v1566_v15 = vld [vmem:[%s1632_s20 + $0xb0] sm:$0xff]   ;;  %v1568_v17 = vld [vmem:[%s1632_s20 + $0xb8] sm:$0xff]   ;;  %v1570_v19 = vld [vmem:[%s1632_s20 + $0xc0] sm:$0xff]  }
  0x16   : > { %v1571_v20 = vld [vmem:[%s1632_s20 + $0x48] sm:$0xff]   ;;  %v1573_v22 = vld [vmem:[%s1632_s20 + $0x50] sm:$0xff]   ;;  %v1575_v24 = vld [vmem:[%s1632_s20 + $0x58] sm:$0xff]  }
  0x17   : > { %v1572_v21 = vld [vmem:[%s1632_s20 + $0xc8] sm:$0xff]   ;;  %v1574_v23 = vld [vmem:[%s1632_s20 + $0xd0] sm:$0xff]   ;;  %v1576_v25 = vld [vmem:[%s1632_s20 + $0xd8] sm:$0xff]  }
  0x18   : > { %v1577_v26 = vld [vmem:[%s1632_s20 + $0x60] sm:$0xff]   ;;  %v1579_v28 = vld [vmem:[%s1632_s20 + $0x68] sm:$0xff]   ;;  %v1581_v30 = vld [vmem:[%s1632_s20 + $0x70] sm:$0xff]  }
  0x19   : > { %v1578_v27 = vld [vmem:[%s1632_s20 + $0xe0] sm:$0xff]   ;;  %v1580_v29 = vld [vmem:[%s1632_s20 + $0xe8] sm:$0xff]   ;;  %v1582_v31 = vld [vmem:[%s1632_s20 + $0xf0] sm:$0xff]  }
  0x1a   : > { %1482 = vmatmul.mubr.msk.bf16.gmra.mrb[4].mxu0 %vm407_vm1, %v1559_v8  ;;  %v1583_v32 = vld [vmem:[%s1632_s20 + $0x78] sm:$0xff]  }
  0x1b   : > { %1514 = vmatmul.mubr.msk.bf16.gmra.mrb[4].mxu1 %vm407_vm1, %v1560_v9  ;;  %1485 = vmatprep.mubr.msk.bf16.mxu0 %vm407_vm1, %v1561_v10  ;;  %v1584_v33 = vld [vmem:[%s1632_s20 + $0xf8] sm:$0xff]  }
  0x1c   : > { %1517 = vmatprep.mubr.msk.bf16.mxu1 %vm407_vm1, %v1562_v11 }
  0x22   : > { %1486 = vmatmul.mubr.msk.bf16.gmra.mrb[8].mxu0 %vm407_vm1, %v1563_v12 }
  0x23   : > { %1518 = vmatmul.mubr.msk.bf16.gmra.mrb[8].mxu1 %vm407_vm1, %v1564_v13  ;;  %1489 = vmatprep.mubr.msk.bf16.mxu0 %vm407_vm1, %v1565_v14 }
  0x24   : > { %1521 = vmatprep.mubr.msk.bf16.mxu1 %vm407_vm1, %v1566_v15 }
  0x2a   : > { %1490 = vmatmul.mubr.msk.bf16.gmra.mrb[12].mxu0 %vm407_vm1, %v1567_v16 }
  0x2b   : > { %1522 = vmatmul.mubr.msk.bf16.gmra.mrb[12].mxu1 %vm407_vm1, %v1568_v17  ;;  %1493 = vmatprep.mubr.msk.bf16.mxu0 %vm407_vm1, %v1569_v18 }
  0x2c   : > { %1525 = vmatprep.mubr.msk.bf16.mxu1 %vm407_vm1, %v1570_v19 }
  0x32   : > { %1494 = vmatmul.mubr.msk.bf16.gmra.mrb[16].mxu0 %vm407_vm1, %v1571_v20 }
  0x33   : > { %1526 = vmatmul.mubr.msk.bf16.gmra.mrb[16].mxu1 %vm407_vm1, %v1572_v21  ;;  %1497 = vmatprep.mubr.msk.bf16.mxu0 %vm407_vm1, %v1573_v22 }
  0x34   : > { %1529 = vmatprep.mubr.msk.bf16.mxu1 %vm407_vm1, %v1574_v23 }
  0x3a   : > { %1498 = vmatmul.mubr.msk.bf16.gmra.mrb[20].mxu0 %vm407_vm1, %v1575_v24 }
  0x3b   : > { %1530 = vmatmul.mubr.msk.bf16.gmra.mrb[20].mxu1 %vm407_vm1, %v1576_v25  ;;  %1501 = vmatprep.mubr.msk.bf16.mxu0 %vm407_vm1, %v1577_v26 }
  0x3c   : > { %1533 = vmatprep.mubr.msk.bf16.mxu1 %vm407_vm1, %v1578_v27 }
  0x42   : > { %1502 = vmatmul.mubr.msk.bf16.gmra.mrb[24].mxu0 %vm407_vm1, %v1579_v28 }
  0x43   : > { %1534 = vmatmul.mubr.msk.bf16.gmra.mrb[24].mxu1 %vm407_vm1, %v1580_v29  ;;  %1505 = vmatprep.mubr.msk.bf16.mxu0 %vm407_vm1, %v1581_v30 }
  0x44   : > { %1537 = vmatprep.mubr.msk.bf16.mxu1 %vm407_vm1, %v1582_v31 }
  0x4a   : > { %1506 = vmatmul.mubr.msk.bf16.gmra.mrb[28].mxu0 %vm407_vm1, %v1583_v32 }
  0x4b   : > { %1538 = vmatmul.mubr.msk.bf16.gmra.mrb[28].mxu1 %vm407_vm1, %v1584_v33 }
  0xe5   : > { %v1479_v35 = vpop.f32.mrb[0].mxu0 }
  0xe6   : > { %v551_v36 = vadd.f32 %v1479_v35, %v1701_v34  ;;  %v1511_v37 = vpop.f32.mrb[0].mxu1  ;;  %v542_v38 = vpop.f32.mrb[1].mxu0 }
  0xe7   : > { %v679_v39 = vadd.f32 %v1511_v37, %v1701_v34  ;;  %v543_v40 = vadd.f32 %v1701_v34, %v542_v38  ;;  %v670_v41 = vpop.f32.mrb[1].mxu1  ;;  %v1480_v42 = vpop.f32.mrb[2].mxu0 }
  0xe8   : > { %v799_v43 = vmax.f32 %v551_v36, 0.0  ;;  %v671_v44 = vadd.f32 %v1701_v34, %v670_v41  ;;  %v554_v45 = vadd.f32 %v1480_v42, %v1701_v34  ;;  %v1512_v46 = vpop.f32.mrb[2].mxu1  ;;  %v545_v47 = vpop.f32.mrb[3].mxu0 }
  0xe9   : > { %v831_v48 = vmax.f32 %v679_v39, 0.0  ;;  %v797_v49 = vmax.f32 %v543_v40, 0.0  ;;  %v682_v50 = vadd.f32 %v1512_v46, %v1701_v34  ;;  %v546_v51 = vadd.f32 %v1701_v34, %v545_v47  ;;  %v673_v52 = vpop.f32.mrb[3].mxu1 }
  0xea   : > { %v1380_v53 = vpack.c.bf16 %v799_v43, %v799_v43  ;;  %v829_v54 = vmax.f32 %v671_v44, 0.0  ;;  %v800_v55 = vmax.f32 %v554_v45, 0.0  ;;  %v674_v56 = vadd.f32 %v1701_v34, %v673_v52 }
  0xeb   : > { %v1412_v57 = vpack.c.bf16 %v831_v48, %v831_v48  ;;  %v1378_v58 = vpack.c.bf16 %v797_v49, %v797_v49  ;;  %v832_v59 = vmax.f32 %v682_v50, 0.0  ;;  %v798_v60 = vmax.f32 %v546_v51, 0.0 }
  0xec   : > { %1120 = vst.msk [vmem:[%s1713_s25 + $0x8] sm:$0xf] %vm1117_vm2, %v1380_v53  ;;  %v1410_v61 = vpack.c.bf16 %v829_v54, %v829_v54  ;;  %v1381_v62 = vpack.c.bf16 %v800_v55, %v800_v55  ;;  %v830_v63 = vmax.f32 %v674_v56, 0.0 }
  0xed   : > { %1152 = vst.msk [vmem:[%s1713_s25 + $0x88] sm:$0xf] %vm1117_vm2, %v1412_v57  ;;  %1118 = vst.msk [vmem:[%s1713_s25] sm:$0xf] %vm1117_vm2, %v1378_v58  ;;  %v1413_v0 = vpack.c.bf16 %v832_v59, %v832_v59  ;;  %v1379_v1 = vpack.c.bf16 %v798_v60, %v798_v60  ;;  %v1483_v2 = vpop.f32.mrb[4].mxu0 }
  0xee   : > { %1150 = vst.msk [vmem:[%s1713_s25 + $0x80] sm:$0xf] %vm1117_vm2, %v1410_v61  ;;  %1121 = vst.msk [vmem:[%s1713_s25 + $0xc] sm:$0xf] %vm1117_vm2, %v1381_v62  ;;  %v1411_v3 = vpack.c.bf16 %v830_v63, %v830_v63  ;;  %v567_v4 = vadd.f32 %v1483_v2, %v1701_v34  ;;  %v1515_v5 = vpop.f32.mrb[4].mxu1  ;;  %v558_v6 = vpop.f32.mrb[5].mxu0 }
  0xef   : > { %1153 = vst.msk [vmem:[%s1713_s25 + $0x8c] sm:$0xf] %vm1117_vm2, %v1413_v0  ;;  %1119 = vst.msk [vmem:[%s1713_s25 + $0x4] sm:$0xf] %vm1117_vm2, %v1379_v1  ;;  %v695_v7 = vadd.f32 %v1515_v5, %v1701_v34  ;;  %v559_v8 = vadd.f32 %v1701_v34, %v558_v6  ;;  %v686_v9 = vpop.f32.mrb[5].mxu1  ;;  %v1484_v10 = vpop.f32.mrb[6].mxu0 }
  0xf0   : > { %1151 = vst.msk [vmem:[%s1713_s25 + $0x84] sm:$0xf] %vm1117_vm2, %v1411_v3  ;;  %v803_v11 = vmax.f32 %v567_v4, 0.0  ;;  %v687_v12 = vadd.f32 %v1701_v34, %v686_v9  ;;  %v570_v13 = vadd.f32 %v1484_v10, %v1701_v34  ;;  %v1516_v14 = vpop.f32.mrb[6].mxu1  ;;  %v561_v15 = vpop.f32.mrb[7].mxu0 }
  0xf1   : > { %v835_v16 = vmax.f32 %v695_v7, 0.0  ;;  %v801_v17 = vmax.f32 %v559_v8, 0.0  ;;  %v698_v18 = vadd.f32 %v1516_v14, %v1701_v34  ;;  %v562_v19 = vadd.f32 %v1701_v34, %v561_v15  ;;  %v689_v20 = vpop.f32.mrb[7].mxu1 }
  0xf2   : > { %v1384_v21 = vpack.c.bf16 %v803_v11, %v803_v11  ;;  %v833_v22 = vmax.f32 %v687_v12, 0.0  ;;  %v804_v23 = vmax.f32 %v570_v13, 0.0  ;;  %v690_v24 = vadd.f32 %v1701_v34, %v689_v20 }
  0xf3   : > { %v1416_v25 = vpack.c.bf16 %v835_v16, %v835_v16  ;;  %v1382_v26 = vpack.c.bf16 %v801_v17, %v801_v17  ;;  %v836_v27 = vmax.f32 %v698_v18, 0.0  ;;  %v802_v28 = vmax.f32 %v562_v19, 0.0 }
  0xf4   : > { %1124 = vst.msk [vmem:[%s1713_s25 + $0x18] sm:$0xf] %vm1117_vm2, %v1384_v21  ;;  %v1414_v29 = vpack.c.bf16 %v833_v22, %v833_v22  ;;  %v1385_v30 = vpack.c.bf16 %v804_v23, %v804_v23  ;;  %v834_v31 = vmax.f32 %v690_v24, 0.0 }
  0xf5   : > { %1156 = vst.msk [vmem:[%s1713_s25 + $0x98] sm:$0xf] %vm1117_vm2, %v1416_v25  ;;  %1122 = vst.msk [vmem:[%s1713_s25 + $0x10] sm:$0xf] %vm1117_vm2, %v1382_v26  ;;  %v1417_v32 = vpack.c.bf16 %v836_v27, %v836_v27  ;;  %v1383_v33 = vpack.c.bf16 %v802_v28, %v802_v28  ;;  %v1487_v35 = vpop.f32.mrb[8].mxu0 }
  0xf6   : > { %1154 = vst.msk [vmem:[%s1713_s25 + $0x90] sm:$0xf] %vm1117_vm2, %v1414_v29  ;;  %1125 = vst.msk [vmem:[%s1713_s25 + $0x1c] sm:$0xf] %vm1117_vm2, %v1385_v30  ;;  %v1415_v36 = vpack.c.bf16 %v834_v31, %v834_v31  ;;  %v583_v37 = vadd.f32 %v1487_v35, %v1701_v34  ;;  %v1519_v38 = vpop.f32.mrb[8].mxu1  ;;  %v574_v39 = vpop.f32.mrb[9].mxu0 }
  0xf7   : > { %1157 = vst.msk [vmem:[%s1713_s25 + $0x9c] sm:$0xf] %vm1117_vm2, %v1417_v32  ;;  %1123 = vst.msk [vmem:[%s1713_s25 + $0x14] sm:$0xf] %vm1117_vm2, %v1383_v33  ;;  %v711_v40 = vadd.f32 %v1519_v38, %v1701_v34  ;;  %v575_v41 = vadd.f32 %v1701_v34, %v574_v39  ;;  %v702_v42 = vpop.f32.mrb[9].mxu1  ;;  %v1488_v43 = vpop.f32.mrb[10].mxu0 }
  0xf8   : > { %1155 = vst.msk [vmem:[%s1713_s25 + $0x94] sm:$0xf] %vm1117_vm2, %v1415_v36  ;;  %v807_v44 = vmax.f32 %v583_v37, 0.0  ;;  %v703_v45 = vadd.f32 %v1701_v34, %v702_v42  ;;  %v586_v46 = vadd.f32 %v1488_v43, %v1701_v34  ;;  %v1520_v47 = vpop.f32.mrb[10].mxu1  ;;  %v577_v48 = vpop.f32.mrb[11].mxu0 }
  0xf9   : > { %v839_v49 = vmax.f32 %v711_v40, 0.0  ;;  %v805_v50 = vmax.f32 %v575_v41, 0.0  ;;  %v714_v51 = vadd.f32 %v1520_v47, %v1701_v34  ;;  %v578_v52 = vadd.f32 %v1701_v34, %v577_v48  ;;  %v705_v53 = vpop.f32.mrb[11].mxu1 }
  0xfa   : > { %v1388_v54 = vpack.c.bf16 %v807_v44, %v807_v44  ;;  %v837_v55 = vmax.f32 %v703_v45, 0.0  ;;  %v808_v56 = vmax.f32 %v586_v46, 0.0  ;;  %v706_v57 = vadd.f32 %v1701_v34, %v705_v53 }
  0xfb   : > { %v1420_v58 = vpack.c.bf16 %v839_v49, %v839_v49  ;;  %v1386_v59 = vpack.c.bf16 %v805_v50, %v805_v50  ;;  %v840_v60 = vmax.f32 %v714_v51, 0.0  ;;  %v806_v61 = vmax.f32 %v578_v52, 0.0 }
  0xfc   : > { %1128 = vst.msk [vmem:[%s1713_s25 + $0x28] sm:$0xf] %vm1117_vm2, %v1388_v54  ;;  %v1418_v62 = vpack.c.bf16 %v837_v55, %v837_v55  ;;  %v1389_v63 = vpack.c.bf16 %v808_v56, %v808_v56  ;;  %v838_v0 = vmax.f32 %v706_v57, 0.0 }
  0xfd   : > { %1160 = vst.msk [vmem:[%s1713_s25 + $0xa8] sm:$0xf] %vm1117_vm2, %v1420_v58  ;;  %1126 = vst.msk [vmem:[%s1713_s25 + $0x20] sm:$0xf] %vm1117_vm2, %v1386_v59  ;;  %v1421_v1 = vpack.c.bf16 %v840_v60, %v840_v60  ;;  %v1387_v2 = vpack.c.bf16 %v806_v61, %v806_v61  ;;  %v1491_v3 = vpop.f32.mrb[12].mxu0 }
  0xfe   : > { %1158 = vst.msk [vmem:[%s1713_s25 + $0xa0] sm:$0xf] %vm1117_vm2, %v1418_v62  ;;  %1129 = vst.msk [vmem:[%s1713_s25 + $0x2c] sm:$0xf] %vm1117_vm2, %v1389_v63  ;;  %v1419_v4 = vpack.c.bf16 %v838_v0, %v838_v0  ;;  %v599_v5 = vadd.f32 %v1491_v3, %v1701_v34  ;;  %v1523_v6 = vpop.f32.mrb[12].mxu1  ;;  %v590_v7 = vpop.f32.mrb[13].mxu0 }
  0xff   : > { %1161 = vst.msk [vmem:[%s1713_s25 + $0xac] sm:$0xf] %vm1117_vm2, %v1421_v1  ;;  %1127 = vst.msk [vmem:[%s1713_s25 + $0x24] sm:$0xf] %vm1117_vm2, %v1387_v2  ;;  %v727_v8 = vadd.f32 %v1523_v6, %v1701_v34  ;;  %v591_v9 = vadd.f32 %v1701_v34, %v590_v7  ;;  %v718_v10 = vpop.f32.mrb[13].mxu1  ;;  %v1492_v11 = vpop.f32.mrb[14].mxu0 }
 0x100   : > { %1159 = vst.msk [vmem:[%s1713_s25 + $0xa4] sm:$0xf] %vm1117_vm2, %v1419_v4  ;;  %v811_v12 = vmax.f32 %v599_v5, 0.0  ;;  %v719_v13 = vadd.f32 %v1701_v34, %v718_v10  ;;  %v602_v14 = vadd.f32 %v1492_v11, %v1701_v34  ;;  %v1524_v15 = vpop.f32.mrb[14].mxu1  ;;  %v593_v16 = vpop.f32.mrb[15].mxu0 }
 0x101   : > { %v843_v17 = vmax.f32 %v727_v8, 0.0  ;;  %v809_v18 = vmax.f32 %v591_v9, 0.0  ;;  %v730_v19 = vadd.f32 %v1524_v15, %v1701_v34  ;;  %v594_v20 = vadd.f32 %v1701_v34, %v593_v16  ;;  %v721_v21 = vpop.f32.mrb[15].mxu1 }
 0x102   : > { %v1392_v22 = vpack.c.bf16 %v811_v12, %v811_v12  ;;  %v841_v23 = vmax.f32 %v719_v13, 0.0  ;;  %v812_v24 = vmax.f32 %v602_v14, 0.0  ;;  %v722_v25 = vadd.f32 %v1701_v34, %v721_v21 }
 0x103   : > { %v1424_v26 = vpack.c.bf16 %v843_v17, %v843_v17  ;;  %v1390_v27 = vpack.c.bf16 %v809_v18, %v809_v18  ;;  %v844_v28 = vmax.f32 %v730_v19, 0.0  ;;  %v810_v29 = vmax.f32 %v594_v20, 0.0 }
 0x104   : > { %1132 = vst.msk [vmem:[%s1713_s25 + $0x38] sm:$0xf] %vm1117_vm2, %v1392_v22  ;;  %v1422_v30 = vpack.c.bf16 %v841_v23, %v841_v23  ;;  %v1393_v31 = vpack.c.bf16 %v812_v24, %v812_v24  ;;  %v842_v32 = vmax.f32 %v722_v25, 0.0 }
 0x105   : > { %1164 = vst.msk [vmem:[%s1713_s25 + $0xb8] sm:$0xf] %vm1117_vm2, %v1424_v26  ;;  %1130 = vst.msk [vmem:[%s1713_s25 + $0x30] sm:$0xf] %vm1117_vm2, %v1390_v27  ;;  %v1425_v33 = vpack.c.bf16 %v844_v28, %v844_v28  ;;  %v1391_v35 = vpack.c.bf16 %v810_v29, %v810_v29  ;;  %v1495_v36 = vpop.f32.mrb[16].mxu0 }
 0x106   : > { %1162 = vst.msk [vmem:[%s1713_s25 + $0xb0] sm:$0xf] %vm1117_vm2, %v1422_v30  ;;  %1133 = vst.msk [vmem:[%s1713_s25 + $0x3c] sm:$0xf] %vm1117_vm2, %v1393_v31  ;;  %v1423_v37 = vpack.c.bf16 %v842_v32, %v842_v32  ;;  %v615_v38 = vadd.f32 %v1495_v36, %v1701_v34  ;;  %v1527_v39 = vpop.f32.mrb[16].mxu1  ;;  %v606_v40 = vpop.f32.mrb[17].mxu0 }
 0x107   : > { %1165 = vst.msk [vmem:[%s1713_s25 + $0xbc] sm:$0xf] %vm1117_vm2, %v1425_v33  ;;  %1131 = vst.msk [vmem:[%s1713_s25 + $0x34] sm:$0xf] %vm1117_vm2, %v1391_v35  ;;  %v743_v41 = vadd.f32 %v1527_v39, %v1701_v34  ;;  %v607_v42 = vadd.f32 %v1701_v34, %v606_v40  ;;  %v734_v43 = vpop.f32.mrb[17].mxu1  ;;  %v1496_v44 = vpop.f32.mrb[18].mxu0 }
 0x108   : > { %1163 = vst.msk [vmem:[%s1713_s25 + $0xb4] sm:$0xf] %vm1117_vm2, %v1423_v37  ;;  %v815_v45 = vmax.f32 %v615_v38, 0.0  ;;  %v735_v46 = vadd.f32 %v1701_v34, %v734_v43  ;;  %v618_v47 = vadd.f32 %v1496_v44, %v1701_v34  ;;  %v1528_v48 = vpop.f32.mrb[18].mxu1  ;;  %v609_v49 = vpop.f32.mrb[19].mxu0 }
 0x109   : > { %v847_v50 = vmax.f32 %v743_v41, 0.0  ;;  %v813_v51 = vmax.f32 %v607_v42, 0.0  ;;  %v746_v52 = vadd.f32 %v1528_v48, %v1701_v34  ;;  %v610_v53 = vadd.f32 %v1701_v34, %v609_v49  ;;  %v737_v54 = vpop.f32.mrb[19].mxu1 }
 0x10a   : > { %v1396_v55 = vpack.c.bf16 %v815_v45, %v815_v45  ;;  %v845_v56 = vmax.f32 %v735_v46, 0.0  ;;  %v816_v57 = vmax.f32 %v618_v47, 0.0  ;;  %v738_v58 = vadd.f32 %v1701_v34, %v737_v54 }
 0x10b   : > { %v1428_v59 = vpack.c.bf16 %v847_v50, %v847_v50  ;;  %v1394_v60 = vpack.c.bf16 %v813_v51, %v813_v51  ;;  %v848_v61 = vmax.f32 %v746_v52, 0.0  ;;  %v814_v62 = vmax.f32 %v610_v53, 0.0 }
 0x10c   : > { %1136 = vst.msk [vmem:[%s1713_s25 + $0x48] sm:$0xf] %vm1117_vm2, %v1396_v55  ;;  %v1426_v63 = vpack.c.bf16 %v845_v56, %v845_v56  ;;  %v1397_v0 = vpack.c.bf16 %v816_v57, %v816_v57  ;;  %v846_v1 = vmax.f32 %v738_v58, 0.0 }
 0x10d   : > { %1168 = vst.msk [vmem:[%s1713_s25 + $0xc8] sm:$0xf] %vm1117_vm2, %v1428_v59  ;;  %1134 = vst.msk [vmem:[%s1713_s25 + $0x40] sm:$0xf] %vm1117_vm2, %v1394_v60  ;;  %v1429_v2 = vpack.c.bf16 %v848_v61, %v848_v61  ;;  %v1395_v3 = vpack.c.bf16 %v814_v62, %v814_v62  ;;  %v1499_v4 = vpop.f32.mrb[20].mxu0 }
 0x10e   : > { %1166 = vst.msk [vmem:[%s1713_s25 + $0xc0] sm:$0xf] %vm1117_vm2, %v1426_v63  ;;  %1137 = vst.msk [vmem:[%s1713_s25 + $0x4c] sm:$0xf] %vm1117_vm2, %v1397_v0  ;;  %v1427_v5 = vpack.c.bf16 %v846_v1, %v846_v1  ;;  %v631_v6 = vadd.f32 %v1499_v4, %v1701_v34  ;;  %v1531_v7 = vpop.f32.mrb[20].mxu1  ;;  %v622_v8 = vpop.f32.mrb[21].mxu0 }
 0x10f   : > { %1169 = vst.msk [vmem:[%s1713_s25 + $0xcc] sm:$0xf] %vm1117_vm2, %v1429_v2  ;;  %1135 = vst.msk [vmem:[%s1713_s25 + $0x44] sm:$0xf] %vm1117_vm2, %v1395_v3  ;;  %v759_v9 = vadd.f32 %v1531_v7, %v1701_v34  ;;  %v623_v10 = vadd.f32 %v1701_v34, %v622_v8  ;;  %v750_v11 = vpop.f32.mrb[21].mxu1  ;;  %v1500_v12 = vpop.f32.mrb[22].mxu0 }
 0x110   : > { %1167 = vst.msk [vmem:[%s1713_s25 + $0xc4] sm:$0xf] %vm1117_vm2, %v1427_v5  ;;  %v819_v13 = vmax.f32 %v631_v6, 0.0  ;;  %v751_v14 = vadd.f32 %v1701_v34, %v750_v11  ;;  %v634_v15 = vadd.f32 %v1500_v12, %v1701_v34  ;;  %v1532_v16 = vpop.f32.mrb[22].mxu1  ;;  %v625_v17 = vpop.f32.mrb[23].mxu0 }
 0x111   : > { %v851_v18 = vmax.f32 %v759_v9, 0.0  ;;  %v817_v19 = vmax.f32 %v623_v10, 0.0  ;;  %v762_v20 = vadd.f32 %v1532_v16, %v1701_v34  ;;  %v626_v21 = vadd.f32 %v1701_v34, %v625_v17  ;;  %v753_v22 = vpop.f32.mrb[23].mxu1 }
 0x112   : > { %v1400_v23 = vpack.c.bf16 %v819_v13, %v819_v13  ;;  %v849_v24 = vmax.f32 %v751_v14, 0.0  ;;  %v820_v25 = vmax.f32 %v634_v15, 0.0  ;;  %v754_v26 = vadd.f32 %v1701_v34, %v753_v22 }
 0x113   : > { %v1432_v27 = vpack.c.bf16 %v851_v18, %v851_v18  ;;  %v1398_v28 = vpack.c.bf16 %v817_v19, %v817_v19  ;;  %v852_v29 = vmax.f32 %v762_v20, 0.0  ;;  %v818_v30 = vmax.f32 %v626_v21, 0.0 }
 0x114   : > { %1140 = vst.msk [vmem:[%s1713_s25 + $0x58] sm:$0xf] %vm1117_vm2, %v1400_v23  ;;  %v1430_v31 = vpack.c.bf16 %v849_v24, %v849_v24  ;;  %v1401_v32 = vpack.c.bf16 %v820_v25, %v820_v25  ;;  %v850_v33 = vmax.f32 %v754_v26, 0.0 }
 0x115   : > { %1172 = vst.msk [vmem:[%s1713_s25 + $0xd8] sm:$0xf] %vm1117_vm2, %v1432_v27  ;;  %1138 = vst.msk [vmem:[%s1713_s25 + $0x50] sm:$0xf] %vm1117_vm2, %v1398_v28  ;;  %v1433_v35 = vpack.c.bf16 %v852_v29, %v852_v29  ;;  %v1399_v36 = vpack.c.bf16 %v818_v30, %v818_v30  ;;  %v1503_v37 = vpop.f32.mrb[24].mxu0 }
 0x116   : > { %1170 = vst.msk [vmem:[%s1713_s25 + $0xd0] sm:$0xf] %vm1117_vm2, %v1430_v31  ;;  %1141 = vst.msk [vmem:[%s1713_s25 + $0x5c] sm:$0xf] %vm1117_vm2, %v1401_v32  ;;  %v1431_v38 = vpack.c.bf16 %v850_v33, %v850_v33  ;;  %v647_v39 = vadd.f32 %v1503_v37, %v1701_v34  ;;  %v1535_v40 = vpop.f32.mrb[24].mxu1  ;;  %v638_v41 = vpop.f32.mrb[25].mxu0 }
 0x117   : > { %1173 = vst.msk [vmem:[%s1713_s25 + $0xdc] sm:$0xf] %vm1117_vm2, %v1433_v35  ;;  %1139 = vst.msk [vmem:[%s1713_s25 + $0x54] sm:$0xf] %vm1117_vm2, %v1399_v36  ;;  %v775_v42 = vadd.f32 %v1535_v40, %v1701_v34  ;;  %v639_v43 = vadd.f32 %v1701_v34, %v638_v41  ;;  %v766_v44 = vpop.f32.mrb[25].mxu1  ;;  %v1504_v45 = vpop.f32.mrb[26].mxu0 }
 0x118   : > { %1171 = vst.msk [vmem:[%s1713_s25 + $0xd4] sm:$0xf] %vm1117_vm2, %v1431_v38  ;;  %v823_v46 = vmax.f32 %v647_v39, 0.0  ;;  %v767_v47 = vadd.f32 %v1701_v34, %v766_v44  ;;  %v650_v48 = vadd.f32 %v1504_v45, %v1701_v34  ;;  %v1536_v49 = vpop.f32.mrb[26].mxu1  ;;  %v641_v50 = vpop.f32.mrb[27].mxu0 }
 0x119   : > { %v855_v51 = vmax.f32 %v775_v42, 0.0  ;;  %v821_v52 = vmax.f32 %v639_v43, 0.0  ;;  %v778_v53 = vadd.f32 %v1536_v49, %v1701_v34  ;;  %v642_v54 = vadd.f32 %v1701_v34, %v641_v50  ;;  %v769_v55 = vpop.f32.mrb[27].mxu1 }
 0x11a   : > { %v1404_v56 = vpack.c.bf16 %v823_v46, %v823_v46  ;;  %v853_v57 = vmax.f32 %v767_v47, 0.0  ;;  %v824_v58 = vmax.f32 %v650_v48, 0.0  ;;  %v770_v59 = vadd.f32 %v1701_v34, %v769_v55 }
 0x11b   : > { %v1436_v60 = vpack.c.bf16 %v855_v51, %v855_v51  ;;  %v1402_v61 = vpack.c.bf16 %v821_v52, %v821_v52  ;;  %v856_v62 = vmax.f32 %v778_v53, 0.0  ;;  %v822_v63 = vmax.f32 %v642_v54, 0.0 }
 0x11c   : > { %1144 = vst.msk [vmem:[%s1713_s25 + $0x68] sm:$0xf] %vm1117_vm2, %v1404_v56  ;;  %v1434_v0 = vpack.c.bf16 %v853_v57, %v853_v57  ;;  %v1405_v1 = vpack.c.bf16 %v824_v58, %v824_v58  ;;  %v854_v2 = vmax.f32 %v770_v59, 0.0 }
 0x11d   : > { %1176 = vst.msk [vmem:[%s1713_s25 + $0xe8] sm:$0xf] %vm1117_vm2, %v1436_v60  ;;  %1142 = vst.msk [vmem:[%s1713_s25 + $0x60] sm:$0xf] %vm1117_vm2, %v1402_v61  ;;  %v1437_v3 = vpack.c.bf16 %v856_v62, %v856_v62  ;;  %v1403_v4 = vpack.c.bf16 %v822_v63, %v822_v63  ;;  %v1507_v5 = vpop.f32.mrb[28].mxu0 }
 0x11e   : > { %1174 = vst.msk [vmem:[%s1713_s25 + $0xe0] sm:$0xf] %vm1117_vm2, %v1434_v0  ;;  %1145 = vst.msk [vmem:[%s1713_s25 + $0x6c] sm:$0xf] %vm1117_vm2, %v1405_v1  ;;  %v1435_v6 = vpack.c.bf16 %v854_v2, %v854_v2  ;;  %v663_v7 = vadd.f32 %v1507_v5, %v1701_v34  ;;  %v1539_v8 = vpop.f32.mrb[28].mxu1  ;;  %v654_v9 = vpop.f32.mrb[29].mxu0 }
 0x11f   : > { %1177 = vst.msk [vmem:[%s1713_s25 + $0xec] sm:$0xf] %vm1117_vm2, %v1437_v3  ;;  %1143 = vst.msk [vmem:[%s1713_s25 + $0x64] sm:$0xf] %vm1117_vm2, %v1403_v4  ;;  %v791_v10 = vadd.f32 %v1539_v8, %v1701_v34  ;;  %v655_v11 = vadd.f32 %v1701_v34, %v654_v9  ;;  %v782_v12 = vpop.f32.mrb[29].mxu1  ;;  %v1508_v13 = vpop.f32.mrb[30].mxu0 }
 0x120   : > { %1175 = vst.msk [vmem:[%s1713_s25 + $0xe4] sm:$0xf] %vm1117_vm2, %v1435_v6  ;;  %v827_v14 = vmax.f32 %v663_v7, 0.0  ;;  %v783_v15 = vadd.f32 %v1701_v34, %v782_v12  ;;  %v666_v16 = vadd.f32 %v1508_v13, %v1701_v34  ;;  %v1540_v17 = vpop.f32.mrb[30].mxu1  ;;  %v657_v18 = vpop.f32.mrb[31].mxu0 }
 0x121   : > { %v859_v19 = vmax.f32 %v791_v10, 0.0  ;;  %v825_v20 = vmax.f32 %v655_v11, 0.0  ;;  %v794_v21 = vadd.f32 %v1540_v17, %v1701_v34  ;;  %v658_v22 = vadd.f32 %v1701_v34, %v657_v18  ;;  %v785_v23 = vpop.f32.mrb[31].mxu1 }
 0x122   : > { %v1408_v24 = vpack.c.bf16 %v827_v14, %v827_v14  ;;  %v857_v25 = vmax.f32 %v783_v15, 0.0  ;;  %v828_v26 = vmax.f32 %v666_v16, 0.0  ;;  %v786_v27 = vadd.f32 %v1701_v34, %v785_v23 }
 0x123   : > { %v1440_v28 = vpack.c.bf16 %v859_v19, %v859_v19  ;;  %v1406_v29 = vpack.c.bf16 %v825_v20, %v825_v20  ;;  %v860_v30 = vmax.f32 %v794_v21, 0.0  ;;  %v826_v31 = vmax.f32 %v658_v22, 0.0 }
 0x124   : > { %1148 = vst.msk [vmem:[%s1713_s25 + $0x78] sm:$0xf] %vm1117_vm2, %v1408_v24  ;;  %v1438_v32 = vpack.c.bf16 %v857_v25, %v857_v25  ;;  %v1409_v33 = vpack.c.bf16 %v828_v26, %v828_v26  ;;  %v858_v35 = vmax.f32 %v786_v27, 0.0 }
 0x125   : > { %1180 = vst.msk [vmem:[%s1713_s25 + $0xf8] sm:$0xf] %vm1117_vm2, %v1440_v28  ;;  %1146 = vst.msk [vmem:[%s1713_s25 + $0x70] sm:$0xf] %vm1117_vm2, %v1406_v29  ;;  %v1441_v36 = vpack.c.bf16 %v860_v30, %v860_v30  ;;  %v1407_v37 = vpack.c.bf16 %v826_v31, %v826_v31 }
 0x126   : > { %1178 = vst.msk [vmem:[%s1713_s25 + $0xf0] sm:$0xf] %vm1117_vm2, %v1438_v32  ;;  %1149 = vst.msk [vmem:[%s1713_s25 + $0x7c] sm:$0xf] %vm1117_vm2, %v1409_v33  ;;  %v1439_v34 = vpack.c.bf16 %v858_v35, %v858_v35 }
 0x127   : > { %1181 = vst.msk [vmem:[%s1713_s25 + $0xfc] sm:$0xf] %vm1117_vm2, %v1441_v36  ;;  %1147 = vst.msk [vmem:[%s1713_s25 + $0x74] sm:$0xf] %vm1117_vm2, %v1407_v37 }
 0x128   : > { %1179 = vst.msk [vmem:[%s1713_s25 + $0xf4] sm:$0xf] %vm1117_vm2, %v1439_v34 }
 0x129 PF: > { %s13_s12 = sadd.s32 1, %s1591_s12  }
 0x12a   : > { %p10_p4 = scmp.ge.s32.totalorder %s13_s12, 4  }
 0x12c   :  { %12 = sbr.rel (!%p10_p4) target bundleno = 1 (0x1), region = 62 }

// kernel: bottleneck_forward.5
= control target key start
LH: loop header
LB: loop body
LE: loop exit
PB: predicated region body
PF: predicated region fallthrough
CT: control target
= control target key end

     0   :  { %s2122_s18 = smov 0   ;;  %s2124_s19 = smov 0   ;;  %s2357_s0 = inlined_call_operand.vmem [shape: bf16[2,10,80,12], index: 0, kind: input, shape index: {}, may-alias: {0,1,2}]   ;;  %s2358_s1 = inlined_call_operand.vmem [shape: bf16[2,10,80,12], index: 1, kind: input, shape index: {}, may-alias: {0,1,2}]   ;;  %s2359_s2 = inlined_call_operand.vmem [shape: bf16[2,10,80,12], index: 2, kind: input, shape index: {}, may-alias: {0,1,2}]   ;;  %s2360_s3 = inlined_call_operand.vmem [shape: bf16[9,12,4], index: 3, kind: input, shape index: {}]   ;;  %s2361_s4 = inlined_call_operand.vmem [shape: f32[1,4], index: 4, kind: input, shape index: {}]   ;;  %s2362_s5 = inlined_call_operand.vmem [shape: bf16[2,8,64,4], index: 5, kind: output, shape index: {}]  }
   0x1   :  { %s2126_s20 = smov 0   ;;  %s2128_s21 = smov 0  }
   0x2   :  { %s2130_s22 = smov 0  }
   0x3 LB: > { %s24_s23 = sadd.s32 1, %s2082_s20  ;;  %s27_s24 = sadd.s32 1, %s2086_s21  ;;  %s2090_s22 = sphi %s2130_s22, %s15_s22   ;;  %s2086_s21 = sphi %s2128_s21, %s2367_s21   ;;  %s2082_s20 = sphi %s2126_s20, %s2366_s20   ;;  %s2078_s19 = sphi %s2124_s19, %s2365_s19   ;;  %s2074_s18 = sphi %s2122_s18, %s2364_s18  }
   0x4   : > { %p25_p0 = scmp.ge.s32.totalorder %s24_s23, 8  ;;  %p1629_p1 = scmp.ge.s32.totalorder %s2090_s22, 1 }
   0x5   : > { %p247_p2 = scmp.lt.s32.totalorder %s2090_s22, 17 }
   0x6   : > { %s2369_s23 = smov (%p25_p0, %s24_s23), 0  ;;  %s2371_s24 = smov (!%p25_p0, %s27_s24), %s2086_s21 }
   0x7   : > { %p248_p3 = pnand %p1629_p1, %p247_p2  ;;  %p29_p4 = scmp.ge.s32.totalorder %s2371_s24, 2 }
   0x8   : > { %v2007_v0 = vld [vmem:[%s2360_s3 + $0x8] sm:$0x3f] (!%p248_p3)   ;;  %vm396_vm0 = vcmask (!%p248_p3), 1045504   ;;  %p303_p5 = scmp.lt.s32.totalorder (!%p248_p3), %s2078_s19, 1  ;;  %v2161_v1 = vld [vmem:[%s2360_s3 + $0x20] sm:$0x3f] (!%p248_p3)  }
   0x9   : > { %s2373_s24 = smov (%p29_p4, %s2371_s24), 0  ;;  %251 = sbr.rel (%p248_p3) target bundleno = 320 (0x140), region = 40 }
   0xa   : > { %1953 = vmatprep.subr.msk.bf16.mxu1 (!%p248_p3), %vm396_vm0, %v2007_v0  ;;  %v398_v2 = vsel (!%p248_p3), %vm396_vm0, %v2007_v0, 0  ;;  %p305_p6 = scmp.lt.s32.totalorder (!%p248_p3), %s2074_s18, 9  ;;  %s312_s29 = sadd.s32 (!%p248_p3), 1, %s2074_s18  ;;  %1957 = vmatprep.subr.msk.bf16.mxu0 (!%p248_p3), %vm396_vm0, %v2161_v1  ;;  %v2172_v3 = vsel (!%p248_p3), %vm396_vm0, %v2161_v1, 0  ;;  %v2013_v4 = vld [vmem:[%s2360_s3] sm:$0x3f] (!%p248_p3)  }
   0xb   : > { %1798 = vmatpush3.bf16.msra.mxu1 (!%p248_p3), %v398_v2  ;;  %1838 = vmatpush3.bf16.msra.mxu0 (!%p248_p3), %v2172_v3  ;;  %p315_p7 = scmp.lt.s32.totalorder (!%p248_p3), %s312_s29, 9  ;;  %v2015_v5 = vld [vmem:[%s2360_s3 + $0x28] sm:$0x3f] (!%p248_p3)   ;;  %s323_s12 = sadd.s32 (!%p248_p3), 2, %s2074_s18  ;;  %vm383_vm1 = vcmask (!%p248_p3), 97280   ;;  %v489_v11 = vsel (!%p248_p3), %vm396_vm0, %v2013_v4, 0 }
   0xc   : > { %1954 = vmatprep.subr.msk.bf16.mxu1 (!%p248_p3), %vm396_vm0, %v2013_v4  ;;  %1959 = vmatprep.subr.msk.bf16.mxu0 (!%p248_p3), %vm396_vm0, %v2015_v5  ;;  %p2194_p8 = scmp.lt.s32.totalorder (!%p248_p3), %s323_s12, 9  ;;  %v2020_v15 = vld [vmem:[%s2360_s3 + $0x30] sm:$0x3f] (!%p248_p3)   ;;  %v977_v22 = vsel (!%p248_p3), %vm396_vm0, %v2015_v5, 0  ;;  %v2028_v31 = vld [vmem:[%s2360_s3 + $0x38] sm:$0x3f] (!%p248_p3)  }
   0xd   : > { %v2022_v16 = vld [vmem:[%s2360_s3 + $0x10] sm:$0x3f] (!%p248_p3)   ;;  %v1101_v28 = vsel (!%p248_p3), %vm396_vm0, %v2020_v15, 0  ;;  %v2032_v34 = vld [vmem:[%s2360_s3 + $0x18] sm:$0x3f] (!%p248_p3)   ;;  %v1225_v41 = vsel (!%p248_p3), %vm396_vm0, %v2028_v31, 0 }
   0xe   : > { %v605_v32 = vsel (!%p248_p3), %vm396_vm0, %v2022_v16, 0  ;;  %v2038_v43 = vld [vmem:[%s2360_s3 + $0x40] sm:$0x3f] (!%p248_p3)   ;;  %v729_v45 = vsel (!%p248_p3), %vm396_vm0, %v2032_v34, 0  ;;  %p336_p9 = scmp.lt.s32.totalorder (!%p248_p3), %s2074_s18, 7  ;;  %vm1479_vm2 = vcmask (!%p248_p3), 27648  }
   0xf   : > { %v1349_v52 = vsel (!%p248_p3), %vm396_vm0, %v2038_v43, 0  ;;  %v1733_v4 = vld [vmem:[%s2361_s4] ss:$0 sm:$0xff] (!%p248_p3) }
  0x10   : > { %s2375_s19 = smov (!%p303_p5, %s2078_s19), 1  ;;  %s2377_s29 = smov (!%p315_p7, %s312_s29), 9 }
  0x11   : > { %s306_s30 = scalar_select %p305_p6, %s2074_s18, 9 }
  0x12   : > { %s2180_s8 = smul.u32 100, %s2375_s19  ;;  %s2379_s12 = smov (!%p2194_p8, %s323_s12), 9 }
  0x13   : > { %s1963_s11 = smul.u32 10, %s306_s30  ;;  %s2381_s18 = smov (!%p336_p9, %s2074_s18), 7 }
  0x14   : > { %s1965_s15 = smul.u32 10, %s2377_s29  ;;  %s1634_s7 = sshll.u32 %s2375_s19, 6 }
  0x15   : > { %s309_s13 = sadd.s32 %s2180_s8, %s1963_s11 }
  0x16   : > { %s1630_s14 = sshll.u32 %s309_s13, 2  ;;  %s319_s27 = sadd.s32 %s1965_s15, %s2180_s8 }
  0x17   : > { %s2192_s25 = scalar_lea.vmem %s2357_s0, %s1630_s14  ;;  %s1631_s28 = sshll.u32 %s319_s27, 2 }
  0x18   : > { %v345_v6 = vld [vmem:[%s2192_s25 + $0x4] sm:$0xf]  ;;  %v346_v7 = vld [vmem:[%s2192_s25 + $0x8] sm:$0xf]  ;;  %v347_v8 = vld [vmem:[%s2192_s25 + $0xc] sm:$0xf]  ;;  %s2207_s6 = scalar_lea.vmem %s2358_s1, %s1631_s28 }
  0x19   : > { %v348_v9 = vld [vmem:[%s2192_s25 + $0x10] sm:$0xf]  ;;  %v1638_v10 = vcombine.low %v345_v6, %v346_v7  ;;  %v349_v13 = vld [vmem:[%s2192_s25 + $0x14] sm:$0xf]  ;;  %v350_v14 = vld [vmem:[%s2192_s25 + $0x18] sm:$0xf]  ;;  %v1648_v30 = vcombine.low %v346_v7, %v347_v8 }
  0x1a   : > { %v1639_v12 = vcombine.low %v347_v8, %v348_v9  ;;  %v2014_v17 = vld [vmem:[%s2207_s6 + $0x4] sm:$0xff]   ;;  %v1640_v18 = vcombine.low %v349_v13, %v350_v14  ;;  %v351_v19 = vld [vmem:[%s2192_s25 + $0x1c] sm:$0xf]  ;;  %v344_v20 = vld [vmem:[%s2192_s25] sm:$0xf]  ;;  %s1966_s13 = smul.u32 10, %s2379_s12  ;;  %v1649_v33 = vcombine.low %v348_v9, %v349_v13 }
  0x1b   : > { %1799 = vmatprep.mubr.msk.bf16.mxu1 %vm383_vm1, %v1638_v10  ;;  %v2016_v21 = vld [vmem:[%s2207_s6 + $0xc] sm:$0xff]   ;;  %1839 = vmatprep.mubr.msk.bf16.mxu0 %vm383_vm1, %v2014_v17  ;;  %v354_v23 = vld [vmem:[%s2192_s25 + $0x20] sm:$0xf]  ;;  %v1647_v26 = vcombine.low %v344_v20, %v345_v6  ;;  %v2023_v29 = vld [vmem:[%s2207_s6 + $0x18] sm:$0xff]   ;;  %v1650_v37 = vcombine.low %v350_v14, %v351_v19 }
  0x1c   : > { %1800 = vmatmul.mubr.msk.bf16.vlgmr.msra.gmra.mrb[0].mxu1 %vm383_vm1, %v1639_v12  ;;  %v2019_v24 = vld [vmem:[%s2207_s6 + $0x8] sm:$0xff]   ;;  %1840 = vmatmul.mubr.msk.bf16.vlgmr.msra.gmra.mrb[0].mxu0 %vm383_vm1, %v2016_v21  ;;  %s330_s14 = sadd.s32 %s1966_s13, %s2180_s8  ;;  %v1641_v25 = vcombine.low %v351_v19, %v354_v23  ;;  %v2021_v27 = vld [vmem:[%s2207_s6 + $0x10] sm:$0xff]   ;;  %v2024_v35 = vld [vmem:[%s2207_s6 + $0x20] sm:$0xff]  }
  0x1d   : > { %1808 = vmatpush3.bf16.msra.mxu1 %v489_v11  ;;  %1803 = vmatprep.mubr.msk.bf16.mxu1 %vm383_vm1, %v1640_v18  ;;  %s1632_s15 = sshll.u32 %s330_s14, 2  ;;  %v2030_v38 = vld [vmem:[%s2192_s25 + $0x8] sm:$0xff]   ;;  %v2031_v40 = vld [vmem:[%s2192_s25 + $0x10] sm:$0xff]   ;;  %v2035_v44 = vld [vmem:[%s2192_s25 + $0x18] sm:$0xff]  }
  0x1e   : > { %1848 = vmatpush3.bf16.msra.mxu0 %v977_v22  ;;  %1849 = vmatprep.mubr.msk.bf16.mxu0 %vm383_vm1, %v2019_v24  ;;  %s2238_s17 = scalar_lea.vmem %s2359_s2, %s1632_s15  ;;  %v2036_v48 = vld [vmem:[%s2192_s25 + $0x20] sm:$0xff]   ;;  %v2041_v53 = vld [vmem:[%s2207_s6 + $0x8] sm:$0xff]   ;;  %v2044_v54 = vld [vmem:[%s2207_s6 + $0x10] sm:$0xff]   ;;  %s1633_s25 = sshll.u32 %s2381_s18, 3 }
  0x1f   : > { %1960 = vmatprep.subr.msk.bf16.mxu0 %vm396_vm0, %v2020_v15  ;;  %1955 = vmatprep.subr.msk.bf16.mxu1 %vm396_vm0, %v2022_v16  ;;  %v2027_v36 = vld [vmem:[%s2238_s17] sm:$0xff]   ;;  %v2029_v39 = vld [vmem:[%s2238_s17 + $0x8] sm:$0xff]   ;;  %v2033_v42 = vld [vmem:[%s2238_s17 + $0x10] sm:$0xff]   ;;  %s340_s9 = sadd.s32 %s1634_s7, %s1633_s25 }
  0x20   : > { %v2034_v46 = vld [vmem:[%s2238_s17 + $0x18] sm:$0xff]   ;;  %v2037_v47 = vld [vmem:[%s2238_s17 + $0x4] sm:$0xff]   ;;  %v2039_v50 = vld [vmem:[%s2238_s17 + $0xc] sm:$0xff]  }
  0x21   : > { %v2040_v49 = vld [vmem:[%s2207_s6] sm:$0xff]   ;;  %v2042_v51 = vld [vmem:[%s2238_s17 + $0x14] sm:$0xff]   ;;  %v2046_v56 = vld [vmem:[%s2238_s17 + $0x8] sm:$0xff]  }
  0x22   : > { %v2043_v55 = vld [vmem:[%s2238_s17 + $0x1c] sm:$0xff]   ;;  %v2048_v58 = vld [vmem:[%s2207_s6 + $0x14] sm:$0xff]  }
  0x23   : > { %v2045_v57 = vld [vmem:[%s2207_s6 + $0x18] sm:$0xff]   ;;  %v2047_v59 = vld [vmem:[%s2238_s17 + $0x10] sm:$0xff]   ;;  %v2051_v62 = vld [vmem:[%s2238_s17 + $0x20] sm:$0xff]  }
  0x24   : > { %1804 = vmatmul.mubr.msk.bf16.gmra.mrb[4].mxu1 %vm383_vm1, %v1641_v25  ;;  %v2050_v60 = vld [vmem:[%s2238_s17 + $0x18] sm:$0xff]  }
  0x25   : > { %1809 = vmatprep.mubr.msk.bf16.mxu1 %vm383_vm1, %v1647_v26  ;;  %v2049_v61 = vld [vmem:[%s2207_s6 + $0x1c] sm:$0xff]   ;;  %s1635_s6 = sshll.u32 %s340_s9, 2 }
  0x26   : > { %s2324_s13 = scalar_lea.vmem %s2362_s5, %s1635_s6 }
  0x28   : > { %1850 = vmatmul.mubr.msk.bf16.vlgmr.msra.gmra.mrb[0].mxu0 %vm383_vm1, %v2021_v27 }
  0x29   : > { %1858 = vmatpush3.bf16.msra.mxu0 %v1101_v28  ;;  %1853 = vmatprep.mubr.msk.bf16.mxu0 %vm383_vm1, %v2023_v29 }
  0x2a   : > { %1961 = vmatprep.subr.msk.bf16.mxu0 %vm396_vm0, %v2028_v31 }
  0x2c   : > { %1810 = vmatmul.mubr.msk.bf16.vlgmr.msra.gmra.mrb[0].mxu1 %vm383_vm1, %v1648_v30 }
  0x2d   : > { %1818 = vmatpush3.bf16.msra.mxu1 %v605_v32  ;;  %1813 = vmatprep.mubr.msk.bf16.mxu1 %vm383_vm1, %v1649_v33 }
  0x2e   : > { %1956 = vmatprep.subr.msk.bf16.mxu1 %vm396_vm0, %v2032_v34 }
  0x30   : > { %1854 = vmatmul.mubr.msk.bf16.gmra.mrb[4].mxu0 %vm383_vm1, %v2024_v35 }
  0x31   : > { %1859 = vmatprep.mubr.msk.bf16.mxu0 %vm383_vm1, %v2027_v36 }
  0x34   : > { %1814 = vmatmul.mubr.msk.bf16.gmra.mrb[4].mxu1 %vm383_vm1, %v1650_v37 }
  0x35   : > { %1819 = vmatprep.mubr.msk.bf16.mxu1 %vm383_vm1, %v2030_v38 }
  0x38   : > { %1860 = vmatmul.mubr.msk.bf16.vlgmr.msra.gmra.mrb[0].mxu0 %vm383_vm1, %v2029_v39 }
  0x39   : > { %1868 = vmatpush3.bf16.msra.mxu0 %v1225_v41  ;;  %1863 = vmatprep.mubr.msk.bf16.mxu0 %vm383_vm1, %v2033_v42 }
  0x3a   : > { %1962 = vmatprep.subr.msk.bf16.mxu0 %vm396_vm0, %v2038_v43 }
  0x3c   : > { %1820 = vmatmul.mubr.msk.bf16.vlgmr.msra.gmra.mrb[0].mxu1 %vm383_vm1, %v2031_v40 }
  0x3d   : > { %1828 = vmatpush3.bf16.msra.mxu1 %v729_v45  ;;  %1823 = vmatprep.mubr.msk.bf16.mxu1 %vm383_vm1, %v2035_v44 }
  0x3e   : > { %1958 = vmatprep.subr.msk.bf16.mxu1 %vm396_vm0, %v2161_v1 }
  0x40   : > { %1864 = vmatmul.mubr.msk.bf16.gmra.mrb[4].mxu0 %vm383_vm1, %v2034_v46 }
  0x41   : > { %1869 = vmatprep.mubr.msk.bf16.mxu0 %vm383_vm1, %v2037_v47 }
  0x44   : > { %1824 = vmatmul.mubr.msk.bf16.gmra.mrb[4].mxu1 %vm383_vm1, %v2036_v48 }
  0x45   : > { %1829 = vmatprep.mubr.msk.bf16.mxu1 %vm383_vm1, %v2040_v49 }
  0x48   : > { %1870 = vmatmul.mubr.msk.bf16.vlgmr.msra.gmra.mrb[0].mxu0 %vm383_vm1, %v2039_v50 }
  0x49   : > { %1878 = vmatpush3.bf16.msra.mxu0 %v1349_v52  ;;  %1873 = vmatprep.mubr.msk.bf16.mxu0 %vm383_vm1, %v2042_v51 }
  0x4c   : > { %1830 = vmatmul.mubr.msk.bf16.vlgmr.msra.gmra.mrb[0].mxu1 %vm383_vm1, %v2041_v53 }
  0x4d   : > { %1888 = vmatpush3.bf16.msra.mxu1 %v2172_v3  ;;  %1833 = vmatprep.mubr.msk.bf16.mxu1 %vm383_vm1, %v2044_v54 }
  0x50   : > { %1874 = vmatmul.mubr.msk.bf16.gmra.mrb[4].mxu0 %vm383_vm1, %v2043_v55 }
  0x51   : > { %1879 = vmatprep.mubr.msk.bf16.mxu0 %vm383_vm1, %v2046_v56 }
  0x54   : > { %1834 = vmatmul.mubr.msk.bf16.gmra.mrb[4].mxu1 %vm383_vm1, %v2045_v57 }
  0x55   : > { %1843 = vmatprep.mubr.msk.bf16.mxu1 %vm383_vm1, %v2048_v58 }
  0x58   : > { %1880 = vmatmul.mubr.msk.bf16.vlgmr.msra.gmra.mrb[0].mxu0 %vm383_vm1, %v2047_v59 }
  0x59   : > { %1883 = vmatprep.mubr.msk.bf16.mxu0 %vm383_vm1, %v2050_v60 }
  0x60   : > { %1844 = vmatmul.mubr.msk.bf16.vlgmr.msra.gmra.mrb[4].mxu1 %vm383_vm1, %v2049_v61  ;;  %1884 = vmatmul.mubr.msk.bf16.gmra.mrb[4].mxu0 %vm383_vm1, %v2051_v62 }
 0x11f   : > { %v1831_v63 = vpop.f32.mrb[0].mxu1 }
 0x120   : > { %v765_v0 = vpop.f32.mrb[1].mxu1 }
 0x121   : > { %v1832_v1 = vpop.f32.mrb[2].mxu1 }
 0x122   : > { %v768_v2 = vpop.f32.mrb[3].mxu1 }
 0x12b   : > { %v1881_v3 = vpop.f32.mrb[0].mxu0 }
 0x12c   : > { %v1889_v5 = vadd.f32 %v1881_v3, %v1831_v63  ;;  %v1385_v6 = vpop.f32.mrb[1].mxu0 }
 0x12d   : > { %v1890_v7 = vadd.f32 %v1385_v6, %v765_v0  ;;  %v1882_v8 = vpop.f32.mrb[2].mxu0 }
 0x12e   : > { %v1433_v9 = vadd.f32 %v1889_v5, %v1733_v4  ;;  %v1891_v10 = vadd.f32 %v1882_v8, %v1832_v1  ;;  %v1388_v11 = vpop.f32.mrb[3].mxu0 }
 0x12f   : > { %v1431_v12 = vadd.f32 %v1890_v7, %v1733_v4  ;;  %v1892_v13 = vadd.f32 %v1388_v11, %v768_v2 }
 0x130   : > { %v1441_v14 = vmax.f32 %v1433_v9, 0.0  ;;  %v1434_v15 = vadd.f32 %v1891_v10, %v1733_v4 }
 0x131   : > { %v1439_v16 = vmax.f32 %v1431_v12, 0.0  ;;  %v1432_v17 = vadd.f32 %v1892_v13, %v1733_v4 }
 0x132   : > { %v1746_v19 = vpack.c.bf16 %v1441_v14, %v1441_v14  ;;  %v1442_v20 = vmax.f32 %v1434_v15, 0.0 }
 0x133   : > { %v1845_v18 = vpop.f32.mrb[4].mxu1  ;;  %v1744_v22 = vpack.c.bf16 %v1439_v16, %v1439_v16  ;;  %v1440_v23 = vmax.f32 %v1432_v17, 0.0  ;;  %v1885_v24 = vpop.f32.mrb[4].mxu0 }
 0x134   : > { %v905_v21 = vpop.f32.mrb[5].mxu1  ;;  %1482 = vst.msk [vmem:[%s2324_s13 + $0x8] sm:$0xf] %vm1479_vm2, %v1746_v19  ;;  %v1747_v26 = vpack.c.bf16 %v1442_v20, %v1442_v20  ;;  %v1893_v27 = vadd.f32 %v1885_v24, %v1845_v18  ;;  %v1401_v28 = vpop.f32.mrb[5].mxu0 }
 0x135   : > { %v1846_v25 = vpop.f32.mrb[6].mxu1  ;;  %1480 = vst.msk [vmem:[%s2324_s13] sm:$0xf] %vm1479_vm2, %v1744_v22  ;;  %v1745_v30 = vpack.c.bf16 %v1440_v23, %v1440_v23  ;;  %v1894_v31 = vadd.f32 %v1401_v28, %v905_v21  ;;  %v1886_v32 = vpop.f32.mrb[6].mxu0 }
 0x136   : > { %v908_v29 = vpop.f32.mrb[7].mxu1  ;;  %1483 = vst.msk [vmem:[%s2324_s13 + $0xc] sm:$0xf] %vm1479_vm2, %v1747_v26  ;;  %v1437_v33 = vadd.f32 %v1893_v27, %v1733_v4  ;;  %v1895_v34 = vadd.f32 %v1886_v32, %v1846_v25  ;;  %v1404_v35 = vpop.f32.mrb[7].mxu0 }
 0x137   : > { %1481 = vst.msk [vmem:[%s2324_s13 + $0x4] sm:$0xf] %vm1479_vm2, %v1745_v30  ;;  %v1435_v36 = vadd.f32 %v1894_v31, %v1733_v4  ;;  %v1896_v37 = vadd.f32 %v1404_v35, %v908_v29 }
 0x138   : > { %v1445_v38 = vmax.f32 %v1437_v33, 0.0  ;;  %v1438_v39 = vadd.f32 %v1895_v34, %v1733_v4 }
 0x139   : > { %v1443_v40 = vmax.f32 %v1435_v36, 0.0  ;;  %v1436_v41 = vadd.f32 %v1896_v37, %v1733_v4 }
 0x13a   : > { %v1750_v42 = vpack.c.bf16 %v1445_v38, %v1445_v38  ;;  %v1446_v43 = vmax.f32 %v1438_v39, 0.0 }
 0x13b   : > { %v1748_v44 = vpack.c.bf16 %v1443_v40, %v1443_v40  ;;  %v1444_v45 = vmax.f32 %v1436_v41, 0.0 }
 0x13c   : > { %1486 = vst.msk [vmem:[%s2324_s13 + $0x18] sm:$0xf] %vm1479_vm2, %v1750_v42  ;;  %v1751_v46 = vpack.c.bf16 %v1446_v43, %v1446_v43 }
 0x13d   : > { %1484 = vst.msk [vmem:[%s2324_s13 + $0x10] sm:$0xf] %vm1479_vm2, %v1748_v44  ;;  %v1749_v47 = vpack.c.bf16 %v1444_v45, %v1444_v45 }
 0x13e   : > { %1487 = vst.msk [vmem:[%s2324_s13 + $0x1c] sm:$0xf] %vm1479_vm2, %v1751_v46 }
 0x13f   : > { %1485 = vst.msk [vmem:[%s2324_s13 + $0x14] sm:$0xf] %vm1479_vm2, %v1749_v47 }
 0x140 PF: > { %s15_s22 = sadd.s32 1, %s2090_s22   ;;  %s2364_s18 = smov %s2082_s20 }
 0x141   : > { %p12_p10 = scmp.ge.s32.totalorder %s15_s22, 18   ;;  %s2365_s19 = smov %s2086_s21 }
 0x142   : > { %s2366_s20 = smov %s2369_s23  ;;  %s2367_s21 = smov %s2373_s24 }
 0x143   :  { %14 = sbr.rel (!%p12_p10) target bundleno = 3 (0x3), region = 84 }

// kernel: bottleneck_forward.6
= control target key start
LH: loop header
LB: loop body
LE: loop exit
PB: predicated region body
PF: predicated region fallthrough
CT: control target
= control target key end

     0   :  { %s1549_s12 = smov 0   ;;  %s1841_s0 = inlined_call_operand.vmem [shape: bf16[1024,8], index: 0, kind: input, shape index: {}]   ;;  %s1842_s1 = inlined_call_operand.vmem [shape: bf16[8,16], index: 1, kind: input, shape index: {}]   ;;  %s1843_s2 = inlined_call_operand.vmem [shape: f32[1,16], index: 2, kind: input, shape index: {}]   ;;  %s1844_s3 = inlined_call_operand.vmem [shape: bf16[1024,16], index: 3, kind: output, shape index: {}]  }
   0x1 LB: > { %s1174_s13 = sadd.s32 4294967295, %s1527_s12   ;;  %p1178_p0 = scmp.ge.s32.totalorder %s1527_s12, 1  ;;  %s1527_s12 = sphi %s1549_s12, %s13_s12  }
   0x2   : > { %p138_p1 = scmp.lt.s32.totalorder %s1527_s12, 3 }
   0x4   : > { %p139_p2 = pnand %p1178_p0, %p138_p1 }
   0x5   : > { %v239_v0 = vld [vmem:[%s1842_s1] sm:$0xf] (!%p139_p2)  ;;  %vm504_vm0 = vcmask (!%p139_p2), 1043456   ;;  %s1179_s16 = sshll.u32 (!%p139_p2), %s1174_s13, 6  ;;  %vm407_vm1 = vcmask (!%p139_p2), 64512   ;;  %vm1053_vm2 = vcmask (!%p139_p2), 125952  }
   0x6   : > { %142 = sbr.rel (%p139_p2) target bundleno = 295 (0x127), region = 32  ;;  %1479 = vmatprep.subr.msk.bf16.mxu0 (!%p139_p2), %vm504_vm0, %v239_v0  ;;  %1480 = vmatprep.subr.msk.bf16.mxu1 (!%p139_p2), %vm504_vm0, %v239_v0  ;;  %v506_v1 = vsel (!%p139_p2), %vm504_vm0, %v239_v0, 0  ;;  %p163_p3 = scmp.lt.s32.totalorder (!%p139_p2), %s1179_s16, 127  ;;  %v1637_v34 = vld [vmem:[%s1843_s2] ss:$0 sm:$0xff] (!%p139_p2) }
   0x7   : > { %1412 = vmatpush3.bf16.msra.mxu0 (!%p139_p2), %v506_v1  ;;  %1478 = vmatpush3.bf16.msra.mxu1 (!%p139_p2), %v506_v1 }
   0xd   : > { %s1846_s16 = smov (!%p163_p3, %s1179_s16), 127 }
   0xe   : > { %s1180_s17 = sshll.u32 %s1846_s16, 2 }
   0xf   : > { %s1568_s20 = scalar_lea.vmem %s1841_s0, %s1180_s17  ;;  %s1645_s25 = scalar_lea.vmem %s1844_s3, %s1180_s17 }
  0x10   : > { %v1489_v2 = vld [vmem:[%s1568_s20] sm:$0xff]   ;;  %v1491_v4 = vld [vmem:[%s1568_s20 + $0x8] sm:$0xff]   ;;  %v1493_v6 = vld [vmem:[%s1568_s20 + $0x10] sm:$0xff]  }
  0x11   : > { %v1490_v3 = vld [vmem:[%s1568_s20 + $0x80] sm:$0xff]   ;;  %1413 = vmatprep.mubr.msk.bf16.mxu0 %vm407_vm1, %v1489_v2  ;;  %v1492_v5 = vld [vmem:[%s1568_s20 + $0x88] sm:$0xff]   ;;  %v1494_v7 = vld [vmem:[%s1568_s20 + $0x90] sm:$0xff]  }
  0x12   : > { %1445 = vmatprep.mubr.msk.bf16.mxu1 %vm407_vm1, %v1490_v3  ;;  %1414 = vmatmul.mubr.msk.bf16.vlgmr.msra.gmra.mrb[0].mxu0 %vm407_vm1, %v1491_v4  ;;  %v1495_v8 = vld [vmem:[%s1568_s20 + $0x18] sm:$0xff]   ;;  %v1497_v10 = vld [vmem:[%s1568_s20 + $0x20] sm:$0xff]   ;;  %v1499_v12 = vld [vmem:[%s1568_s20 + $0x28] sm:$0xff]  }
  0x13   : > { %1446 = vmatmul.mubr.msk.bf16.vlgmr.msra.gmra.mrb[0].mxu1 %vm407_vm1, %v1492_v5  ;;  %1417 = vmatprep.mubr.msk.bf16.mxu0 %vm407_vm1, %v1493_v6  ;;  %v1496_v9 = vld [vmem:[%s1568_s20 + $0x98] sm:$0xff]   ;;  %v1498_v11 = vld [vmem:[%s1568_s20 + $0xa0] sm:$0xff]   ;;  %v1500_v13 = vld [vmem:[%s1568_s20 + $0xa8] sm:$0xff]  }
  0x14   : > { %1449 = vmatprep.mubr.msk.bf16.mxu1 %vm407_vm1, %v1494_v7  ;;  %v1501_v14 = vld [vmem:[%s1568_s20 + $0x30] sm:$0xff]   ;;  %v1503_v16 = vld [vmem:[%s1568_s20 + $0x38] sm:$0xff]   ;;  %v1505_v18 = vld [vmem:[%s1568_s20 + $0x40] sm:$0xff]  }
  0x15   : > { %v1502_v15 = vld [vmem:[%s1568_s20 + $0xb0] sm:$0xff]   ;;  %v1504_v17 = vld [vmem:[%s1568_s20 + $0xb8] sm:$0xff]   ;;  %v1506_v19 = vld [vmem:[%s1568_s20 + $0xc0] sm:$0xff]  }
  0x16   : > { %v1507_v20 = vld [vmem:[%s1568_s20 + $0x48] sm:$0xff]   ;;  %v1509_v22 = vld [vmem:[%s1568_s20 + $0x50] sm:$0xff]   ;;  %v1511_v24 = vld [vmem:[%s1568_s20 + $0x58] sm:$0xff]  }
  0x17   : > { %v1508_v21 = vld [vmem:[%s1568_s20 + $0xc8] sm:$0xff]   ;;  %v1510_v23 = vld [vmem:[%s1568_s20 + $0xd0] sm:$0xff]   ;;  %v1512_v25 = vld [vmem:[%s1568_s20 + $0xd8] sm:$0xff]  }
  0x18   : > { %v1513_v26 = vld [vmem:[%s1568_s20 + $0x60] sm:$0xff]   ;;  %v1515_v28 = vld [vmem:[%s1568_s20 + $0x68] sm:$0xff]   ;;  %v1517_v30 = vld [vmem:[%s1568_s20 + $0x70] sm:$0xff]  }
  0x19   : > { %v1514_v27 = vld [vmem:[%s1568_s20 + $0xe0] sm:$0xff]   ;;  %v1516_v29 = vld [vmem:[%s1568_s20 + $0xe8] sm:$0xff]   ;;  %v1518_v31 = vld [vmem:[%s1568_s20 + $0xf0] sm:$0xff]  }
  0x1a   : > { %1418 = vmatmul.mubr.msk.bf16.gmra.mrb[4].mxu0 %vm407_vm1, %v1495_v8  ;;  %v1519_v32 = vld [vmem:[%s1568_s20 + $0x78] sm:$0xff]  }
  0x1b   : > { %1450 = vmatmul.mubr.msk.bf16.gmra.mrb[4].mxu1 %vm407_vm1, %v1496_v9  ;;  %1421 = vmatprep.mubr.msk.bf16.mxu0 %vm407_vm1, %v1497_v10  ;;  %v1520_v33 = vld [vmem:[%s1568_s20 + $0xf8] sm:$0xff]  }
  0x1c   : > { %1453 = vmatprep.mubr.msk.bf16.mxu1 %vm407_vm1, %v1498_v11 }
  0x22   : > { %1422 = vmatmul.mubr.msk.bf16.gmra.mrb[8].mxu0 %vm407_vm1, %v1499_v12 }
  0x23   : > { %1454 = vmatmul.mubr.msk.bf16.gmra.mrb[8].mxu1 %vm407_vm1, %v1500_v13  ;;  %1425 = vmatprep.mubr.msk.bf16.mxu0 %vm407_vm1, %v1501_v14 }
  0x24   : > { %1457 = vmatprep.mubr.msk.bf16.mxu1 %vm407_vm1, %v1502_v15 }
  0x2a   : > { %1426 = vmatmul.mubr.msk.bf16.gmra.mrb[12].mxu0 %vm407_vm1, %v1503_v16 }
  0x2b   : > { %1458 = vmatmul.mubr.msk.bf16.gmra.mrb[12].mxu1 %vm407_vm1, %v1504_v17  ;;  %1429 = vmatprep.mubr.msk.bf16.mxu0 %vm407_vm1, %v1505_v18 }
  0x2c   : > { %1461 = vmatprep.mubr.msk.bf16.mxu1 %vm407_vm1, %v1506_v19 }
  0x32   : > { %1430 = vmatmul.mubr.msk.bf16.gmra.mrb[16].mxu0 %vm407_vm1, %v1507_v20 }
  0x33   : > { %1462 = vmatmul.mubr.msk.bf16.gmra.mrb[16].mxu1 %vm407_vm1, %v1508_v21  ;;  %1433 = vmatprep.mubr.msk.bf16.mxu0 %vm407_vm1, %v1509_v22 }
  0x34   : > { %1465 = vmatprep.mubr.msk.bf16.mxu1 %vm407_vm1, %v1510_v23 }
  0x3a   : > { %1434 = vmatmul.mubr.msk.bf16.gmra.mrb[20].mxu0 %vm407_vm1, %v1511_v24 }
  0x3b   : > { %1466 = vmatmul.mubr.msk.bf16.gmra.mrb[20].mxu1 %vm407_vm1, %v1512_v25  ;;  %1437 = vmatprep.mubr.msk.bf16.mxu0 %vm407_vm1, %v1513_v26 }
  0x3c   : > { %1469 = vmatprep.mubr.msk.bf16.mxu1 %vm407_vm1, %v1514_v27 }
  0x42   : > { %1438 = vmatmul.mubr.msk.bf16.gmra.mrb[24].mxu0 %vm407_vm1, %v1515_v28 }
  0x43   : > { %1470 = vmatmul.mubr.msk.bf16.gmra.mrb[24].mxu1 %vm407_vm1, %v1516_v29  ;;  %1441 = vmatprep.mubr.msk.bf16.mxu0 %vm407_vm1, %v1517_v30 }
  0x44   : > { %1473 = vmatprep.mubr.msk.bf16.mxu1 %vm407_vm1, %v1518_v31 }
  0x4a   : > { %1442 = vmatmul.mubr.msk.bf16.gmra.mrb[28].mxu0 %vm407_vm1, %v1519_v32 }
  0x4b   : > { %1474 = vmatmul.mubr.msk.bf16.gmra.mrb[28].mxu1 %vm407_vm1, %v1520_v33 }
  0xe5   : > { %v1415_v35 = vpop.f32.mrb[0].mxu0 }
  0xe6   : > { %v551_v36 = vadd.f32 %v1415_v35, %v1637_v34  ;;  %v1447_v37 = vpop.f32.mrb[0].mxu1  ;;  %v542_v38 = vpop.f32.mrb[1].mxu0 }
  0xe7   : > { %v679_v39 = vadd.f32 %v1447_v37, %v1637_v34  ;;  %v543_v40 = vadd.f32 %v1637_v34, %v542_v38  ;;  %v670_v41 = vpop.f32.mrb[1].mxu1  ;;  %v1416_v42 = vpop.f32.mrb[2].mxu0 }
  0xe8   : > { %v1316_v43 = vpack.c.bf16 %v551_v36, %v551_v36  ;;  %v671_v44 = vadd.f32 %v1637_v34, %v670_v41  ;;  %v554_v45 = vadd.f32 %v1416_v42, %v1637_v34  ;;  %v1448_v46 = vpop.f32.mrb[2].mxu1  ;;  %v545_v47 = vpop.f32.mrb[3].mxu0 }
  0xe9   : > { %v1348_v48 = vpack.c.bf16 %v679_v39, %v679_v39  ;;  %v1314_v49 = vpack.c.bf16 %v543_v40, %v543_v40  ;;  %v682_v50 = vadd.f32 %v1448_v46, %v1637_v34  ;;  %v546_v51 = vadd.f32 %v1637_v34, %v545_v47  ;;  %v673_v52 = vpop.f32.mrb[3].mxu1 }
  0xea   : > { %1056 = vst.msk [vmem:[%s1645_s25 + $0x8] sm:$0xf] %vm1053_vm2, %v1316_v43  ;;  %v1346_v53 = vpack.c.bf16 %v671_v44, %v671_v44  ;;  %v1317_v54 = vpack.c.bf16 %v554_v45, %v554_v45  ;;  %v674_v55 = vadd.f32 %v1637_v34, %v673_v52 }
  0xeb   : > { %1088 = vst.msk [vmem:[%s1645_s25 + $0x88] sm:$0xf] %vm1053_vm2, %v1348_v48  ;;  %1054 = vst.msk [vmem:[%s1645_s25] sm:$0xf] %vm1053_vm2, %v1314_v49  ;;  %v1349_v56 = vpack.c.bf16 %v682_v50, %v682_v50  ;;  %v1315_v57 = vpack.c.bf16 %v546_v51, %v546_v51 }
  0xec   : > { %1086 = vst.msk [vmem:[%s1645_s25 + $0x80] sm:$0xf] %vm1053_vm2, %v1346_v53  ;;  %1057 = vst.msk [vmem:[%s1645_s25 + $0xc] sm:$0xf] %vm1053_vm2, %v1317_v54  ;;  %v1347_v58 = vpack.c.bf16 %v674_v55, %v674_v55 }
  0xed   : > { %1089 = vst.msk [vmem:[%s1645_s25 + $0x8c] sm:$0xf] %vm1053_vm2, %v1349_v56  ;;  %1055 = vst.msk [vmem:[%s1645_s25 + $0x4] sm:$0xf] %vm1053_vm2, %v1315_v57  ;;  %v1419_v59 = vpop.f32.mrb[4].mxu0 }
  0xee   : > { %1087 = vst.msk [vmem:[%s1645_s25 + $0x84] sm:$0xf] %vm1053_vm2, %v1347_v58  ;;  %v567_v60 = vadd.f32 %v1419_v59, %v1637_v34  ;;  %v1451_v61 = vpop.f32.mrb[4].mxu1  ;;  %v558_v62 = vpop.f32.mrb[5].mxu0 }
  0xef   : > { %v695_v63 = vadd.f32 %v1451_v61, %v1637_v34  ;;  %v559_v0 = vadd.f32 %v1637_v34, %v558_v62  ;;  %v686_v1 = vpop.f32.mrb[5].mxu1  ;;  %v1420_v2 = vpop.f32.mrb[6].mxu0 }
  0xf0   : > { %v1320_v3 = vpack.c.bf16 %v567_v60, %v567_v60  ;;  %v687_v4 = vadd.f32 %v1637_v34, %v686_v1  ;;  %v570_v5 = vadd.f32 %v1420_v2, %v1637_v34  ;;  %v1452_v6 = vpop.f32.mrb[6].mxu1  ;;  %v561_v7 = vpop.f32.mrb[7].mxu0 }
  0xf1   : > { %v1352_v8 = vpack.c.bf16 %v695_v63, %v695_v63  ;;  %v1318_v9 = vpack.c.bf16 %v559_v0, %v559_v0  ;;  %v698_v10 = vadd.f32 %v1452_v6, %v1637_v34  ;;  %v562_v11 = vadd.f32 %v1637_v34, %v561_v7  ;;  %v689_v12 = vpop.f32.mrb[7].mxu1 }
  0xf2   : > { %1060 = vst.msk [vmem:[%s1645_s25 + $0x18] sm:$0xf] %vm1053_vm2, %v1320_v3  ;;  %v1350_v13 = vpack.c.bf16 %v687_v4, %v687_v4  ;;  %v1321_v14 = vpack.c.bf16 %v570_v5, %v570_v5  ;;  %v690_v15 = vadd.f32 %v1637_v34, %v689_v12 }
  0xf3   : > { %1092 = vst.msk [vmem:[%s1645_s25 + $0x98] sm:$0xf] %vm1053_vm2, %v1352_v8  ;;  %1058 = vst.msk [vmem:[%s1645_s25 + $0x10] sm:$0xf] %vm1053_vm2, %v1318_v9  ;;  %v1353_v16 = vpack.c.bf16 %v698_v10, %v698_v10  ;;  %v1319_v17 = vpack.c.bf16 %v562_v11, %v562_v11 }
  0xf4   : > { %1090 = vst.msk [vmem:[%s1645_s25 + $0x90] sm:$0xf] %vm1053_vm2, %v1350_v13  ;;  %1061 = vst.msk [vmem:[%s1645_s25 + $0x1c] sm:$0xf] %vm1053_vm2, %v1321_v14  ;;  %v1351_v18 = vpack.c.bf16 %v690_v15, %v690_v15 }
  0xf5   : > { %1093 = vst.msk [vmem:[%s1645_s25 + $0x9c] sm:$0xf] %vm1053_vm2, %v1353_v16  ;;  %1059 = vst.msk [vmem:[%s1645_s25 + $0x14] sm:$0xf] %vm1053_vm2, %v1319_v17  ;;  %v1423_v19 = vpop.f32.mrb[8].mxu0 }
  0xf6   : > { %1091 = vst.msk [vmem:[%s1645_s25 + $0x94] sm:$0xf] %vm1053_vm2, %v1351_v18  ;;  %v583_v20 = vadd.f32 %v1423_v19, %v1637_v34  ;;  %v1455_v21 = vpop.f32.mrb[8].mxu1  ;;  %v574_v22 = vpop.f32.mrb[9].mxu0 }
  0xf7   : > { %v711_v23 = vadd.f32 %v1455_v21, %v1637_v34  ;;  %v575_v24 = vadd.f32 %v1637_v34, %v574_v22  ;;  %v702_v25 = vpop.f32.mrb[9].mxu1  ;;  %v1424_v26 = vpop.f32.mrb[10].mxu0 }
  0xf8   : > { %v1324_v27 = vpack.c.bf16 %v583_v20, %v583_v20  ;;  %v703_v28 = vadd.f32 %v1637_v34, %v702_v25  ;;  %v586_v29 = vadd.f32 %v1424_v26, %v1637_v34  ;;  %v1456_v30 = vpop.f32.mrb[10].mxu1  ;;  %v577_v31 = vpop.f32.mrb[11].mxu0 }
  0xf9   : > { %v1356_v32 = vpack.c.bf16 %v711_v23, %v711_v23  ;;  %v1322_v33 = vpack.c.bf16 %v575_v24, %v575_v24  ;;  %v714_v35 = vadd.f32 %v1456_v30, %v1637_v34  ;;  %v578_v36 = vadd.f32 %v1637_v34, %v577_v31  ;;  %v705_v37 = vpop.f32.mrb[11].mxu1 }
  0xfa   : > { %1064 = vst.msk [vmem:[%s1645_s25 + $0x28] sm:$0xf] %vm1053_vm2, %v1324_v27  ;;  %v1354_v38 = vpack.c.bf16 %v703_v28, %v703_v28  ;;  %v1325_v39 = vpack.c.bf16 %v586_v29, %v586_v29  ;;  %v706_v40 = vadd.f32 %v1637_v34, %v705_v37 }
  0xfb   : > { %1096 = vst.msk [vmem:[%s1645_s25 + $0xa8] sm:$0xf] %vm1053_vm2, %v1356_v32  ;;  %1062 = vst.msk [vmem:[%s1645_s25 + $0x20] sm:$0xf] %vm1053_vm2, %v1322_v33  ;;  %v1357_v41 = vpack.c.bf16 %v714_v35, %v714_v35  ;;  %v1323_v42 = vpack.c.bf16 %v578_v36, %v578_v36 }
  0xfc   : > { %1094 = vst.msk [vmem:[%s1645_s25 + $0xa0] sm:$0xf] %vm1053_vm2, %v1354_v38  ;;  %1065 = vst.msk [vmem:[%s1645_s25 + $0x2c] sm:$0xf] %vm1053_vm2, %v1325_v39  ;;  %v1355_v43 = vpack.c.bf16 %v706_v40, %v706_v40 }
  0xfd   : > { %1097 = vst.msk [vmem:[%s1645_s25 + $0xac] sm:$0xf] %vm1053_vm2, %v1357_v41  ;;  %1063 = vst.msk [vmem:[%s1645_s25 + $0x24] sm:$0xf] %vm1053_vm2, %v1323_v42  ;;  %v1427_v44 = vpop.f32.mrb[12].mxu0 }
  0xfe   : > { %1095 = vst.msk [vmem:[%s1645_s25 + $0xa4] sm:$0xf] %vm1053_vm2, %v1355_v43  ;;  %v599_v45 = vadd.f32 %v1427_v44, %v1637_v34  ;;  %v1459_v46 = vpop.f32.mrb[12].mxu1  ;;  %v590_v47 = vpop.f32.mrb[13].mxu0 }
  0xff   : > { %v727_v48 = vadd.f32 %v1459_v46, %v1637_v34  ;;  %v591_v49 = vadd.f32 %v1637_v34, %v590_v47  ;;  %v718_v50 = vpop.f32.mrb[13].mxu1  ;;  %v1428_v51 = vpop.f32.mrb[14].mxu0 }
 0x100   : > { %v1328_v52 = vpack.c.bf16 %v599_v45, %v599_v45  ;;  %v719_v53 = vadd.f32 %v1637_v34, %v718_v50  ;;  %v602_v54 = vadd.f32 %v1428_v51, %v1637_v34  ;;  %v1460_v55 = vpop.f32.mrb[14].mxu1  ;;  %v593_v56 = vpop.f32.mrb[15].mxu0 }
 0x101   : > { %v1360_v57 = vpack.c.bf16 %v727_v48, %v727_v48  ;;  %v1326_v58 = vpack.c.bf16 %v591_v49, %v591_v49  ;;  %v730_v59 = vadd.f32 %v1460_v55, %v1637_v34  ;;  %v594_v60 = vadd.f32 %v1637_v34, %v593_v56  ;;  %v721_v61 = vpop.f32.mrb[15].mxu1 }
 0x102   : > { %1068 = vst.msk [vmem:[%s1645_s25 + $0x38] sm:$0xf] %vm1053_vm2, %v1328_v52  ;;  %v1358_v62 = vpack.c.bf16 %v719_v53, %v719_v53  ;;  %v1329_v63 = vpack.c.bf16 %v602_v54, %v602_v54  ;;  %v722_v0 = vadd.f32 %v1637_v34, %v721_v61 }
 0x103   : > { %1100 = vst.msk [vmem:[%s1645_s25 + $0xb8] sm:$0xf] %vm1053_vm2, %v1360_v57  ;;  %1066 = vst.msk [vmem:[%s1645_s25 + $0x30] sm:$0xf] %vm1053_vm2, %v1326_v58  ;;  %v1361_v1 = vpack.c.bf16 %v730_v59, %v730_v59  ;;  %v1327_v2 = vpack.c.bf16 %v594_v60, %v594_v60 }
 0x104   : > { %1098 = vst.msk [vmem:[%s1645_s25 + $0xb0] sm:$0xf] %vm1053_vm2, %v1358_v62  ;;  %1069 = vst.msk [vmem:[%s1645_s25 + $0x3c] sm:$0xf] %vm1053_vm2, %v1329_v63  ;;  %v1359_v3 = vpack.c.bf16 %v722_v0, %v722_v0 }
 0x105   : > { %1101 = vst.msk [vmem:[%s1645_s25 + $0xbc] sm:$0xf] %vm1053_vm2, %v1361_v1  ;;  %1067 = vst.msk [vmem:[%s1645_s25 + $0x34] sm:$0xf] %vm1053_vm2, %v1327_v2  ;;  %v1431_v4 = vpop.f32.mrb[16].mxu0 }
 0x106   : > { %1099 = vst.msk [vmem:[%s1645_s25 + $0xb4] sm:$0xf] %vm1053_vm2, %v1359_v3  ;;  %v615_v5 = vadd.f32 %v1431_v4, %v1637_v34  ;;  %v1463_v6 = vpop.f32.mrb[16].mxu1  ;;  %v606_v7 = vpop.f32.mrb[17].mxu0 }
 0x107   : > { %v743_v8 = vadd.f32 %v1463_v6, %v1637_v34  ;;  %v607_v9 = vadd.f32 %v1637_v34, %v606_v7  ;;  %v734_v10 = vpop.f32.mrb[17].mxu1  ;;  %v1432_v11 = vpop.f32.mrb[18].mxu0 }
 0x108   : > { %v1332_v12 = vpack.c.bf16 %v615_v5, %v615_v5  ;;  %v735_v13 = vadd.f32 %v1637_v34, %v734_v10  ;;  %v618_v14 = vadd.f32 %v1432_v11, %v1637_v34  ;;  %v1464_v15 = vpop.f32.mrb[18].mxu1  ;;  %v609_v16 = vpop.f32.mrb[19].mxu0 }
 0x109   : > { %v1364_v17 = vpack.c.bf16 %v743_v8, %v743_v8  ;;  %v1330_v18 = vpack.c.bf16 %v607_v9, %v607_v9  ;;  %v746_v19 = vadd.f32 %v1464_v15, %v1637_v34  ;;  %v610_v20 = vadd.f32 %v1637_v34, %v609_v16  ;;  %v737_v21 = vpop.f32.mrb[19].mxu1 }
 0x10a   : > { %1072 = vst.msk [vmem:[%s1645_s25 + $0x48] sm:$0xf] %vm1053_vm2, %v1332_v12  ;;  %v1362_v22 = vpack.c.bf16 %v735_v13, %v735_v13  ;;  %v1333_v23 = vpack.c.bf16 %v618_v14, %v618_v14  ;;  %v738_v24 = vadd.f32 %v1637_v34, %v737_v21 }
 0x10b   : > { %1104 = vst.msk [vmem:[%s1645_s25 + $0xc8] sm:$0xf] %vm1053_vm2, %v1364_v17  ;;  %1070 = vst.msk [vmem:[%s1645_s25 + $0x40] sm:$0xf] %vm1053_vm2, %v1330_v18  ;;  %v1365_v25 = vpack.c.bf16 %v746_v19, %v746_v19  ;;  %v1331_v26 = vpack.c.bf16 %v610_v20, %v610_v20 }
 0x10c   : > { %1102 = vst.msk [vmem:[%s1645_s25 + $0xc0] sm:$0xf] %vm1053_vm2, %v1362_v22  ;;  %1073 = vst.msk [vmem:[%s1645_s25 + $0x4c] sm:$0xf] %vm1053_vm2, %v1333_v23  ;;  %v1363_v27 = vpack.c.bf16 %v738_v24, %v738_v24 }
 0x10d   : > { %1105 = vst.msk [vmem:[%s1645_s25 + $0xcc] sm:$0xf] %vm1053_vm2, %v1365_v25  ;;  %1071 = vst.msk [vmem:[%s1645_s25 + $0x44] sm:$0xf] %vm1053_vm2, %v1331_v26  ;;  %v1435_v28 = vpop.f32.mrb[20].mxu0 }
 0x10e   : > { %1103 = vst.msk [vmem:[%s1645_s25 + $0xc4] sm:$0xf] %vm1053_vm2, %v1363_v27  ;;  %v631_v29 = vadd.f32 %v1435_v28, %v1637_v34  ;;  %v1467_v30 = vpop.f32.mrb[20].mxu1  ;;  %v622_v31 = vpop.f32.mrb[21].mxu0 }
 0x10f   : > { %v759_v32 = vadd.f32 %v1467_v30, %v1637_v34  ;;  %v623_v33 = vadd.f32 %v1637_v34, %v622_v31  ;;  %v750_v35 = vpop.f32.mrb[21].mxu1  ;;  %v1436_v36 = vpop.f32.mrb[22].mxu0 }
 0x110   : > { %v1336_v37 = vpack.c.bf16 %v631_v29, %v631_v29  ;;  %v751_v38 = vadd.f32 %v1637_v34, %v750_v35  ;;  %v634_v39 = vadd.f32 %v1436_v36, %v1637_v34  ;;  %v1468_v40 = vpop.f32.mrb[22].mxu1  ;;  %v625_v41 = vpop.f32.mrb[23].mxu0 }
 0x111   : > { %v1368_v42 = vpack.c.bf16 %v759_v32, %v759_v32  ;;  %v1334_v43 = vpack.c.bf16 %v623_v33, %v623_v33  ;;  %v762_v44 = vadd.f32 %v1468_v40, %v1637_v34  ;;  %v626_v45 = vadd.f32 %v1637_v34, %v625_v41  ;;  %v753_v46 = vpop.f32.mrb[23].mxu1 }
 0x112   : > { %1076 = vst.msk [vmem:[%s1645_s25 + $0x58] sm:$0xf] %vm1053_vm2, %v1336_v37  ;;  %v1366_v47 = vpack.c.bf16 %v751_v38, %v751_v38  ;;  %v1337_v48 = vpack.c.bf16 %v634_v39, %v634_v39  ;;  %v754_v49 = vadd.f32 %v1637_v34, %v753_v46 }
 0x113   : > { %1108 = vst.msk [vmem:[%s1645_s25 + $0xd8] sm:$0xf] %vm1053_vm2, %v1368_v42  ;;  %1074 = vst.msk [vmem:[%s1645_s25 + $0x50] sm:$0xf] %vm1053_vm2, %v1334_v43  ;;  %v1369_v50 = vpack.c.bf16 %v762_v44, %v762_v44  ;;  %v1335_v51 = vpack.c.bf16 %v626_v45, %v626_v45 }
 0x114   : > { %1106 = vst.msk [vmem:[%s1645_s25 + $0xd0] sm:$0xf] %vm1053_vm2, %v1366_v47  ;;  %1077 = vst.msk [vmem:[%s1645_s25 + $0x5c] sm:$0xf] %vm1053_vm2, %v1337_v48  ;;  %v1367_v52 = vpack.c.bf16 %v754_v49, %v754_v49 }
 0x115   : > { %1109 = vst.msk [vmem:[%s1645_s25 + $0xdc] sm:$0xf] %vm1053_vm2, %v1369_v50  ;;  %1075 = vst.msk [vmem:[%s1645_s25 + $0x54] sm:$0xf] %vm1053_vm2, %v1335_v51  ;;  %v1439_v53 = vpop.f32.mrb[24].mxu0 }
 0x116   : > { %1107 = vst.msk [vmem:[%s1645_s25 + $0xd4] sm:$0xf] %vm1053_vm2, %v1367_v52  ;;  %v647_v54 = vadd.f32 %v1439_v53, %v1637_v34  ;;  %v1471_v55 = vpop.f32.mrb[24].mxu1  ;;  %v638_v56 = vpop.f32.mrb[25].mxu0 }
 0x117   : > { %v775_v57 = vadd.f32 %v1471_v55, %v1637_v34  ;;  %v639_v58 = vadd.f32 %v1637_v34, %v638_v56  ;;  %v766_v59 = vpop.f32.mrb[25].mxu1  ;;  %v1440_v60 = vpop.f32.mrb[26].mxu0 }
 0x118   : > { %v1340_v61 = vpack.c.bf16 %v647_v54, %v647_v54  ;;  %v767_v62 = vadd.f32 %v1637_v34, %v766_v59  ;;  %v650_v63 = vadd.f32 %v1440_v60, %v1637_v34  ;;  %v1472_v0 = vpop.f32.mrb[26].mxu1  ;;  %v641_v1 = vpop.f32.mrb[27].mxu0 }
 0x119   : > { %v1372_v2 = vpack.c.bf16 %v775_v57, %v775_v57  ;;  %v1338_v3 = vpack.c.bf16 %v639_v58, %v639_v58  ;;  %v778_v4 = vadd.f32 %v1472_v0, %v1637_v34  ;;  %v642_v5 = vadd.f32 %v1637_v34, %v641_v1  ;;  %v769_v6 = vpop.f32.mrb[27].mxu1 }
 0x11a   : > { %1080 = vst.msk [vmem:[%s1645_s25 + $0x68] sm:$0xf] %vm1053_vm2, %v1340_v61  ;;  %v1370_v7 = vpack.c.bf16 %v767_v62, %v767_v62  ;;  %v1341_v8 = vpack.c.bf16 %v650_v63, %v650_v63  ;;  %v770_v9 = vadd.f32 %v1637_v34, %v769_v6 }
 0x11b   : > { %1112 = vst.msk [vmem:[%s1645_s25 + $0xe8] sm:$0xf] %vm1053_vm2, %v1372_v2  ;;  %1078 = vst.msk [vmem:[%s1645_s25 + $0x60] sm:$0xf] %vm1053_vm2, %v1338_v3  ;;  %v1373_v10 = vpack.c.bf16 %v778_v4, %v778_v4  ;;  %v1339_v11 = vpack.c.bf16 %v642_v5, %v642_v5 }
 0x11c   : > { %1110 = vst.msk [vmem:[%s1645_s25 + $0xe0] sm:$0xf] %vm1053_vm2, %v1370_v7  ;;  %1081 = vst.msk [vmem:[%s1645_s25 + $0x6c] sm:$0xf] %vm1053_vm2, %v1341_v8  ;;  %v1371_v12 = vpack.c.bf16 %v770_v9, %v770_v9 }
 0x11d   : > { %1113 = vst.msk [vmem:[%s1645_s25 + $0xec] sm:$0xf] %vm1053_vm2, %v1373_v10  ;;  %1079 = vst.msk [vmem:[%s1645_s25 + $0x64] sm:$0xf] %vm1053_vm2, %v1339_v11  ;;  %v1443_v13 = vpop.f32.mrb[28].mxu0 }
 0x11e   : > { %1111 = vst.msk [vmem:[%s1645_s25 + $0xe4] sm:$0xf] %vm1053_vm2, %v1371_v12  ;;  %v663_v14 = vadd.f32 %v1443_v13, %v1637_v34  ;;  %v1475_v15 = vpop.f32.mrb[28].mxu1  ;;  %v654_v16 = vpop.f32.mrb[29].mxu0 }
 0x11f   : > { %v791_v17 = vadd.f32 %v1475_v15, %v1637_v34  ;;  %v655_v18 = vadd.f32 %v1637_v34, %v654_v16  ;;  %v782_v19 = vpop.f32.mrb[29].mxu1  ;;  %v1444_v20 = vpop.f32.mrb[30].mxu0 }
 0x120   : > { %v1344_v21 = vpack.c.bf16 %v663_v14, %v663_v14  ;;  %v783_v22 = vadd.f32 %v1637_v34, %v782_v19  ;;  %v666_v23 = vadd.f32 %v1444_v20, %v1637_v34  ;;  %v1476_v24 = vpop.f32.mrb[30].mxu1  ;;  %v657_v25 = vpop.f32.mrb[31].mxu0 }
 0x121   : > { %v1376_v26 = vpack.c.bf16 %v791_v17, %v791_v17  ;;  %v1342_v27 = vpack.c.bf16 %v655_v18, %v655_v18  ;;  %v794_v28 = vadd.f32 %v1476_v24, %v1637_v34  ;;  %v658_v29 = vadd.f32 %v1637_v34, %v657_v25  ;;  %v785_v30 = vpop.f32.mrb[31].mxu1 }
 0x122   : > { %1084 = vst.msk [vmem:[%s1645_s25 + $0x78] sm:$0xf] %vm1053_vm2, %v1344_v21  ;;  %v1374_v31 = vpack.c.bf16 %v783_v22, %v783_v22  ;;  %v1345_v32 = vpack.c.bf16 %v666_v23, %v666_v23  ;;  %v786_v33 = vadd.f32 %v1637_v34, %v785_v30 }
 0x123   : > { %1116 = vst.msk [vmem:[%s1645_s25 + $0xf8] sm:$0xf] %vm1053_vm2, %v1376_v26  ;;  %1082 = vst.msk [vmem:[%s1645_s25 + $0x70] sm:$0xf] %vm1053_vm2, %v1342_v27  ;;  %v1377_v35 = vpack.c.bf16 %v794_v28, %v794_v28  ;;  %v1343_v36 = vpack.c.bf16 %v658_v29, %v658_v29 }
 0x124   : > { %1114 = vst.msk [vmem:[%s1645_s25 + $0xf0] sm:$0xf] %vm1053_vm2, %v1374_v31  ;;  %1085 = vst.msk [vmem:[%s1645_s25 + $0x7c] sm:$0xf] %vm1053_vm2, %v1345_v32  ;;  %v1375_v37 = vpack.c.bf16 %v786_v33, %v786_v33 }
 0x125   : > { %1117 = vst.msk [vmem:[%s1645_s25 + $0xfc] sm:$0xf] %vm1053_vm2, %v1377_v35  ;;  %1083 = vst.msk [vmem:[%s1645_s25 + $0x74] sm:$0xf] %vm1053_vm2, %v1343_v36 }
 0x126   : > { %1115 = vst.msk [vmem:[%s1645_s25 + $0xf4] sm:$0xf] %vm1053_vm2, %v1375_v37 }
 0x127 PF: > { %s13_s12 = sadd.s32 1, %s1527_s12  }
 0x128   : > { %p10_p4 = scmp.ge.s32.totalorder %s13_s12, 4  }
 0x12a   :  { %12 = sbr.rel (!%p10_p4) target bundleno = 1 (0x1), region = 62 }

// kernel: bottleneck_forward.7
= control target key start
LH: loop header
LB: loop body
LE: loop exit
PB: predicated region body
PF: predicated region fallthrough
CT: control target
= control target key end

     0   :  { %s2032_s15 = smov 0   ;;  %s2615_s0 = inlined_call_operand.vmem [shape: bf16[1024,4], index: 0, kind: input, shape index: {}]   ;;  %s2616_s1 = inlined_call_operand.vmem [shape: bf16[4,16], index: 1, kind: input, shape index: {}]   ;;  %s2617_s2 = inlined_call_operand.vmem [shape: f32[1,16], index: 2, kind: input, shape index: {}]   ;;  %s2618_s3 = inlined_call_operand.vmem [shape: bf16[1024,16], index: 3, kind: input, shape index: {}]   ;;  %s2619_s4 = inlined_call_operand.vmem [shape: bf16[1024,16], index: 4, kind: output, shape index: {}]  }
   0x1 LB: > { %s1491_s16 = sadd.s32 4294967295, %s2005_s15   ;;  %p1495_p0 = scmp.ge.s32.totalorder %s2005_s15, 1  ;;  %s2005_s15 = sphi %s2032_s15, %s14_s15  }
   0x2   : > { %p174_p1 = scmp.lt.s32.totalorder %s2005_s15, 3 }
   0x4   : > { %p175_p2 = pnand %p1495_p0, %p174_p1 }
   0x5   : > { %v288_v0 = vld [vmem:[%s2616_s1] sm:$0x3] (!%p175_p2)  ;;  %vm553_vm0 = vcmask (!%p175_p2), 1041408   ;;  %s1496_s19 = sshll.u32 (!%p175_p2), %s1491_s16, 6  ;;  %vm456_vm1 = vcmask (!%p175_p2), 31744   ;;  %vm1358_vm2 = vcmask (!%p175_p2), 125952  }
   0x6   : > { %178 = sbr.rel (%p175_p2) target bundleno = 312 (0x138), region = 36  ;;  %1957 = vmatprep.subr.msk.bf16.mxu0 (!%p175_p2), %vm553_vm0, %v288_v0  ;;  %1958 = vmatprep.subr.msk.bf16.mxu1 (!%p175_p2), %vm553_vm0, %v288_v0  ;;  %v555_v1 = vsel (!%p175_p2), %vm553_vm0, %v288_v0, 0  ;;  %p206_p3 = scmp.lt.s32.totalorder (!%p175_p2), %s1496_s19, 127 }
   0x7   : > { %1890 = vmatpush3.bf16.msra.mxu0 (!%p175_p2), %v555_v1  ;;  %1956 = vmatpush3.bf16.msra.mxu1 (!%p175_p2), %v555_v1 }
   0xd   : > { %s2669_s19 = smov (!%p206_p3, %s1496_s19), 127 }
   0xe   : > { %s2043_s20 = sshll.u32 %s2669_s19, 2 }
   0xf   : > { %s2049_s23 = scalar_lea.vmem %s2615_s0, %s2043_s20  ;;  %s2119_s26 = scalar_lea.vmem %s2618_s3, %s2043_s20 }
  0x10   : > { %v1967_v2 = vld [vmem:[%s2049_s23] sm:$0xff]   ;;  %v1969_v4 = vld [vmem:[%s2049_s23 + $0x8] sm:$0xff]   ;;  %v1971_v6 = vld [vmem:[%s2049_s23 + $0x10] sm:$0xff]   ;;  %s2308_s5 = scalar_lea.vmem %s2619_s4, %s2043_s20 }
  0x11   : > { %v1968_v3 = vld [vmem:[%s2049_s23 + $0x80] sm:$0xff]   ;;  %1891 = vmatprep.mubr.msk.bf16.mxu0 %vm456_vm1, %v1967_v2  ;;  %v1970_v5 = vld [vmem:[%s2049_s23 + $0x88] sm:$0xff]   ;;  %v1972_v7 = vld [vmem:[%s2049_s23 + $0x90] sm:$0xff]  }
  0x12   : > { %1923 = vmatprep.mubr.msk.bf16.mxu1 %vm456_vm1, %v1968_v3  ;;  %1892 = vmatmul.mubr.msk.bf16.vlgmr.msra.gmra.mrb[0].mxu0 %vm456_vm1, %v1969_v4  ;;  %v1973_v8 = vld [vmem:[%s2049_s23 + $0x18] sm:$0xff]   ;;  %v1975_v10 = vld [vmem:[%s2049_s23 + $0x20] sm:$0xff]   ;;  %v1977_v12 = vld [vmem:[%s2049_s23 + $0x28] sm:$0xff]  }
  0x13   : > { %1924 = vmatmul.mubr.msk.bf16.vlgmr.msra.gmra.mrb[0].mxu1 %vm456_vm1, %v1970_v5  ;;  %1895 = vmatprep.mubr.msk.bf16.mxu0 %vm456_vm1, %v1971_v6  ;;  %v1974_v9 = vld [vmem:[%s2049_s23 + $0x98] sm:$0xff]   ;;  %v1976_v11 = vld [vmem:[%s2049_s23 + $0xa0] sm:$0xff]   ;;  %v1978_v13 = vld [vmem:[%s2049_s23 + $0xa8] sm:$0xff]  }
  0x14   : > { %1927 = vmatprep.mubr.msk.bf16.mxu1 %vm456_vm1, %v1972_v7  ;;  %v1979_v14 = vld [vmem:[%s2049_s23 + $0x30] sm:$0xff]   ;;  %v1981_v16 = vld [vmem:[%s2049_s23 + $0x38] sm:$0xff]   ;;  %v1983_v18 = vld [vmem:[%s2049_s23 + $0x40] sm:$0xff]  }
  0x15   : > { %v1980_v15 = vld [vmem:[%s2049_s23 + $0xb0] sm:$0xff]   ;;  %v1982_v17 = vld [vmem:[%s2049_s23 + $0xb8] sm:$0xff]   ;;  %v1984_v19 = vld [vmem:[%s2049_s23 + $0xc0] sm:$0xff]  }
  0x16   : > { %v1985_v20 = vld [vmem:[%s2049_s23 + $0x48] sm:$0xff]   ;;  %v1987_v22 = vld [vmem:[%s2049_s23 + $0x50] sm:$0xff]   ;;  %v1989_v24 = vld [vmem:[%s2049_s23 + $0x58] sm:$0xff]  }
  0x17   : > { %v1986_v21 = vld [vmem:[%s2049_s23 + $0xc8] sm:$0xff]   ;;  %v1988_v23 = vld [vmem:[%s2049_s23 + $0xd0] sm:$0xff]   ;;  %v1990_v25 = vld [vmem:[%s2049_s23 + $0xd8] sm:$0xff]  }
  0x18   : > { %v1991_v26 = vld [vmem:[%s2049_s23 + $0x60] sm:$0xff]   ;;  %v1993_v28 = vld [vmem:[%s2049_s23 + $0x68] sm:$0xff]   ;;  %v1995_v30 = vld [vmem:[%s2049_s23 + $0x70] sm:$0xff]  }
  0x19   : > { %v1992_v27 = vld [vmem:[%s2049_s23 + $0xe0] sm:$0xff]   ;;  %v1994_v29 = vld [vmem:[%s2049_s23 + $0xe8] sm:$0xff]   ;;  %v1996_v31 = vld [vmem:[%s2049_s23 + $0xf0] sm:$0xff]  }
  0x1a   : > { %1896 = vmatmul.mubr.msk.bf16.gmra.mrb[4].mxu0 %vm456_vm1, %v1973_v8  ;;  %v1997_v32 = vld [vmem:[%s2049_s23 + $0x78] sm:$0xff]   ;;  %v2122_v34 = vld [vmem:[%s2119_s26 + $0x8] sm:$0xff]   ;;  %v2128_v36 = vld [vmem:[%s2119_s26] sm:$0xff]  }
  0x1b   : > { %1928 = vmatmul.mubr.msk.bf16.gmra.mrb[4].mxu1 %vm456_vm1, %v1974_v9  ;;  %1899 = vmatprep.mubr.msk.bf16.mxu0 %vm456_vm1, %v1975_v10  ;;  %v1998_v33 = vld [vmem:[%s2049_s23 + $0xf8] sm:$0xff]   ;;  %v2125_v35 = vld [vmem:[%s2119_s26 + $0x88] sm:$0xff]   ;;  %v2131_v37 = vld [vmem:[%s2119_s26 + $0x80] sm:$0xff]   ;;  %v1703_v40 = vunpack.c.l.bf16 %v2122_v34  ;;  %v1699_v44 = vunpack.c.l.bf16 %v2128_v36  ;;  %v1704_v46 = vunpack.c.h.bf16 %v2122_v34  ;;  %v1700_v50 = vunpack.c.h.bf16 %v2128_v36 }
  0x1c   : > { %1931 = vmatprep.mubr.msk.bf16.mxu1 %vm456_vm1, %v1976_v11  ;;  %v2134_v38 = vld [vmem:[%s2119_s26 + $0x18] sm:$0xff]   ;;  %v1767_v41 = vunpack.c.l.bf16 %v2125_v35  ;;  %v2142_v42 = vld [vmem:[%s2119_s26 + $0x10] sm:$0xff]   ;;  %v1763_v45 = vunpack.c.l.bf16 %v2131_v37  ;;  %v1768_v47 = vunpack.c.h.bf16 %v2125_v35  ;;  %v2152_v48 = vld [vmem:[%s2119_s26 + $0x28] sm:$0xff]   ;;  %v1764_v51 = vunpack.c.h.bf16 %v2131_v37 }
  0x1d   : > { %v2137_v39 = vld [vmem:[%s2119_s26 + $0x98] sm:$0xff]   ;;  %v2145_v43 = vld [vmem:[%s2119_s26 + $0x90] sm:$0xff]   ;;  %v2155_v49 = vld [vmem:[%s2119_s26 + $0xa8] sm:$0xff]   ;;  %v1711_v52 = vunpack.c.l.bf16 %v2134_v38  ;;  %v1707_v56 = vunpack.c.l.bf16 %v2142_v42  ;;  %v1712_v58 = vunpack.c.h.bf16 %v2134_v38  ;;  %v1708_v62 = vunpack.c.h.bf16 %v2142_v42 }
  0x1e   : > { %v1775_v53 = vunpack.c.l.bf16 %v2137_v39  ;;  %v2162_v54 = vld [vmem:[%s2119_s26 + $0x20] sm:$0xff]   ;;  %v1771_v57 = vunpack.c.l.bf16 %v2145_v43  ;;  %v1776_v59 = vunpack.c.h.bf16 %v2137_v39  ;;  %v2172_v60 = vld [vmem:[%s2119_s26 + $0x38] sm:$0xff]   ;;  %v2182_v2 = vld [vmem:[%s2119_s26 + $0x30] sm:$0xff]  }
  0x1f   : > { %v2165_v55 = vld [vmem:[%s2119_s26 + $0xa0] sm:$0xff]   ;;  %v2175_v61 = vld [vmem:[%s2119_s26 + $0xb8] sm:$0xff]   ;;  %v2185_v3 = vld [vmem:[%s2119_s26 + $0xb0] sm:$0xff]  }
  0x20   : > { %v2192_v8 = vld [vmem:[%s2119_s26 + $0x48] sm:$0xff]  }
  0x21   : > { %v2195_v9 = vld [vmem:[%s2119_s26 + $0xc8] sm:$0xff]  }
  0x22   : > { %1900 = vmatmul.mubr.msk.bf16.gmra.mrb[8].mxu0 %vm456_vm1, %v1977_v12 }
  0x23   : > { %1932 = vmatmul.mubr.msk.bf16.gmra.mrb[8].mxu1 %vm456_vm1, %v1978_v13  ;;  %1903 = vmatprep.mubr.msk.bf16.mxu0 %vm456_vm1, %v1979_v14  ;;  %v2202_v14 = vld [vmem:[%s2119_s26 + $0x40] sm:$0xff]  }
  0x24   : > { %1935 = vmatprep.mubr.msk.bf16.mxu1 %vm456_vm1, %v1980_v15  ;;  %v2205_v15 = vld [vmem:[%s2119_s26 + $0xc0] sm:$0xff]  }
  0x2a   : > { %1904 = vmatmul.mubr.msk.bf16.gmra.mrb[12].mxu0 %vm456_vm1, %v1981_v16 }
  0x2b   : > { %1936 = vmatmul.mubr.msk.bf16.gmra.mrb[12].mxu1 %vm456_vm1, %v1982_v17  ;;  %1907 = vmatprep.mubr.msk.bf16.mxu0 %vm456_vm1, %v1983_v18  ;;  %v2252_v18 = vld [vmem:[%s2119_s26 + $0x78] sm:$0xff]   ;;  %v2267_v17 = vld [vmem:[%s2119_s26 + $0x70] sm:$0xff]  }
  0x2c   : > { %1939 = vmatprep.mubr.msk.bf16.mxu1 %vm456_vm1, %v1984_v19 }
  0x32   : > { %1908 = vmatmul.mubr.msk.bf16.gmra.mrb[16].mxu0 %vm456_vm1, %v1985_v20  ;;  %v2212_v20 = vld [vmem:[%s2119_s26 + $0x58] sm:$0xff]  }
  0x33   : > { %1940 = vmatmul.mubr.msk.bf16.gmra.mrb[16].mxu1 %vm456_vm1, %v1986_v21  ;;  %1911 = vmatprep.mubr.msk.bf16.mxu0 %vm456_vm1, %v1987_v22  ;;  %v2215_v21 = vld [vmem:[%s2119_s26 + $0xd8] sm:$0xff]   ;;  %v2245_v22 = vld [vmem:[%s2119_s26 + $0xe0] sm:$0xff]  }
  0x34   : > { %1943 = vmatprep.mubr.msk.bf16.mxu1 %vm456_vm1, %v1988_v23 }
  0x3a   : > { %1912 = vmatmul.mubr.msk.bf16.gmra.mrb[20].mxu0 %vm456_vm1, %v1989_v24  ;;  %v2255_v24 = vld [vmem:[%s2119_s26 + $0xf8] sm:$0xff]  }
  0x3b   : > { %1944 = vmatmul.mubr.msk.bf16.gmra.mrb[20].mxu1 %vm456_vm1, %v1990_v25  ;;  %1915 = vmatprep.mubr.msk.bf16.mxu0 %vm456_vm1, %v1991_v26  ;;  %v2222_v26 = vld [vmem:[%s2119_s26 + $0x50] sm:$0xff]  }
  0x3c   : > { %1947 = vmatprep.mubr.msk.bf16.mxu1 %vm456_vm1, %v1992_v27  ;;  %v2225_v27 = vld [vmem:[%s2119_s26 + $0xd0] sm:$0xff]  }
  0x3d   : > { %v2270_v25 = vld [vmem:[%s2119_s26 + $0xf0] sm:$0xff]  }
  0x42   : > { %1916 = vmatmul.mubr.msk.bf16.gmra.mrb[24].mxu0 %vm456_vm1, %v1993_v28  ;;  %v2260_v28 = vld [vmem:[%s2617_s2] ss:$0 sm:$0xff] }
  0x43   : > { %1948 = vmatmul.mubr.msk.bf16.gmra.mrb[24].mxu1 %vm456_vm1, %v1994_v29  ;;  %1919 = vmatprep.mubr.msk.bf16.mxu0 %vm456_vm1, %v1995_v30  ;;  %v2242_v29 = vld [vmem:[%s2119_s26 + $0x60] sm:$0xff]  }
  0x44   : > { %1951 = vmatprep.mubr.msk.bf16.mxu1 %vm456_vm1, %v1996_v31 }
  0x4a   : > { %1920 = vmatmul.mubr.msk.bf16.gmra.mrb[28].mxu0 %vm456_vm1, %v1997_v32  ;;  %v2232_v32 = vld [vmem:[%s2119_s26 + $0x68] sm:$0xff]  }
  0x4b   : > { %1952 = vmatmul.mubr.msk.bf16.gmra.mrb[28].mxu1 %vm456_vm1, %v1998_v33  ;;  %v2235_v33 = vld [vmem:[%s2119_s26 + $0xe8] sm:$0xff]  }
  0xe5   : > { %v1893_v10 = vpop.f32.mrb[0].mxu0 }
  0xe6   : > { %v600_v7 = vadd.f32 %v1893_v10, %v2260_v28  ;;  %v1925_v6 = vpop.f32.mrb[0].mxu1  ;;  %v591_v5 = vpop.f32.mrb[1].mxu0 }
  0xe7   : > { %v728_v11 = vadd.f32 %v1925_v6, %v2260_v28  ;;  %v592_v23 = vadd.f32 %v2260_v28, %v591_v5  ;;  %v719_v4 = vpop.f32.mrb[1].mxu1  ;;  %v1894_v31 = vpop.f32.mrb[2].mxu0  ;;  %v1820_v6 = vunpack.c.h.bf16 %v2270_v25 }
  0xe8   : > { %v976_v10 = vadd.f32 %v1703_v40, %v600_v7  ;;  %v720_v16 = vadd.f32 %v2260_v28, %v719_v4  ;;  %v603_v13 = vadd.f32 %v1894_v31, %v2260_v28  ;;  %v1926_v1 = vpop.f32.mrb[2].mxu1  ;;  %v594_v12 = vpop.f32.mrb[3].mxu0 }
  0xe9   : > { %v1008_v5 = vadd.f32 %v1767_v41, %v728_v11  ;;  %v974_v30 = vadd.f32 %v1699_v44, %v592_v23  ;;  %v731_v19 = vadd.f32 %v1926_v1, %v2260_v28  ;;  %v595_v0 = vadd.f32 %v2260_v28, %v594_v12  ;;  %v722_v63 = vpop.f32.mrb[3].mxu1 }
  0xea   : > { %v1040_v40 = vmax.f32 %v976_v10, 0.0  ;;  %v1006_v4 = vadd.f32 %v1763_v45, %v720_v16  ;;  %v977_v7 = vadd.f32 %v1704_v46, %v603_v13  ;;  %v723_v31 = vadd.f32 %v2260_v28, %v722_v63 }
  0xeb   : > { %v1072_v41 = vmax.f32 %v1008_v5, 0.0  ;;  %v1038_v44 = vmax.f32 %v974_v30, 0.0  ;;  %v1009_v1 = vadd.f32 %v1768_v47, %v731_v19  ;;  %v975_v11 = vadd.f32 %v1700_v50, %v595_v0 }
  0xec   : > { %v1635_v45 = vpack.c.bf16 %v1040_v40, %v1040_v40  ;;  %v1070_v34 = vmax.f32 %v1006_v4, 0.0  ;;  %v1041_v46 = vmax.f32 %v977_v7, 0.0  ;;  %v1007_v63 = vadd.f32 %v1764_v51, %v723_v31 }
  0xed   : > { %v1667_v12 = vpack.c.bf16 %v1072_v41, %v1072_v41  ;;  %v1633_v13 = vpack.c.bf16 %v1038_v44, %v1038_v44  ;;  %v1073_v16 = vmax.f32 %v1009_v1, 0.0  ;;  %v1039_v23 = vmax.f32 %v975_v11, 0.0  ;;  %v1897_v10 = vpop.f32.mrb[4].mxu0 }
  0xee   : > { %1361 = vst.msk [vmem:[%s2308_s5 + $0x8] sm:$0xf] %vm1358_vm2, %v1635_v45  ;;  %v1665_v35 = vpack.c.bf16 %v1070_v34, %v1070_v34  ;;  %v1636_v36 = vpack.c.bf16 %v1041_v46, %v1041_v46  ;;  %v1071_v47 = vmax.f32 %v1007_v63, 0.0  ;;  %v616_v50 = vadd.f32 %v1897_v10, %v2260_v28  ;;  %v1929_v0 = vpop.f32.mrb[4].mxu1  ;;  %v607_v19 = vpop.f32.mrb[5].mxu0 }
  0xef   : > { %1393 = vst.msk [vmem:[%s2308_s5 + $0x88] sm:$0xf] %vm1358_vm2, %v1667_v12  ;;  %1359 = vst.msk [vmem:[%s2308_s5] sm:$0xf] %vm1358_vm2, %v1633_v13  ;;  %v1668_v37 = vpack.c.bf16 %v1073_v16, %v1073_v16  ;;  %v1634_v51 = vpack.c.bf16 %v1039_v23, %v1039_v23  ;;  %v744_v30 = vadd.f32 %v1929_v0, %v2260_v28  ;;  %v735_v40 = vpop.f32.mrb[5].mxu1  ;;  %v1898_v4 = vpop.f32.mrb[6].mxu0 }
  0xf0   : > { %v608_v5 = vadd.f32 %v2260_v28, %v607_v19  ;;  %1391 = vst.msk [vmem:[%s2308_s5 + $0x80] sm:$0xf] %vm1358_vm2, %v1665_v35  ;;  %1362 = vst.msk [vmem:[%s2308_s5 + $0xc] sm:$0xf] %vm1358_vm2, %v1636_v36  ;;  %v1666_v7 = vpack.c.bf16 %v1071_v47, %v1071_v47  ;;  %v980_v31 = vadd.f32 %v1711_v52, %v616_v50  ;;  %v1930_v1 = vpop.f32.mrb[6].mxu1  ;;  %v610_v11 = vpop.f32.mrb[7].mxu0 }
  0xf1   : > { %v736_v41 = vadd.f32 %v2260_v28, %v735_v40  ;;  %v619_v44 = vadd.f32 %v1898_v4, %v2260_v28  ;;  %1394 = vst.msk [vmem:[%s2308_s5 + $0x8c] sm:$0xf] %vm1358_vm2, %v1668_v37  ;;  %1360 = vst.msk [vmem:[%s2308_s5 + $0x4] sm:$0xf] %vm1358_vm2, %v1634_v51  ;;  %v1012_v45 = vadd.f32 %v1775_v53, %v744_v30  ;;  %v738_v63 = vpop.f32.mrb[7].mxu1 }
  0xf2   : > { %v978_v34 = vadd.f32 %v1707_v56, %v608_v5  ;;  %v747_v46 = vadd.f32 %v1930_v1, %v2260_v28  ;;  %v611_v52 = vadd.f32 %v2260_v28, %v610_v11  ;;  %1392 = vst.msk [vmem:[%s2308_s5 + $0x84] sm:$0xf] %vm1358_vm2, %v1666_v7  ;;  %v1044_v12 = vmax.f32 %v980_v31, 0.0 }
  0xf3   : > { %v1010_v13 = vadd.f32 %v1771_v57, %v736_v41  ;;  %v981_v16 = vadd.f32 %v1712_v58, %v619_v44  ;;  %v739_v53 = vadd.f32 %v2260_v28, %v738_v63  ;;  %v1076_v23 = vmax.f32 %v1012_v45, 0.0 }
  0xf4   : > { %v1042_v10 = vmax.f32 %v978_v34, 0.0  ;;  %v1013_v56 = vadd.f32 %v1776_v59, %v747_v46  ;;  %v979_v35 = vadd.f32 %v1708_v62, %v611_v52  ;;  %v1639_v36 = vpack.c.bf16 %v1044_v12, %v1044_v12 }
  0xf5   : > { %v1074_v47 = vmax.f32 %v1010_v13, 0.0  ;;  %v1045_v50 = vmax.f32 %v981_v16, 0.0  ;;  %v2620_v57 = vunpack.c.h.bf16 %v2145_v43  ;;  %v1671_v0 = vpack.c.bf16 %v1076_v23, %v1076_v23  ;;  %v1901_v51 = vpop.f32.mrb[8].mxu0 }
  0xf6   : > { %v1637_v58 = vpack.c.bf16 %v1042_v10, %v1042_v10  ;;  %v1077_v19 = vmax.f32 %v1013_v56, 0.0  ;;  %v1043_v37 = vmax.f32 %v979_v35, 0.0  ;;  %1365 = vst.msk [vmem:[%s2308_s5 + $0x18] sm:$0xf] %vm1358_vm2, %v1639_v36  ;;  %v632_v62 = vadd.f32 %v1901_v51, %v2260_v28  ;;  %v1933_v30 = vpop.f32.mrb[8].mxu1  ;;  %v623_v5 = vpop.f32.mrb[9].mxu0 }
  0xf7   : > { %v1011_v38 = vadd.f32 %v2620_v57, %v739_v53  ;;  %v1669_v39 = vpack.c.bf16 %v1074_v47, %v1074_v47  ;;  %v1640_v42 = vpack.c.bf16 %v1045_v50, %v1045_v50  ;;  %1397 = vst.msk [vmem:[%s2308_s5 + $0x98] sm:$0xf] %vm1358_vm2, %v1671_v0  ;;  %v760_v4 = vadd.f32 %v1933_v30, %v2260_v28  ;;  %v751_v31 = vpop.f32.mrb[9].mxu1  ;;  %v1902_v41 = vpop.f32.mrb[10].mxu0 }
  0xf8   : > { %1363 = vst.msk [vmem:[%s2308_s5 + $0x10] sm:$0xf] %vm1358_vm2, %v1637_v58  ;;  %v1672_v43 = vpack.c.bf16 %v1077_v19, %v1077_v19  ;;  %v1638_v40 = vpack.c.bf16 %v1043_v37, %v1043_v37  ;;  %v624_v7 = vadd.f32 %v2260_v28, %v623_v5  ;;  %v2621_v1 = vunpack.c.l.bf16 %v2152_v48  ;;  %v1934_v46 = vpop.f32.mrb[10].mxu1  ;;  %v626_v52 = vpop.f32.mrb[11].mxu0 }
  0xf9   : > { %v1075_v59 = vmax.f32 %v1011_v38, 0.0  ;;  %1395 = vst.msk [vmem:[%s2308_s5 + $0x90] sm:$0xf] %vm1358_vm2, %v1669_v39  ;;  %1366 = vst.msk [vmem:[%s2308_s5 + $0x1c] sm:$0xf] %vm1358_vm2, %v1640_v42  ;;  %v752_v45 = vadd.f32 %v2260_v28, %v751_v31  ;;  %v635_v34 = vadd.f32 %v1902_v41, %v2260_v28  ;;  %v2622_v63 = vunpack.c.l.bf16 %v2155_v49  ;;  %v754_v10 = vpop.f32.mrb[11].mxu1 }
  0xfa   : > { %v984_v11 = vadd.f32 %v2621_v1, %v632_v62  ;;  %1398 = vst.msk [vmem:[%s2308_s5 + $0x9c] sm:$0xf] %vm1358_vm2, %v1672_v43  ;;  %1364 = vst.msk [vmem:[%s2308_s5 + $0x14] sm:$0xf] %vm1358_vm2, %v1638_v40  ;;  %v2623_v13 = vunpack.c.l.bf16 %v2162_v54  ;;  %v763_v53 = vadd.f32 %v1934_v46, %v2260_v28  ;;  %v627_v23 = vadd.f32 %v2260_v28, %v626_v52 }
  0xfb   : > { %v1670_v44 = vpack.c.bf16 %v1075_v59, %v1075_v59  ;;  %v1016_v12 = vadd.f32 %v2622_v63, %v760_v4  ;;  %v2624_v35 = vunpack.c.l.bf16 %v2165_v55  ;;  %v2625_v47 = vunpack.c.h.bf16 %v2152_v48 }
  0xfc   : > { %v982_v16 = vadd.f32 %v2623_v13, %v624_v7  ;;  %v1048_v56 = vmax.f32 %v984_v11, 0.0  ;;  %v755_v57 = vadd.f32 %v2260_v28, %v754_v10  ;;  %v2626_v58 = vunpack.c.h.bf16 %v2155_v49 }
  0xfd   : > { %1396 = vst.msk [vmem:[%s2308_s5 + $0x94] sm:$0xf] %vm1358_vm2, %v1670_v44  ;;  %v1014_v36 = vadd.f32 %v2624_v35, %v752_v45  ;;  %v985_v50 = vadd.f32 %v2625_v47, %v635_v34  ;;  %v1080_v38 = vmax.f32 %v1016_v12, 0.0  ;;  %v2627_v37 = vunpack.c.h.bf16 %v2162_v54  ;;  %v1905_v4 = vpop.f32.mrb[12].mxu0 }
  0xfe   : > { %v1046_v0 = vmax.f32 %v982_v16, 0.0  ;;  %v1017_v19 = vadd.f32 %v2626_v58, %v763_v53  ;;  %v1643_v39 = vpack.c.bf16 %v1048_v56, %v1048_v56  ;;  %v2628_v62 = vunpack.c.h.bf16 %v2165_v55  ;;  %v1937_v41 = vpop.f32.mrb[12].mxu1  ;;  %v639_v44 = vpop.f32.mrb[13].mxu0 }
  0xff   : > { %v983_v51 = vadd.f32 %v2627_v37, %v627_v23  ;;  %v1078_v42 = vmax.f32 %v1014_v36, 0.0  ;;  %v1049_v59 = vmax.f32 %v985_v50, 0.0  ;;  %v1675_v30 = vpack.c.bf16 %v1080_v38, %v1080_v38  ;;  %v767_v34 = vpop.f32.mrb[13].mxu1  ;;  %v1906_v46 = vpop.f32.mrb[14].mxu0 }
 0x100   : > { %v1015_v48 = vadd.f32 %v2628_v62, %v755_v57  ;;  %v1641_v5 = vpack.c.bf16 %v1046_v0, %v1046_v0  ;;  %v1081_v43 = vmax.f32 %v1017_v19, 0.0  ;;  %1369 = vst.msk [vmem:[%s2308_s5 + $0x28] sm:$0xf] %vm1358_vm2, %v1643_v39  ;;  %v648_v31 = vadd.f32 %v1905_v4, %v2260_v28  ;;  %v1938_v53 = vpop.f32.mrb[14].mxu1  ;;  %v642_v23 = vpop.f32.mrb[15].mxu0 }
 0x101   : > { %v1047_v40 = vmax.f32 %v983_v51, 0.0  ;;  %v1673_v49 = vpack.c.bf16 %v1078_v42, %v1078_v42  ;;  %v1644_v54 = vpack.c.bf16 %v1049_v59, %v1049_v59  ;;  %1401 = vst.msk [vmem:[%s2308_s5 + $0xa8] sm:$0xf] %vm1358_vm2, %v1675_v30  ;;  %v776_v11 = vadd.f32 %v1937_v41, %v2260_v28  ;;  %v770_v57 = vpop.f32.mrb[15].mxu1 }
 0x102   : > { %v1079_v7 = vmax.f32 %v1015_v48, 0.0  ;;  %1367 = vst.msk [vmem:[%s2308_s5 + $0x20] sm:$0xf] %vm1358_vm2, %v1641_v5  ;;  %v1676_v55 = vpack.c.bf16 %v1081_v43, %v1081_v43  ;;  %v640_v45 = vadd.f32 %v2260_v28, %v639_v44  ;;  %v2629_v63 = vunpack.c.l.bf16 %v2172_v60 }
 0x103   : > { %v1642_v1 = vpack.c.bf16 %v1047_v40, %v1047_v40  ;;  %1399 = vst.msk [vmem:[%s2308_s5 + $0xa0] sm:$0xf] %vm1358_vm2, %v1673_v49  ;;  %1370 = vst.msk [vmem:[%s2308_s5 + $0x2c] sm:$0xf] %vm1358_vm2, %v1644_v54  ;;  %v768_v13 = vadd.f32 %v2260_v28, %v767_v34  ;;  %v651_v16 = vadd.f32 %v1906_v46, %v2260_v28  ;;  %v2630_v10 = vunpack.c.l.bf16 %v2175_v61 }
 0x104   : > { %v1674_v52 = vpack.c.bf16 %v1079_v7, %v1079_v7  ;;  %v988_v12 = vadd.f32 %v2629_v63, %v648_v31  ;;  %1402 = vst.msk [vmem:[%s2308_s5 + $0xac] sm:$0xf] %vm1358_vm2, %v1676_v55  ;;  %v2631_v35 = vunpack.c.l.bf16 %v2182_v2  ;;  %v779_v47 = vadd.f32 %v1938_v53, %v2260_v28 }
 0x105   : > { %1368 = vst.msk [vmem:[%s2308_s5 + $0x24] sm:$0xf] %vm1358_vm2, %v1642_v1  ;;  %v1020_v56 = vadd.f32 %v2630_v10, %v776_v11  ;;  %v643_v50 = vadd.f32 %v2260_v28, %v642_v23  ;;  %v2632_v0 = vunpack.c.l.bf16 %v2185_v3  ;;  %v2633_v19 = vunpack.c.h.bf16 %v2172_v60  ;;  %v1909_v41 = vpop.f32.mrb[16].mxu0 }
 0x106   : > { %v986_v36 = vadd.f32 %v2631_v35, %v640_v45  ;;  %1400 = vst.msk [vmem:[%s2308_s5 + $0xa4] sm:$0xf] %vm1358_vm2, %v1674_v52  ;;  %v1052_v38 = vmax.f32 %v988_v12, 0.0  ;;  %v771_v51 = vadd.f32 %v2260_v28, %v770_v57  ;;  %v2634_v59 = vunpack.c.h.bf16 %v2175_v61  ;;  %v1941_v1 = vpop.f32.mrb[16].mxu1  ;;  %v655_v11 = vpop.f32.mrb[17].mxu0 }
 0x107   : > { %v1018_v58 = vadd.f32 %v2632_v0, %v768_v13  ;;  %v989_v37 = vadd.f32 %v2633_v19, %v651_v16  ;;  %v1084_v39 = vmax.f32 %v1020_v56, 0.0  ;;  %v2635_v48 = vunpack.c.h.bf16 %v2182_v2  ;;  %v783_v52 = vpop.f32.mrb[17].mxu1  ;;  %v1910_v63 = vpop.f32.mrb[18].mxu0 }
 0x108   : > { %v1050_v42 = vmax.f32 %v986_v36, 0.0  ;;  %v1021_v62 = vadd.f32 %v2634_v59, %v779_v47  ;;  %v1647_v5 = vpack.c.bf16 %v1052_v38, %v1052_v38  ;;  %v2636_v4 = vunpack.c.h.bf16 %v2185_v3  ;;  %v1942_v10 = vpop.f32.mrb[18].mxu1  ;;  %v658_v56 = vpop.f32.mrb[19].mxu0 }
 0x109   : > { %v987_v30 = vadd.f32 %v2635_v48, %v643_v50  ;;  %v1082_v43 = vmax.f32 %v1018_v58, 0.0  ;;  %v1053_v40 = vmax.f32 %v989_v37, 0.0  ;;  %v1679_v49 = vpack.c.bf16 %v1084_v39, %v1084_v39  ;;  %v786_v0 = vpop.f32.mrb[19].mxu1 }
 0x10a   : > { %v1019_v60 = vadd.f32 %v2636_v4, %v771_v51  ;;  %v1645_v54 = vpack.c.bf16 %v1050_v42, %v1050_v42  ;;  %v1085_v7 = vmax.f32 %v1021_v62, 0.0  ;;  %1373 = vst.msk [vmem:[%s2308_s5 + $0x38] sm:$0xf] %vm1358_vm2, %v1647_v5  ;;  %v664_v55 = vadd.f32 %v1909_v41, %v2260_v28 }
 0x10b   : > { %v1051_v31 = vmax.f32 %v987_v30, 0.0  ;;  %v1677_v61 = vpack.c.bf16 %v1082_v43, %v1082_v43  ;;  %v1648_v2 = vpack.c.bf16 %v1053_v40, %v1053_v40  ;;  %1405 = vst.msk [vmem:[%s2308_s5 + $0xb8] sm:$0xf] %vm1358_vm2, %v1679_v49  ;;  %v792_v34 = vadd.f32 %v1941_v1, %v2260_v28 }
 0x10c   : > { %v1083_v44 = vmax.f32 %v1019_v60, 0.0  ;;  %1371 = vst.msk [vmem:[%s2308_s5 + $0x30] sm:$0xf] %vm1358_vm2, %v1645_v54  ;;  %v1680_v3 = vpack.c.bf16 %v1085_v7, %v1085_v7  ;;  %v656_v46 = vadd.f32 %v2260_v28, %v655_v11  ;;  %v2637_v13 = vunpack.c.l.bf16 %v2192_v8 }
 0x10d   : > { %v1646_v45 = vpack.c.bf16 %v1051_v31, %v1051_v31  ;;  %1403 = vst.msk [vmem:[%s2308_s5 + $0xb0] sm:$0xf] %vm1358_vm2, %v1677_v61  ;;  %1374 = vst.msk [vmem:[%s2308_s5 + $0x3c] sm:$0xf] %vm1358_vm2, %v1648_v2  ;;  %v784_v53 = vadd.f32 %v2260_v28, %v783_v52  ;;  %v667_v23 = vadd.f32 %v1910_v63, %v2260_v28  ;;  %v2638_v35 = vunpack.c.l.bf16 %v2195_v9  ;;  %v1913_v61 = vpop.f32.mrb[20].mxu0 }
 0x10e   : > { %v1678_v12 = vpack.c.bf16 %v1083_v44, %v1083_v44  ;;  %v992_v16 = vadd.f32 %v2637_v13, %v664_v55  ;;  %1406 = vst.msk [vmem:[%s2308_s5 + $0xbc] sm:$0xf] %vm1358_vm2, %v1680_v3  ;;  %v2639_v47 = vunpack.c.l.bf16 %v2202_v14  ;;  %v795_v57 = vadd.f32 %v1942_v10, %v2260_v28  ;;  %v1945_v55 = vpop.f32.mrb[20].mxu1  ;;  %v671_v1 = vpop.f32.mrb[21].mxu0 }
 0x10f   : > { %1372 = vst.msk [vmem:[%s2308_s5 + $0x34] sm:$0xf] %vm1358_vm2, %v1646_v45  ;;  %v1024_v36 = vadd.f32 %v2638_v35, %v792_v34  ;;  %v659_v38 = vadd.f32 %v2260_v28, %v658_v56  ;;  %v2640_v19 = vunpack.c.l.bf16 %v2205_v15  ;;  %v2641_v51 = vunpack.c.h.bf16 %v2192_v8  ;;  %v799_v34 = vpop.f32.mrb[21].mxu1 }
 0x110   : > { %v990_v50 = vadd.f32 %v2639_v47, %v656_v46  ;;  %1404 = vst.msk [vmem:[%s2308_s5 + $0xb4] sm:$0xf] %vm1358_vm2, %v1678_v12  ;;  %v1056_v58 = vmax.f32 %v992_v16, 0.0  ;;  %v787_v42 = vadd.f32 %v2260_v28, %v786_v0  ;;  %v2642_v48 = vunpack.c.h.bf16 %v2195_v9  ;;  %v1914_v46 = vpop.f32.mrb[22].mxu0 }
 0x111   : > { %v1022_v37 = vadd.f32 %v2640_v19, %v784_v53  ;;  %v993_v39 = vadd.f32 %v2641_v51, %v667_v23  ;;  %v1088_v59 = vmax.f32 %v1024_v36, 0.0  ;;  %v2643_v5 = vunpack.c.h.bf16 %v2202_v14  ;;  %v1946_v53 = vpop.f32.mrb[22].mxu1  ;;  %v674_v23 = vpop.f32.mrb[23].mxu0 }
 0x112   : > { %v1054_v62 = vmax.f32 %v990_v50, 0.0  ;;  %v1025_v30 = vadd.f32 %v2642_v48, %v795_v57  ;;  %v1651_v40 = vpack.c.bf16 %v1056_v58, %v1056_v58  ;;  %v2644_v49 = vunpack.c.h.bf16 %v2205_v15  ;;  %v802_v57 = vpop.f32.mrb[23].mxu1 }
 0x113   : > { %v991_v43 = vadd.f32 %v2643_v5, %v659_v38  ;;  %v1086_v4 = vmax.f32 %v1022_v37, 0.0  ;;  %v1057_v60 = vmax.f32 %v993_v39, 0.0  ;;  %v1683_v54 = vpack.c.bf16 %v1088_v59, %v1088_v59 }
 0x114   : > { %v1023_v8 = vadd.f32 %v2644_v49, %v787_v42  ;;  %v1649_v7 = vpack.c.bf16 %v1054_v62, %v1054_v62  ;;  %v1089_v31 = vmax.f32 %v1025_v30, 0.0  ;;  %1377 = vst.msk [vmem:[%s2308_s5 + $0x48] sm:$0xf] %vm1358_vm2, %v1651_v40  ;;  %v680_v44 = vadd.f32 %v1913_v61, %v2260_v28 }
 0x115   : > { %v1055_v41 = vmax.f32 %v991_v43, 0.0  ;;  %v1681_v9 = vpack.c.bf16 %v1086_v4, %v1086_v4  ;;  %v1652_v14 = vpack.c.bf16 %v1057_v60, %v1057_v60  ;;  %1409 = vst.msk [vmem:[%s2308_s5 + $0xc8] sm:$0xf] %vm1358_vm2, %v1683_v54  ;;  %v808_v3 = vadd.f32 %v1945_v55, %v2260_v28 }
 0x116   : > { %v1087_v2 = vmax.f32 %v1023_v8, 0.0  ;;  %1375 = vst.msk [vmem:[%s2308_s5 + $0x40] sm:$0xf] %vm1358_vm2, %v1649_v7  ;;  %v1684_v15 = vpack.c.bf16 %v1089_v31, %v1089_v31  ;;  %v672_v45 = vadd.f32 %v2260_v28, %v671_v1  ;;  %v2645_v63 = vunpack.c.l.bf16 %v2212_v20  ;;  %v1917_v7 = vpop.f32.mrb[24].mxu0  ;;  %v1949_v61 = vpop.f32.mrb[24].mxu1 }
 0x117   : > { %v1650_v11 = vpack.c.bf16 %v1055_v41, %v1055_v41  ;;  %1407 = vst.msk [vmem:[%s2308_s5 + $0xc0] sm:$0xf] %vm1358_vm2, %v1681_v9  ;;  %1378 = vst.msk [vmem:[%s2308_s5 + $0x4c] sm:$0xf] %vm1358_vm2, %v1652_v14  ;;  %v800_v13 = vadd.f32 %v2260_v28, %v799_v34  ;;  %v683_v16 = vadd.f32 %v1914_v46, %v2260_v28  ;;  %v2646_v10 = vunpack.c.l.bf16 %v2215_v21  ;;  %v687_v9 = vpop.f32.mrb[25].mxu0  ;;  %v815_v55 = vpop.f32.mrb[25].mxu1 }
 0x118   : > { %v1682_v52 = vpack.c.bf16 %v1087_v2, %v1087_v2  ;;  %v996_v12 = vadd.f32 %v2645_v63, %v680_v44  ;;  %1410 = vst.msk [vmem:[%s2308_s5 + $0xcc] sm:$0xf] %vm1358_vm2, %v1684_v15  ;;  %v2647_v35 = vunpack.c.l.bf16 %v2222_v26  ;;  %v811_v47 = vadd.f32 %v1946_v53, %v2260_v28  ;;  %v1918_v1 = vpop.f32.mrb[26].mxu0  ;;  %v1950_v46 = vpop.f32.mrb[26].mxu1 }
 0x119   : > { %1376 = vst.msk [vmem:[%s2308_s5 + $0x44] sm:$0xf] %vm1358_vm2, %v1650_v11  ;;  %v1028_v56 = vadd.f32 %v2646_v10, %v808_v3  ;;  %v675_v50 = vadd.f32 %v2260_v28, %v674_v23  ;;  %v2648_v0 = vunpack.c.l.bf16 %v2225_v27  ;;  %v2649_v19 = vunpack.c.h.bf16 %v2212_v20  ;;  %v818_v10 = vpop.f32.mrb[27].mxu1 }
 0x11a   : > { %v994_v36 = vadd.f32 %v2647_v35, %v672_v45  ;;  %1408 = vst.msk [vmem:[%s2308_s5 + $0xc4] sm:$0xf] %vm1358_vm2, %v1682_v52  ;;  %v1060_v38 = vmax.f32 %v996_v12, 0.0  ;;  %v803_v51 = vadd.f32 %v2260_v28, %v802_v57  ;;  %v2650_v59 = vunpack.c.h.bf16 %v2215_v21  ;;  %v690_v52 = vpop.f32.mrb[27].mxu0 }
 0x11b   : > { %v1026_v58 = vadd.f32 %v2648_v0, %v800_v13  ;;  %v997_v37 = vadd.f32 %v2649_v19, %v683_v16  ;;  %v1092_v39 = vmax.f32 %v1028_v56, 0.0  ;;  %v2651_v48 = vunpack.c.h.bf16 %v2222_v26 }
 0x11c   : > { %v1058_v42 = vmax.f32 %v994_v36, 0.0  ;;  %v1029_v62 = vadd.f32 %v2650_v59, %v811_v47  ;;  %v1655_v5 = vpack.c.bf16 %v1060_v38, %v1060_v38  ;;  %v2652_v4 = vunpack.c.h.bf16 %v2225_v27 }
 0x11d   : > { %v995_v30 = vadd.f32 %v2651_v48, %v675_v50  ;;  %v1090_v43 = vmax.f32 %v1026_v58, 0.0  ;;  %v1061_v40 = vmax.f32 %v997_v37, 0.0  ;;  %v1687_v60 = vpack.c.bf16 %v1092_v39, %v1092_v39 }
 0x11e   : > { %v1027_v20 = vadd.f32 %v2652_v4, %v803_v51  ;;  %v1653_v49 = vpack.c.bf16 %v1058_v42, %v1058_v42  ;;  %v1093_v8 = vmax.f32 %v1029_v62, 0.0  ;;  %1381 = vst.msk [vmem:[%s2308_s5 + $0x58] sm:$0xf] %vm1358_vm2, %v1655_v5  ;;  %v696_v41 = vadd.f32 %v1917_v7, %v2260_v28 }
 0x11f   : > { %v1059_v54 = vmax.f32 %v995_v30, 0.0  ;;  %v1685_v21 = vpack.c.bf16 %v1090_v43, %v1090_v43  ;;  %v1656_v26 = vpack.c.bf16 %v1061_v40, %v1061_v40  ;;  %1413 = vst.msk [vmem:[%s2308_s5 + $0xd8] sm:$0xf] %vm1358_vm2, %v1687_v60  ;;  %v824_v2 = vadd.f32 %v1949_v61, %v2260_v28  ;;  %v1921_v40 = vpop.f32.mrb[28].mxu0  ;;  %v1953_v60 = vpop.f32.mrb[28].mxu1 }
 0x120   : > { %v1091_v31 = vmax.f32 %v1027_v20, 0.0  ;;  %1379 = vst.msk [vmem:[%s2308_s5 + $0x50] sm:$0xf] %vm1358_vm2, %v1653_v49  ;;  %v1688_v27 = vpack.c.bf16 %v1093_v8, %v1093_v8  ;;  %v688_v44 = vadd.f32 %v2260_v28, %v687_v9  ;;  %v2653_v11 = vunpack.c.l.bf16 %v2232_v32  ;;  %v703_v49 = vpop.f32.mrb[29].mxu0 }
 0x121   : > { %v1654_v14 = vpack.c.bf16 %v1059_v54, %v1059_v54  ;;  %1411 = vst.msk [vmem:[%s2308_s5 + $0xd0] sm:$0xf] %vm1358_vm2, %v1685_v21  ;;  %1382 = vst.msk [vmem:[%s2308_s5 + $0x5c] sm:$0xf] %vm1358_vm2, %v1656_v26  ;;  %v816_v45 = vadd.f32 %v2260_v28, %v815_v55  ;;  %v699_v34 = vadd.f32 %v1918_v1, %v2260_v28  ;;  %v2654_v63 = vunpack.c.l.bf16 %v2235_v33  ;;  %v831_v21 = vpop.f32.mrb[29].mxu1  ;;  %v1922_v26 = vpop.f32.mrb[30].mxu0 }
 0x122   : > { %v1686_v15 = vpack.c.bf16 %v1091_v31, %v1091_v31  ;;  %v1000_v3 = vadd.f32 %v2653_v11, %v696_v41  ;;  %1414 = vst.msk [vmem:[%s2308_s5 + $0xdc] sm:$0xf] %vm1358_vm2, %v1688_v27  ;;  %v2655_v13 = vunpack.c.l.bf16 %v2242_v29  ;;  %v827_v53 = vadd.f32 %v1950_v46, %v2260_v28 }
 0x123   : > { %1380 = vst.msk [vmem:[%s2308_s5 + $0x54] sm:$0xf] %vm1358_vm2, %v1654_v14  ;;  %v1032_v12 = vadd.f32 %v2654_v63, %v824_v2  ;;  %v691_v23 = vadd.f32 %v2260_v28, %v690_v52  ;;  %v2656_v35 = vunpack.c.l.bf16 %v2245_v22  ;;  %v2657_v47 = vunpack.c.h.bf16 %v2232_v32  ;;  %v1954_v14 = vpop.f32.mrb[30].mxu1  ;;  %v706_v2 = vpop.f32.mrb[31].mxu0 }
 0x124   : > { %v998_v16 = vadd.f32 %v2655_v13, %v688_v44  ;;  %1412 = vst.msk [vmem:[%s2308_s5 + $0xd4] sm:$0xf] %vm1358_vm2, %v1686_v15  ;;  %v1064_v56 = vmax.f32 %v1000_v3, 0.0  ;;  %v819_v57 = vadd.f32 %v2260_v28, %v818_v10  ;;  %v2658_v58 = vunpack.c.h.bf16 %v2235_v33 }
 0x125   : > { %v1030_v36 = vadd.f32 %v2656_v35, %v816_v45  ;;  %v1001_v50 = vadd.f32 %v2657_v47, %v699_v34  ;;  %v1096_v38 = vmax.f32 %v1032_v12, 0.0  ;;  %v2659_v37 = vunpack.c.h.bf16 %v2242_v29  ;;  %v834_v45 = vpop.f32.mrb[31].mxu1 }
 0x126   : > { %v1062_v0 = vmax.f32 %v998_v16, 0.0  ;;  %v1033_v19 = vadd.f32 %v2658_v58, %v827_v53  ;;  %v1659_v39 = vpack.c.bf16 %v1064_v56, %v1064_v56  ;;  %v2660_v62 = vunpack.c.h.bf16 %v2245_v22 }
 0x127   : > { %v999_v51 = vadd.f32 %v2659_v37, %v691_v23  ;;  %v1094_v42 = vmax.f32 %v1030_v36, 0.0  ;;  %v1065_v59 = vmax.f32 %v1001_v50, 0.0  ;;  %v1691_v48 = vpack.c.bf16 %v1096_v38, %v1096_v38 }
 0x128   : > { %v1031_v32 = vadd.f32 %v2660_v62, %v819_v57  ;;  %v1657_v30 = vpack.c.bf16 %v1062_v0, %v1062_v0  ;;  %v1097_v5 = vmax.f32 %v1033_v19, 0.0  ;;  %1385 = vst.msk [vmem:[%s2308_s5 + $0x68] sm:$0xf] %vm1358_vm2, %v1659_v39  ;;  %v712_v20 = vadd.f32 %v1921_v40, %v2260_v28 }
 0x129   : > { %v1063_v43 = vmax.f32 %v999_v51, 0.0  ;;  %v1689_v33 = vpack.c.bf16 %v1094_v42, %v1094_v42  ;;  %v1660_v29 = vpack.c.bf16 %v1065_v59, %v1065_v59  ;;  %1417 = vst.msk [vmem:[%s2308_s5 + $0xe8] sm:$0xf] %vm1358_vm2, %v1691_v48  ;;  %v840_v54 = vadd.f32 %v1953_v60, %v2260_v28 }
 0x12a   : > { %v1095_v4 = vmax.f32 %v1031_v32, 0.0  ;;  %1383 = vst.msk [vmem:[%s2308_s5 + $0x60] sm:$0xf] %vm1358_vm2, %v1657_v30  ;;  %v1692_v22 = vpack.c.bf16 %v1097_v5, %v1097_v5  ;;  %v704_v7 = vadd.f32 %v2260_v28, %v703_v49  ;;  %v2661_v41 = vunpack.c.l.bf16 %v2252_v18 }
 0x12b   : > { %v1658_v8 = vpack.c.bf16 %v1063_v43, %v1063_v43  ;;  %1415 = vst.msk [vmem:[%s2308_s5 + $0xe0] sm:$0xf] %vm1358_vm2, %v1689_v33  ;;  %1386 = vst.msk [vmem:[%s2308_s5 + $0x6c] sm:$0xf] %vm1358_vm2, %v1660_v29  ;;  %v832_v9 = vadd.f32 %v2260_v28, %v831_v21  ;;  %v715_v27 = vadd.f32 %v1922_v26, %v2260_v28  ;;  %v2662_v44 = vunpack.c.l.bf16 %v2255_v24 }
 0x12c   : > { %v1690_v31 = vpack.c.bf16 %v1095_v4, %v1095_v4  ;;  %v1004_v61 = vadd.f32 %v2661_v41, %v712_v20  ;;  %1418 = vst.msk [vmem:[%s2308_s5 + $0xec] sm:$0xf] %vm1358_vm2, %v1692_v22  ;;  %v2663_v1 = vunpack.c.l.bf16 %v2267_v17  ;;  %v843_v11 = vadd.f32 %v1954_v14, %v2260_v28 }
 0x12d   : > { %1384 = vst.msk [vmem:[%s2308_s5 + $0x64] sm:$0xf] %vm1358_vm2, %v1658_v8  ;;  %v1036_v55 = vadd.f32 %v2662_v44, %v840_v54  ;;  %v707_v3 = vadd.f32 %v2260_v28, %v706_v2  ;;  %v2664_v46 = vunpack.c.l.bf16 %v2270_v25  ;;  %v2665_v63 = vunpack.c.h.bf16 %v2252_v18 }
 0x12e   : > { %v1002_v15 = vadd.f32 %v2663_v1, %v704_v7  ;;  %1416 = vst.msk [vmem:[%s2308_s5 + $0xe4] sm:$0xf] %vm1358_vm2, %v1690_v31  ;;  %v1068_v34 = vmax.f32 %v1004_v61, 0.0  ;;  %v835_v13 = vadd.f32 %v2260_v28, %v834_v45  ;;  %v2666_v23 = vunpack.c.h.bf16 %v2255_v24 }
 0x12f   : > { %v1034_v52 = vadd.f32 %v2664_v46, %v832_v9  ;;  %v1005_v12 = vadd.f32 %v2665_v63, %v715_v27  ;;  %v1100_v16 = vmax.f32 %v1036_v55, 0.0  ;;  %v2667_v56 = vunpack.c.h.bf16 %v2267_v17 }
 0x130   : > { %v1066_v53 = vmax.f32 %v1002_v15, 0.0  ;;  %v1037_v10 = vadd.f32 %v2666_v23, %v843_v11  ;;  %v1663_v36 = vpack.c.bf16 %v1068_v34, %v1068_v34  ;;  %v1035_v18 = vadd.f32 %v1820_v6, %v835_v13 }
 0x131   : > { %v1003_v35 = vadd.f32 %v2667_v56, %v707_v3  ;;  %v1098_v47 = vmax.f32 %v1034_v52, 0.0  ;;  %v1069_v50 = vmax.f32 %v1005_v12, 0.0  ;;  %v1695_v28 = vpack.c.bf16 %v1100_v16, %v1100_v16 }
 0x132   : > { %v1661_v57 = vpack.c.bf16 %v1066_v53, %v1066_v53  ;;  %v1101_v38 = vmax.f32 %v1037_v10, 0.0  ;;  %1389 = vst.msk [vmem:[%s2308_s5 + $0x78] sm:$0xf] %vm1358_vm2, %v1663_v36  ;;  %v1099_v58 = vmax.f32 %v1035_v18, 0.0 }
 0x133   : > { %v1067_v24 = vmax.f32 %v1003_v35, 0.0  ;;  %v1693_v0 = vpack.c.bf16 %v1098_v47, %v1098_v47  ;;  %v1664_v17 = vpack.c.bf16 %v1069_v50, %v1069_v50  ;;  %1421 = vst.msk [vmem:[%s2308_s5 + $0xf8] sm:$0xf] %vm1358_vm2, %v1695_v28 }
 0x134   : > { %1387 = vst.msk [vmem:[%s2308_s5 + $0x70] sm:$0xf] %vm1358_vm2, %v1661_v57  ;;  %v1696_v19 = vpack.c.bf16 %v1101_v38, %v1101_v38  ;;  %v1694_v25 = vpack.c.bf16 %v1099_v58, %v1099_v58 }
 0x135   : > { %v1662_v37 = vpack.c.bf16 %v1067_v24, %v1067_v24  ;;  %1419 = vst.msk [vmem:[%s2308_s5 + $0xf0] sm:$0xf] %vm1358_vm2, %v1693_v0  ;;  %1390 = vst.msk [vmem:[%s2308_s5 + $0x7c] sm:$0xf] %vm1358_vm2, %v1664_v17 }
 0x136   : > { %1422 = vst.msk [vmem:[%s2308_s5 + $0xfc] sm:$0xf] %vm1358_vm2, %v1696_v19  ;;  %1420 = vst.msk [vmem:[%s2308_s5 + $0xf4] sm:$0xf] %vm1358_vm2, %v1694_v25 }
 0x137   : > { %1388 = vst.msk [vmem:[%s2308_s5 + $0x74] sm:$0xf] %vm1358_vm2, %v1662_v37 }
 0x138 PF: > { %s14_s15 = sadd.s32 1, %s2005_s15  }
 0x139   : > { %p11_p4 = scmp.ge.s32.totalorder %s14_s15, 4  }
 0x13b   :  { %13 = sbr.rel (!%p11_p4) target bundleno = 1 (0x1), region = 69 }

</bundles_post_ra>
